<compile_context>
chip_gen: v7x
topology: tpu7x:2x2x1
jax: 0.10.0
libtpu: 0.0.40
codegen_flags: <defaults>
</compile_context>

<pallas_src>
import functools

import jax
import jax.numpy as jnp
from jax import lax
from jax.experimental import pallas as pl
from jax.experimental.pallas import tpu as pltpu

BN_EPS = 1e-5
VMEM_LIMIT = 32 * 1024 * 1024   # conservative; fits v7x's 64 MiB physical VMEM


# ----------------------------------------------------------------------------
# Pallas kernel: fused dilated 3x3 conv (block-Toeplitz) + folded BN + ReLU
# ----------------------------------------------------------------------------

def _conv_kernel(x_ref, w_ref, b_ref, o_ref, *, H, d):
    """One batch element per grid step.

    x_ref : (Hp, Wp*C)        bf16  padded input image (lane-dense)
    w_ref : (3, Wp*C, W*Cout) bf16  per-row-tap block-Toeplitz weights
    b_ref : (1, W*Cout)       f32   folded bias tiled over W
    o_ref : (H, W*Cout)       bf16  lane-dense output
    """
    acc = jnp.dot(x_ref[0:H, :], w_ref[0],
                  preferred_element_type=jnp.float32)
    acc = acc + jnp.dot(x_ref[d:d + H, :], w_ref[1],
                        preferred_element_type=jnp.float32)
    acc = acc + jnp.dot(x_ref[2 * d:2 * d + H, :], w_ref[2],
                        preferred_element_type=jnp.float32)
    o_ref[...] = jnp.maximum(acc + b_ref[...], 0.0).astype(o_ref.dtype)


def _build_bigw(wk, W, Wp, C, Cout, d):
    """Block-Toeplitz weights BigW[i] (Wp*C, W*Cout) from wk (3,3,C,Cout).

    BigW[i, (w + j*d)*C + c, w*Cout + co] = wk[i, j, c, co]
    (constant-folded by XLA when params are jit constants).
    """
    wp = jnp.arange(Wp)
    w = jnp.arange(W)
    j = jnp.arange(3)
    sel = (wp[None, :, None] ==
           (w[None, None, :] + j[:, None, None] * d)).astype(wk.dtype)  # (3,Wp,W)
    big = jnp.einsum('jpw,ijcn->ipcwn', sel, wk)           # (3, Wp, C, W, Cout)
    return big.reshape(3, Wp * C, W * Cout).astype(jnp.bfloat16)


def _fused_conv3x3(x, wk, bias, Cout, d):
    """x: (B,H,W,C) float; wk: (3,3,C,Cout) f32 (BN-scaled); bias: (Cout,) f32."""
    B, H, W, C = x.shape
    Hp, Wp = H + 2 * d, W + 2 * d

    xpad = jnp.pad(x.astype(jnp.bfloat16), ((0, 0), (d, d), (d, d), (0, 0)))
    xpad = xpad.reshape(B, Hp, Wp * C)                     # lane-dense slab
    bigw = _build_bigw(wk, W, Wp, C, Cout, d)
    brow = jnp.tile(bias.astype(jnp.float32), W).reshape(1, W * Cout)

    kern = functools.partial(_conv_kernel, H=H, d=d)
    out = pl.pallas_call(
        kern,
        out_shape=jax.ShapeDtypeStruct((B, H, W * Cout), jnp.bfloat16),
        grid=(B,),
        in_specs=[
            pl.BlockSpec((None, Hp, Wp * C), lambda b: (b, 0, 0)),      # image
            pl.BlockSpec((3, Wp * C, W * Cout), lambda b: (0, 0, 0)),   # weights
            pl.BlockSpec((1, W * Cout), lambda b: (0, 0)),              # bias
        ],
        out_specs=pl.BlockSpec((None, H, W * Cout), lambda b: (b, 0, 0)),
        compiler_params=pltpu.CompilerParams(
            dimension_semantics=("parallel",),
            vmem_limit_bytes=VMEM_LIMIT,
        ),
    )(xpad, bigw, brow)
    return out.reshape(B, H, W, Cout)                      # free contiguous split


# ----------------------------------------------------------------------------
# Layer wrappers: fold BN (and depthwise) into the dense MXU kernel
# ----------------------------------------------------------------------------

def rebnconv_pallas(p, x):
    d = p["dirate"]
    w = p["conv"]["w"]                                     # (Cout, Cin, 3, 3)
    Cout = w.shape[0]
    scale = p["bn"]["gamma"] * lax.rsqrt(p["bn"]["var"] + BN_EPS)
    bias = p["bn"]["beta"] - p["bn"]["mean"] * scale + p["conv"]["b"] * scale
    wk = (w * scale[:, None, None, None]).transpose(2, 3, 1, 0)  # (3,3,Cin,Cout)
    return _fused_conv3x3(x, wk, bias, Cout, d)


def bnredwsconv_pallas(p, x):
    d = p["dirate"]
    C = x.shape[-1]
    Cout = p["pw"]["w"].shape[0]
    assert p["dw"]["w"].shape[0] == C == Cout, "DWS fold assumes in_ch == out_ch"
    scale = p["bn"]["gamma"] * lax.rsqrt(p["bn"]["var"] + BN_EPS)
    wpw_s = p["pw"]["w"].reshape(Cout, C).T * scale[None, :]     # (C, Cout)
    bias = (p["dw"]["b"] @ wpw_s + p["pw"]["b"] * scale
            + p["bn"]["beta"] - p["bn"]["mean"] * scale)
    wdw = p["dw"]["w"].reshape(C, 3, 3).transpose(1, 2, 0)       # (3,3,C)
    wk = wdw[:, :, :, None] * wpw_s[None, None, :, :]            # (3,3,C,Cout)
    return _fused_conv3x3(x, wk, bias, Cout, d)


# ----------------------------------------------------------------------------
# Plain-JAX glue (NHWC): pooling, align_corners upsample, spatial attention
# ----------------------------------------------------------------------------

def maxpool2x2_ceil(x):
    B, H, W, C = x.shape
    Ho, Wo = -(-H // 2), -(-W // 2)
    xp = jnp.pad(x, ((0, 0), (0, Ho * 2 - H), (0, Wo * 2 - W), (0, 0)),
                 constant_values=-jnp.inf)
    return xp.reshape(B, Ho, 2, Wo, 2, C).max(axis=(2, 4))


def upsample_like(src, tar):
    """Bilinear resize with align_corners=True to tar's spatial size (NHWC)."""
    B, H, W, C = src.shape
    Ht, Wt = tar.shape[1], tar.shape[2]
    if (H, W) == (Ht, Wt):
        return src

    def coords(o, i):
        if o > 1 and i > 1:
            c = jnp.arange(o, dtype=jnp.float32) * ((i - 1) / (o - 1))
        else:
            c = jnp.zeros((o,), jnp.float32)
        i0 = jnp.clip(jnp.floor(c).astype(jnp.int32), 0, i - 1)
        i1 = jnp.clip(i0 + 1, 0, i - 1)
        return i0, i1, c - i0.astype(jnp.float32)

    y0, y1, fy = coords(Ht, H)
    x0, x1, fx = coords(Wt, W)
    r0 = jnp.take(src, y0, axis=1)
    r1 = jnp.take(src, y1, axis=1)
    g00 = jnp.take(r0, x0, axis=2)
    g01 = jnp.take(r0, x1, axis=2)
    g10 = jnp.take(r1, x0, axis=2)
    g11 = jnp.take(r1, x1, axis=2)
    fx_ = fx[None, None, :, None]
    fy_ = fy[None, :, None, None]
    top = g00 * (1.0 - fx_) + g01 * fx_
    bot = g10 * (1.0 - fx_) + g11 * fx_
    return top * (1.0 - fy_) + bot * fy_


def spatial_attention(p, x):
    # Cout=1 7x7 conv: left to XLA (an N=1 matmul would waste the MXU lanes).
    avg = jnp.mean(x, axis=-1, keepdims=True)
    mx = jnp.max(x, axis=-1, keepdims=True)
    f = jnp.concatenate([avg, mx], axis=-1).astype(jnp.float32)   # (B,H,W,2)
    w_hwio = jnp.transpose(p["w"], (2, 3, 1, 0))                  # (7,7,2,1)
    y = lax.conv_general_dilated(
        f, w_hwio, window_strides=(1, 1), padding=((3, 3), (3, 3)),
        dimension_numbers=("NHWC", "HWIO", "NHWC"))
    return jax.nn.sigmoid(y)


# ----------------------------------------------------------------------------
# Pure-JAX (f32) reference conv layers, for numerical validation
# ----------------------------------------------------------------------------

def _bn_apply(bn, y):
    scale = bn["gamma"] * lax.rsqrt(bn["var"] + BN_EPS)
    return (y - bn["mean"]) * scale + bn["beta"]


def rebnconv_ref(p, x):
    d = p["dirate"]
    w = jnp.transpose(p["conv"]["w"], (2, 3, 1, 0))               # HWIO
    y = lax.conv_general_dilated(
        x, w, (1, 1), ((d, d), (d, d)), rhs_dilation=(d, d),
        dimension_numbers=("NHWC", "HWIO", "NHWC"))
    y = _bn_apply(p["bn"], y + p["conv"]["b"])
    return jnp.maximum(y, 0.0)


def bnredwsconv_ref(p, x):
    d = p["dirate"]
    C = x.shape[-1]
    wdw = jnp.transpose(p["dw"]["w"], (2, 3, 1, 0))               # (3,3,1,C)
    y = lax.conv_general_dilated(
        x, wdw, (1, 1), ((d, d), (d, d)), rhs_dilation=(d, d),
        dimension_numbers=("NHWC", "HWIO", "NHWC"), feature_group_count=C)
    y = y + p["dw"]["b"]
    wpw = jnp.transpose(p["pw"]["w"], (2, 3, 1, 0))               # (1,1,C,Cout)
    y = lax.conv_general_dilated(
        y, wpw, (1, 1), ((0, 0), (0, 0)),
        dimension_numbers=("NHWC", "HWIO", "NHWC"))
    y = _bn_apply(p["bn"], y + p["pw"]["b"])
    return jnp.maximum(y, 0.0)


# ----------------------------------------------------------------------------
# NUSUnit7S forward (shared topology; NHWC inside)
# ----------------------------------------------------------------------------

def unit_forward(p, x, dense_fn, dws_fn):
    hxin = dense_fn(p["conv1"], x)
    hx1 = dense_fn(p["conv2"], hxin)
    hx = maxpool2x2_ceil(hx1)
    hx2 = dws_fn(p["conv4"], hx)
    hx = maxpool2x2_ceil(hx2)
    hx3 = dws_fn(p["conv5"], hx)
    hx = maxpool2x2_ceil(hx3)
    hx4 = dws_fn(p["conv6"], hx)
    hx = maxpool2x2_ceil(hx4)
    hx5 = dws_fn(p["conv4"], hx)
    hx = maxpool2x2_ceil(hx5)
    hx6 = dws_fn(p["conv5"], hx)
    hx7 = dws_fn(p["conv6"], hx6)

    hx6d = dws_fn(p["conv4"], hx7 + hx6)
    hx5d = dws_fn(p["conv4"], upsample_like(hx6d, hx5) + hx5)
    hx4d = dws_fn(p["conv4"], upsample_like(hx5d, hx4) + hx4)
    hx3d = dws_fn(p["conv4"], upsample_like(hx4d, hx3) + hx3)
    hx2d = dws_fn(p["conv4"], upsample_like(hx3d, hx2) + hx2)
    hxinout = dense_fn(p["conv3"], upsample_like(hx2d, hx1) + hx1)

    att = spatial_attention(p["sa"], hxinout)
    return jnp.maximum(hxin + att * hxinout, 0.0)


def nusunit7s_forward(p, x_nchw):
    x = jnp.transpose(x_nchw, (0, 2, 3, 1))        # NCHW -> NHWC at the boundary
    y = unit_forward(p, x, rebnconv_pallas, bnredwsconv_pallas)
    return jnp.transpose(y, (0, 3, 1, 2)).astype(jnp.float32)


def nusunit7s_reference(p, x_nchw):
    x = jnp.transpose(x_nchw, (0, 2, 3, 1))
    y = unit_forward(p, x, rebnconv_ref, bnredwsconv_ref)
    return jnp.transpose(y, (0, 3, 1, 2))


# ----------------------------------------------------------------------------
# Parameter initialization (deterministic, He-style)
# ----------------------------------------------------------------------------

class KeyGen:
    def __init__(self, key):
        self.key = key

    def __call__(self):
        self.key, k = jax.random.split(self.key)
        return k


def init_conv(kg, cout, cin_per_group, k, bias=True):
    fan_in = cin_per_group * k * k
    w = jax.random.normal(kg(), (cout, cin_per_group, k, k), jnp.float32) * \
        jnp.sqrt(2.0 / fan_in)
    b = (0.01 * jax.random.normal(kg(), (cout,), jnp.float32)
         if bias else jnp.zeros((cout,), jnp.float32))
    return {"w": w, "b": b}


def init_bn(kg, c):
    return {"gamma": 1.0 + 0.02 * jax.random.normal(kg(), (c,), jnp.float32),
            "beta": 0.02 * jax.random.normal(kg(), (c,), jnp.float32),
            "mean": jnp.zeros((c,), jnp.float32),
            "var": jnp.ones((c,), jnp.float32)}


def init_rebnconv(kg, cin, cout, d):
    return {"conv": init_conv(kg, cout, cin, 3), "bn": init_bn(kg, cout),
            "dirate": d}


def init_bnredws(kg, cin, cout, d):
    # depthwise weight (out_ch, 1, 3, 3); pointwise (out_ch, in_ch, 1, 1)
    return {"dw": init_conv(kg, cout, 1, 3),
            "pw": init_conv(kg, cout, cin, 1),
            "bn": init_bn(kg, cout), "dirate": d}


def init_nusunit7s(key, in_ch=3, mid_ch=12, out_ch=3):
    kg = KeyGen(key)
    return {"conv1": init_rebnconv(kg, in_ch, out_ch, 1),
            "conv2": init_rebnconv(kg, out_ch, mid_ch, 1),
            "conv3": init_rebnconv(kg, mid_ch, out_ch, 1),
            "conv4": init_bnredws(kg, mid_ch, mid_ch, 1),
            "conv5": init_bnredws(kg, mid_ch, mid_ch, 2),
            "conv6": init_bnredws(kg, mid_ch, mid_ch, 5),
            "sa": {"w": jax.random.normal(kg(), (1, 2, 7, 7), jnp.float32)
                        * jnp.sqrt(2.0 / 98.0)}}


# ----------------------------------------------------------------------------
# Demo
# ----------------------------------------------------------------------------

if __name__ == "__main__":
    key = jax.random.PRNGKey(0)
    kp, kx = jax.random.split(key)
    params = init_nusunit7s(kp, in_ch=3, mid_ch=12, out_ch=3)
    x = jax.random.normal(kx, (2, 3, 32, 32), jnp.float32)

    fwd = jax.jit(functools.partial(nusunit7s_forward, params))
    out = jax.block_until_ready(fwd(x))

    ref_fwd = jax.jit(functools.partial(nusunit7s_reference, params))
    ref = jax.block_until_ready(ref_fwd(x))

    assert out.shape == (2, 3, 32, 32)
    assert bool(jnp.all(jnp.isfinite(out)))
    assert bool(jnp.all(out >= 0.0))
    rel_err = float(jnp.max(jnp.abs(out - ref)) /
                    (jnp.max(jnp.abs(ref)) + 1e-6))
    assert rel_err < 8e-2, f"mismatch vs f32 reference: rel_err={rel_err}"
    print("KERNEL_OK")
</pallas_src>

<mosaic_0001>
module attributes {stable_mosaic.version = 11 : i64} {
  func.func @_conv_kernel(%arg0: i32, %arg1: memref<1x34x102xbf16, #tpu.memory_space<vmem>>, %arg2: memref<3x102x96xbf16, #tpu.memory_space<vmem>>, %arg3: memref<1x96xf32, #tpu.memory_space<vmem>>, %arg4: memref<1x32x96xbf16, #tpu.memory_space<vmem>>) attributes {dimension_semantics = [#tpu.dimension_semantics<parallel>], iteration_bounds = array<i64: 2>, scalar_prefetch = 0 : i64, scratch_operands = 0 : i64, tpu.core_type = #tpu.core_type<tc>, window_params = [{transform_indices = @transform_0, window_bounds = array<i64: 1, 34, 102>}, {pipeline_mode = #tpu.pipeline_mode<synchronous>, transform_indices = @transform_1, window_bounds = array<i64: 3, 102, 96>}, {pipeline_mode = #tpu.pipeline_mode<synchronous>, transform_indices = @transform_2, window_bounds = array<i64: 1, 96>}, {transform_indices = @transform_3, window_bounds = array<i64: 1, 32, 96>}]} {
    %c0 = arith.constant 0 : index
    %c0_0 = arith.constant 0 : index
    %c0_1 = arith.constant 0 : index
    %0 = vector.load %arg1[%c0, %c0_0, %c0_1] : memref<1x34x102xbf16, #tpu.memory_space<vmem>>, vector<1x32x102xbf16>
    %1 = vector.shape_cast %0 : vector<1x32x102xbf16> to vector<32x102xbf16>
    %c0_2 = arith.constant 0 : index
    %c0_3 = arith.constant 0 : index
    %c0_4 = arith.constant 0 : index
    %2 = vector.load %arg2[%c0_2, %c0_3, %c0_4] : memref<3x102x96xbf16, #tpu.memory_space<vmem>>, vector<1x102x96xbf16>
    %3 = vector.shape_cast %2 : vector<1x102x96xbf16> to vector<102x96xbf16>
    %cst = arith.constant dense<0.000000e+00> : vector<32x96xf32>
    %4 = tpu.matmul %1, %3, %cst {dimension_numbers = #tpu.dot_dimension_numbers<[1], [0], [0], [1], [0, 0, 1, 1], [], []>} : vector<32x102xbf16>, vector<102x96xbf16>, vector<32x96xf32> -> vector<32x96xf32>
    %c0_5 = arith.constant 0 : index
    %c1 = arith.constant 1 : index
    %c0_6 = arith.constant 0 : index
    %5 = vector.load %arg1[%c0_5, %c1, %c0_6] : memref<1x34x102xbf16, #tpu.memory_space<vmem>>, vector<1x32x102xbf16>
    %6 = vector.shape_cast %5 : vector<1x32x102xbf16> to vector<32x102xbf16>
    %c1_7 = arith.constant 1 : index
    %c0_8 = arith.constant 0 : index
    %c0_9 = arith.constant 0 : index
    %7 = vector.load %arg2[%c1_7, %c0_8, %c0_9] : memref<3x102x96xbf16, #tpu.memory_space<vmem>>, vector<1x102x96xbf16>
    %8 = vector.shape_cast %7 : vector<1x102x96xbf16> to vector<102x96xbf16>
    %cst_10 = arith.constant dense<0.000000e+00> : vector<32x96xf32>
    %9 = tpu.matmul %6, %8, %cst_10 {dimension_numbers = #tpu.dot_dimension_numbers<[1], [0], [0], [1], [0, 0, 1, 1], [], []>} : vector<32x102xbf16>, vector<102x96xbf16>, vector<32x96xf32> -> vector<32x96xf32>
    %10 = arith.addf %4, %9 : vector<32x96xf32>
    %c0_11 = arith.constant 0 : index
    %c2 = arith.constant 2 : index
    %c0_12 = arith.constant 0 : index
    %11 = vector.load %arg1[%c0_11, %c2, %c0_12] : memref<1x34x102xbf16, #tpu.memory_space<vmem>>, vector<1x32x102xbf16>
    %12 = vector.shape_cast %11 : vector<1x32x102xbf16> to vector<32x102xbf16>
    %c2_13 = arith.constant 2 : index
    %c0_14 = arith.constant 0 : index
    %c0_15 = arith.constant 0 : index
    %13 = vector.load %arg2[%c2_13, %c0_14, %c0_15] : memref<3x102x96xbf16, #tpu.memory_space<vmem>>, vector<1x102x96xbf16>
    %14 = vector.shape_cast %13 : vector<1x102x96xbf16> to vector<102x96xbf16>
    %cst_16 = arith.constant dense<0.000000e+00> : vector<32x96xf32>
    %15 = tpu.matmul %12, %14, %cst_16 {dimension_numbers = #tpu.dot_dimension_numbers<[1], [0], [0], [1], [0, 0, 1, 1], [], []>} : vector<32x102xbf16>, vector<102x96xbf16>, vector<32x96xf32> -> vector<32x96xf32>
    %16 = arith.addf %10, %15 : vector<32x96xf32>
    %c0_17 = arith.constant 0 : index
    %c0_18 = arith.constant 0 : index
    %17 = vector.load %arg3[%c0_17, %c0_18] : memref<1x96xf32, #tpu.memory_space<vmem>>, vector<1x96xf32>
    %18 = vector.broadcast %17 : vector<1x96xf32> to vector<32x96xf32>
    %19 = arith.addf %16, %18 : vector<32x96xf32>
    %cst_19 = arith.constant 0.000000e+00 : f32
    %20 = vector.broadcast %cst_19 : f32 to vector<32x96xf32>
    %21 = arith.maximumf %19, %20 : vector<32x96xf32>
    %22 = arith.truncf %21 : vector<32x96xf32> to vector<32x96xbf16>
    %c0_20 = arith.constant 0 : index
    %c0_21 = arith.constant 0 : index
    %c0_22 = arith.constant 0 : index
    %23 = vector.load %arg4[%c0_20, %c0_21, %c0_22] : memref<1x32x96xbf16, #tpu.memory_space<vmem>>, vector<1x32x96xbf16>
    %24 = vector.shape_cast %23 : vector<1x32x96xbf16> to vector<32x96xbf16>
    %25 = vector.shape_cast %22 : vector<32x96xbf16> to vector<1x32x96xbf16>
    tpu.vector_store %arg4[%c0_20, %c0_21, %c0_22], %25 {strides = array<i32>} : memref<1x32x96xbf16, #tpu.memory_space<vmem>>, vector<1x32x96xbf16>,
    return
  }
  func.func @transform_0(%arg0: i32) -> (i32, i32, i32) {
    %c0_i32 = arith.constant 0 : i32
    %c0_i32_0 = arith.constant 0 : i32
    %c0_i32_1 = arith.constant 0 : i32
    return %arg0, %c0_i32, %c0_i32_0 : i32, i32, i32
  }
  func.func @transform_1(%arg0: i32) -> (i32, i32, i32) {
    %c0_i32 = arith.constant 0 : i32
    %c0_i32_0 = arith.constant 0 : i32
    %c0_i32_1 = arith.constant 0 : i32
    %c0_i32_2 = arith.constant 0 : i32
    return %c0_i32, %c0_i32_0, %c0_i32_1 : i32, i32, i32
  }
  func.func @transform_2(%arg0: i32) -> (i32, i32) {
    %c0_i32 = arith.constant 0 : i32
    %c0_i32_0 = arith.constant 0 : i32
    %c0_i32_1 = arith.constant 0 : i32
    return %c0_i32, %c0_i32_0 : i32, i32
  }
  func.func @transform_3(%arg0: i32) -> (i32, i32, i32) {
    %c0_i32 = arith.constant 0 : i32
    %c0_i32_0 = arith.constant 0 : i32
    %c0_i32_1 = arith.constant 0 : i32
    return %arg0, %c0_i32, %c0_i32_0 : i32, i32, i32
  }
}

module attributes {stable_mosaic.version = 11 : i64} {
  func.func @_conv_kernel(%arg0: i32, %arg1: memref<1x34x102xbf16, #tpu.memory_space<vmem>>, %arg2: memref<3x102x384xbf16, #tpu.memory_space<vmem>>, %arg3: memref<1x384xf32, #tpu.memory_space<vmem>>, %arg4: memref<1x32x384xbf16, #tpu.memory_space<vmem>>) attributes {dimension_semantics = [#tpu.dimension_semantics<parallel>], iteration_bounds = array<i64: 2>, scalar_prefetch = 0 : i64, scratch_operands = 0 : i64, tpu.core_type = #tpu.core_type<tc>, window_params = [{transform_indices = @transform_0, window_bounds = array<i64: 1, 34, 102>}, {pipeline_mode = #tpu.pipeline_mode<synchronous>, transform_indices = @transform_1, window_bounds = array<i64: 3, 102, 384>}, {pipeline_mode = #tpu.pipeline_mode<synchronous>, transform_indices = @transform_2, window_bounds = array<i64: 1, 384>}, {transform_indices = @transform_3, window_bounds = array<i64: 1, 32, 384>}]} {
    %c0 = arith.constant 0 : index
    %c0_0 = arith.constant 0 : index
    %c0_1 = arith.constant 0 : index
    %0 = vector.load %arg1[%c0, %c0_0, %c0_1] : memref<1x34x102xbf16, #tpu.memory_space<vmem>>, vector<1x32x102xbf16>
    %1 = vector.shape_cast %0 : vector<1x32x102xbf16> to vector<32x102xbf16>
    %c0_2 = arith.constant 0 : index
    %c0_3 = arith.constant 0 : index
    %c0_4 = arith.constant 0 : index
    %2 = vector.load %arg2[%c0_2, %c0_3, %c0_4] : memref<3x102x384xbf16, #tpu.memory_space<vmem>>, vector<1x102x384xbf16>
    %3 = vector.shape_cast %2 : vector<1x102x384xbf16> to vector<102x384xbf16>
    %cst = arith.constant dense<0.000000e+00> : vector<32x384xf32>
    %4 = tpu.matmul %1, %3, %cst {dimension_numbers = #tpu.dot_dimension_numbers<[1], [0], [0], [1], [0, 0, 1, 1], [], []>} : vector<32x102xbf16>, vector<102x384xbf16>, vector<32x384xf32> -> vector<32x384xf32>
    %c0_5 = arith.constant 0 : index
    %c1 = arith.constant 1 : index
    %c0_6 = arith.constant 0 : index
    %5 = vector.load %arg1[%c0_5, %c1, %c0_6] : memref<1x34x102xbf16, #tpu.memory_space<vmem>>, vector<1x32x102xbf16>
    %6 = vector.shape_cast %5 : vector<1x32x102xbf16> to vector<32x102xbf16>
    %c1_7 = arith.constant 1 : index
    %c0_8 = arith.constant 0 : index
    %c0_9 = arith.constant 0 : index
    %7 = vector.load %arg2[%c1_7, %c0_8, %c0_9] : memref<3x102x384xbf16, #tpu.memory_space<vmem>>, vector<1x102x384xbf16>
    %8 = vector.shape_cast %7 : vector<1x102x384xbf16> to vector<102x384xbf16>
    %cst_10 = arith.constant dense<0.000000e+00> : vector<32x384xf32>
    %9 = tpu.matmul %6, %8, %cst_10 {dimension_numbers = #tpu.dot_dimension_numbers<[1], [0], [0], [1], [0, 0, 1, 1], [], []>} : vector<32x102xbf16>, vector<102x384xbf16>, vector<32x384xf32> -> vector<32x384xf32>
    %10 = arith.addf %4, %9 : vector<32x384xf32>
    %c0_11 = arith.constant 0 : index
    %c2 = arith.constant 2 : index
    %c0_12 = arith.constant 0 : index
    %11 = vector.load %arg1[%c0_11, %c2, %c0_12] : memref<1x34x102xbf16, #tpu.memory_space<vmem>>, vector<1x32x102xbf16>
    %12 = vector.shape_cast %11 : vector<1x32x102xbf16> to vector<32x102xbf16>
    %c2_13 = arith.constant 2 : index
    %c0_14 = arith.constant 0 : index
    %c0_15 = arith.constant 0 : index
    %13 = vector.load %arg2[%c2_13, %c0_14, %c0_15] : memref<3x102x384xbf16, #tpu.memory_space<vmem>>, vector<1x102x384xbf16>
    %14 = vector.shape_cast %13 : vector<1x102x384xbf16> to vector<102x384xbf16>
    %cst_16 = arith.constant dense<0.000000e+00> : vector<32x384xf32>
    %15 = tpu.matmul %12, %14, %cst_16 {dimension_numbers = #tpu.dot_dimension_numbers<[1], [0], [0], [1], [0, 0, 1, 1], [], []>} : vector<32x102xbf16>, vector<102x384xbf16>, vector<32x384xf32> -> vector<32x384xf32>
    %16 = arith.addf %10, %15 : vector<32x384xf32>
    %c0_17 = arith.constant 0 : index
    %c0_18 = arith.constant 0 : index
    %17 = vector.load %arg3[%c0_17, %c0_18] : memref<1x384xf32, #tpu.memory_space<vmem>>, vector<1x384xf32>
    %18 = vector.broadcast %17 : vector<1x384xf32> to vector<32x384xf32>
    %19 = arith.addf %16, %18 : vector<32x384xf32>
    %cst_19 = arith.constant 0.000000e+00 : f32
    %20 = vector.broadcast %cst_19 : f32 to vector<32x384xf32>
    %21 = arith.maximumf %19, %20 : vector<32x384xf32>
    %22 = arith.truncf %21 : vector<32x384xf32> to vector<32x384xbf16>
    %c0_20 = arith.constant 0 : index
    %c0_21 = arith.constant 0 : index
    %c0_22 = arith.constant 0 : index
    %23 = vector.load %arg4[%c0_20, %c0_21, %c0_22] : memref<1x32x384xbf16, #tpu.memory_space<vmem>>, vector<1x32x384xbf16>
    %24 = vector.shape_cast %23 : vector<1x32x384xbf16> to vector<32x384xbf16>
    %25 = vector.shape_cast %22 : vector<32x384xbf16> to vector<1x32x384xbf16>
    tpu.vector_store %arg4[%c0_20, %c0_21, %c0_22], %25 {strides = array<i32>} : memref<1x32x384xbf16, #tpu.memory_space<vmem>>, vector<1x32x384xbf16>,
    return
  }
  func.func @transform_0(%arg0: i32) -> (i32, i32, i32) {
    %c0_i32 = arith.constant 0 : i32
    %c0_i32_0 = arith.constant 0 : i32
    %c0_i32_1 = arith.constant 0 : i32
    return %arg0, %c0_i32, %c0_i32_0 : i32, i32, i32
  }
  func.func @transform_1(%arg0: i32) -> (i32, i32, i32) {
    %c0_i32 = arith.constant 0 : i32
    %c0_i32_0 = arith.constant 0 : i32
    %c0_i32_1 = arith.constant 0 : i32
    %c0_i32_2 = arith.constant 0 : i32
    return %c0_i32, %c0_i32_0, %c0_i32_1 : i32, i32, i32
  }
  func.func @transform_2(%arg0: i32) -> (i32, i32) {
    %c0_i32 = arith.constant 0 : i32
    %c0_i32_0 = arith.constant 0 : i32
    %c0_i32_1 = arith.constant 0 : i32
    return %c0_i32, %c0_i32_0 : i32, i32
  }
  func.func @transform_3(%arg0: i32) -> (i32, i32, i32) {
    %c0_i32 = arith.constant 0 : i32
    %c0_i32_0 = arith.constant 0 : i32
    %c0_i32_1 = arith.constant 0 : i32
    return %arg0, %c0_i32, %c0_i32_0 : i32, i32, i32
  }
}

module attributes {stable_mosaic.version = 11 : i64} {
  func.func @_conv_kernel(%arg0: i32, %arg1: memref<1x18x216xbf16, #tpu.memory_space<vmem>>, %arg2: memref<3x216x192xbf16, #tpu.memory_space<vmem>>, %arg3: memref<1x192xf32, #tpu.memory_space<vmem>>, %arg4: memref<1x16x192xbf16, #tpu.memory_space<vmem>>) attributes {dimension_semantics = [#tpu.dimension_semantics<parallel>], iteration_bounds = array<i64: 2>, scalar_prefetch = 0 : i64, scratch_operands = 0 : i64, tpu.core_type = #tpu.core_type<tc>, window_params = [{transform_indices = @transform_0, window_bounds = array<i64: 1, 18, 216>}, {pipeline_mode = #tpu.pipeline_mode<synchronous>, transform_indices = @transform_1, window_bounds = array<i64: 3, 216, 192>}, {pipeline_mode = #tpu.pipeline_mode<synchronous>, transform_indices = @transform_2, window_bounds = array<i64: 1, 192>}, {transform_indices = @transform_3, window_bounds = array<i64: 1, 16, 192>}]} {
    %c0 = arith.constant 0 : index
    %c0_0 = arith.constant 0 : index
    %c0_1 = arith.constant 0 : index
    %0 = vector.load %arg1[%c0, %c0_0, %c0_1] : memref<1x18x216xbf16, #tpu.memory_space<vmem>>, vector<1x16x216xbf16>
    %1 = vector.shape_cast %0 : vector<1x16x216xbf16> to vector<16x216xbf16>
    %c0_2 = arith.constant 0 : index
    %c0_3 = arith.constant 0 : index
    %c0_4 = arith.constant 0 : index
    %2 = vector.load %arg2[%c0_2, %c0_3, %c0_4] : memref<3x216x192xbf16, #tpu.memory_space<vmem>>, vector<1x216x192xbf16>
    %3 = vector.shape_cast %2 : vector<1x216x192xbf16> to vector<216x192xbf16>
    %cst = arith.constant dense<0.000000e+00> : vector<16x192xf32>
    %4 = tpu.matmul %1, %3, %cst {dimension_numbers = #tpu.dot_dimension_numbers<[1], [0], [0], [1], [0, 0, 1, 1], [], []>} : vector<16x216xbf16>, vector<216x192xbf16>, vector<16x192xf32> -> vector<16x192xf32>
    %c0_5 = arith.constant 0 : index
    %c1 = arith.constant 1 : index
    %c0_6 = arith.constant 0 : index
    %5 = vector.load %arg1[%c0_5, %c1, %c0_6] : memref<1x18x216xbf16, #tpu.memory_space<vmem>>, vector<1x16x216xbf16>
    %6 = vector.shape_cast %5 : vector<1x16x216xbf16> to vector<16x216xbf16>
    %c1_7 = arith.constant 1 : index
    %c0_8 = arith.constant 0 : index
    %c0_9 = arith.constant 0 : index
    %7 = vector.load %arg2[%c1_7, %c0_8, %c0_9] : memref<3x216x192xbf16, #tpu.memory_space<vmem>>, vector<1x216x192xbf16>
    %8 = vector.shape_cast %7 : vector<1x216x192xbf16> to vector<216x192xbf16>
    %cst_10 = arith.constant dense<0.000000e+00> : vector<16x192xf32>
    %9 = tpu.matmul %6, %8, %cst_10 {dimension_numbers = #tpu.dot_dimension_numbers<[1], [0], [0], [1], [0, 0, 1, 1], [], []>} : vector<16x216xbf16>, vector<216x192xbf16>, vector<16x192xf32> -> vector<16x192xf32>
    %10 = arith.addf %4, %9 : vector<16x192xf32>
    %c0_11 = arith.constant 0 : index
    %c2 = arith.constant 2 : index
    %c0_12 = arith.constant 0 : index
    %11 = vector.load %arg1[%c0_11, %c2, %c0_12] : memref<1x18x216xbf16, #tpu.memory_space<vmem>>, vector<1x16x216xbf16>
    %12 = vector.shape_cast %11 : vector<1x16x216xbf16> to vector<16x216xbf16>
    %c2_13 = arith.constant 2 : index
    %c0_14 = arith.constant 0 : index
    %c0_15 = arith.constant 0 : index
    %13 = vector.load %arg2[%c2_13, %c0_14, %c0_15] : memref<3x216x192xbf16, #tpu.memory_space<vmem>>, vector<1x216x192xbf16>
    %14 = vector.shape_cast %13 : vector<1x216x192xbf16> to vector<216x192xbf16>
    %cst_16 = arith.constant dense<0.000000e+00> : vector<16x192xf32>
    %15 = tpu.matmul %12, %14, %cst_16 {dimension_numbers = #tpu.dot_dimension_numbers<[1], [0], [0], [1], [0, 0, 1, 1], [], []>} : vector<16x216xbf16>, vector<216x192xbf16>, vector<16x192xf32> -> vector<16x192xf32>
    %16 = arith.addf %10, %15 : vector<16x192xf32>
    %c0_17 = arith.constant 0 : index
    %c0_18 = arith.constant 0 : index
    %17 = vector.load %arg3[%c0_17, %c0_18] : memref<1x192xf32, #tpu.memory_space<vmem>>, vector<1x192xf32>
    %18 = vector.broadcast %17 : vector<1x192xf32> to vector<16x192xf32>
    %19 = arith.addf %16, %18 : vector<16x192xf32>
    %cst_19 = arith.constant 0.000000e+00 : f32
    %20 = vector.broadcast %cst_19 : f32 to vector<16x192xf32>
    %21 = arith.maximumf %19, %20 : vector<16x192xf32>
    %22 = arith.truncf %21 : vector<16x192xf32> to vector<16x192xbf16>
    %c0_20 = arith.constant 0 : index
    %c0_21 = arith.constant 0 : index
    %c0_22 = arith.constant 0 : index
    %23 = vector.load %arg4[%c0_20, %c0_21, %c0_22] : memref<1x16x192xbf16, #tpu.memory_space<vmem>>, vector<1x16x192xbf16>
    %24 = vector.shape_cast %23 : vector<1x16x192xbf16> to vector<16x192xbf16>
    %25 = vector.shape_cast %22 : vector<16x192xbf16> to vector<1x16x192xbf16>
    tpu.vector_store %arg4[%c0_20, %c0_21, %c0_22], %25 {strides = array<i32>} : memref<1x16x192xbf16, #tpu.memory_space<vmem>>, vector<1x16x192xbf16>,
    return
  }
  func.func @transform_0(%arg0: i32) -> (i32, i32, i32) {
    %c0_i32 = arith.constant 0 : i32
    %c0_i32_0 = arith.constant 0 : i32
    %c0_i32_1 = arith.constant 0 : i32
    return %arg0, %c0_i32, %c0_i32_0 : i32, i32, i32
  }
  func.func @transform_1(%arg0: i32) -> (i32, i32, i32) {
    %c0_i32 = arith.constant 0 : i32
    %c0_i32_0 = arith.constant 0 : i32
    %c0_i32_1 = arith.constant 0 : i32
    %c0_i32_2 = arith.constant 0 : i32
    return %c0_i32, %c0_i32_0, %c0_i32_1 : i32, i32, i32
  }
  func.func @transform_2(%arg0: i32) -> (i32, i32) {
    %c0_i32 = arith.constant 0 : i32
    %c0_i32_0 = arith.constant 0 : i32
    %c0_i32_1 = arith.constant 0 : i32
    return %c0_i32, %c0_i32_0 : i32, i32
  }
  func.func @transform_3(%arg0: i32) -> (i32, i32, i32) {
    %c0_i32 = arith.constant 0 : i32
    %c0_i32_0 = arith.constant 0 : i32
    %c0_i32_1 = arith.constant 0 : i32
    return %arg0, %c0_i32, %c0_i32_0 : i32, i32, i32
  }
}

module attributes {stable_mosaic.version = 11 : i64} {
  func.func @_conv_kernel(%arg0: i32, %arg1: memref<1x12x144xbf16, #tpu.memory_space<vmem>>, %arg2: memref<3x144x96xbf16, #tpu.memory_space<vmem>>, %arg3: memref<1x96xf32, #tpu.memory_space<vmem>>, %arg4: memref<1x8x96xbf16, #tpu.memory_space<vmem>>) attributes {dimension_semantics = [#tpu.dimension_semantics<parallel>], iteration_bounds = array<i64: 2>, scalar_prefetch = 0 : i64, scratch_operands = 0 : i64, tpu.core_type = #tpu.core_type<tc>, window_params = [{transform_indices = @transform_0, window_bounds = array<i64: 1, 12, 144>}, {pipeline_mode = #tpu.pipeline_mode<synchronous>, transform_indices = @transform_1, window_bounds = array<i64: 3, 144, 96>}, {pipeline_mode = #tpu.pipeline_mode<synchronous>, transform_indices = @transform_2, window_bounds = array<i64: 1, 96>}, {transform_indices = @transform_3, window_bounds = array<i64: 1, 8, 96>}]} {
    %c0 = arith.constant 0 : index
    %c0_0 = arith.constant 0 : index
    %c0_1 = arith.constant 0 : index
    %0 = vector.load %arg1[%c0, %c0_0, %c0_1] : memref<1x12x144xbf16, #tpu.memory_space<vmem>>, vector<1x8x144xbf16>
    %1 = vector.shape_cast %0 : vector<1x8x144xbf16> to vector<8x144xbf16>
    %c0_2 = arith.constant 0 : index
    %c0_3 = arith.constant 0 : index
    %c0_4 = arith.constant 0 : index
    %2 = vector.load %arg2[%c0_2, %c0_3, %c0_4] : memref<3x144x96xbf16, #tpu.memory_space<vmem>>, vector<1x144x96xbf16>
    %3 = vector.shape_cast %2 : vector<1x144x96xbf16> to vector<144x96xbf16>
    %cst = arith.constant dense<0.000000e+00> : vector<8x96xf32>
    %4 = tpu.matmul %1, %3, %cst {dimension_numbers = #tpu.dot_dimension_numbers<[1], [0], [0], [1], [0, 0, 1, 1], [], []>} : vector<8x144xbf16>, vector<144x96xbf16>, vector<8x96xf32> -> vector<8x96xf32>
    %c0_5 = arith.constant 0 : index
    %c2 = arith.constant 2 : index
    %c0_6 = arith.constant 0 : index
    %5 = vector.load %arg1[%c0_5, %c2, %c0_6] : memref<1x12x144xbf16, #tpu.memory_space<vmem>>, vector<1x8x144xbf16>
    %6 = vector.shape_cast %5 : vector<1x8x144xbf16> to vector<8x144xbf16>
    %c1 = arith.constant 1 : index
    %c0_7 = arith.constant 0 : index
    %c0_8 = arith.constant 0 : index
    %7 = vector.load %arg2[%c1, %c0_7, %c0_8] : memref<3x144x96xbf16, #tpu.memory_space<vmem>>, vector<1x144x96xbf16>
    %8 = vector.shape_cast %7 : vector<1x144x96xbf16> to vector<144x96xbf16>
    %cst_9 = arith.constant dense<0.000000e+00> : vector<8x96xf32>
    %9 = tpu.matmul %6, %8, %cst_9 {dimension_numbers = #tpu.dot_dimension_numbers<[1], [0], [0], [1], [0, 0, 1, 1], [], []>} : vector<8x144xbf16>, vector<144x96xbf16>, vector<8x96xf32> -> vector<8x96xf32>
    %10 = arith.addf %4, %9 : vector<8x96xf32>
    %c0_10 = arith.constant 0 : index
    %c4 = arith.constant 4 : index
    %c0_11 = arith.constant 0 : index
    %11 = vector.load %arg1[%c0_10, %c4, %c0_11] : memref<1x12x144xbf16, #tpu.memory_space<vmem>>, vector<1x8x144xbf16>
    %12 = vector.shape_cast %11 : vector<1x8x144xbf16> to vector<8x144xbf16>
    %c2_12 = arith.constant 2 : index
    %c0_13 = arith.constant 0 : index
    %c0_14 = arith.constant 0 : index
    %13 = vector.load %arg2[%c2_12, %c0_13, %c0_14] : memref<3x144x96xbf16, #tpu.memory_space<vmem>>, vector<1x144x96xbf16>
    %14 = vector.shape_cast %13 : vector<1x144x96xbf16> to vector<144x96xbf16>
    %cst_15 = arith.constant dense<0.000000e+00> : vector<8x96xf32>
    %15 = tpu.matmul %12, %14, %cst_15 {dimension_numbers = #tpu.dot_dimension_numbers<[1], [0], [0], [1], [0, 0, 1, 1], [], []>} : vector<8x144xbf16>, vector<144x96xbf16>, vector<8x96xf32> -> vector<8x96xf32>
    %16 = arith.addf %10, %15 : vector<8x96xf32>
    %c0_16 = arith.constant 0 : index
    %c0_17 = arith.constant 0 : index
    %17 = vector.load %arg3[%c0_16, %c0_17] : memref<1x96xf32, #tpu.memory_space<vmem>>, vector<1x96xf32>
    %18 = vector.broadcast %17 : vector<1x96xf32> to vector<8x96xf32>
    %19 = arith.addf %16, %18 : vector<8x96xf32>
    %cst_18 = arith.constant 0.000000e+00 : f32
    %20 = vector.broadcast %cst_18 : f32 to vector<8x96xf32>
    %21 = arith.maximumf %19, %20 : vector<8x96xf32>
    %22 = arith.truncf %21 : vector<8x96xf32> to vector<8x96xbf16>
    %c0_19 = arith.constant 0 : index
    %c0_20 = arith.constant 0 : index
    %c0_21 = arith.constant 0 : index
    %23 = vector.load %arg4[%c0_19, %c0_20, %c0_21] : memref<1x8x96xbf16, #tpu.memory_space<vmem>>, vector<1x8x96xbf16>
    %24 = vector.shape_cast %23 : vector<1x8x96xbf16> to vector<8x96xbf16>
    %25 = vector.shape_cast %22 : vector<8x96xbf16> to vector<1x8x96xbf16>
    tpu.vector_store %arg4[%c0_19, %c0_20, %c0_21], %25 {strides = array<i32>} : memref<1x8x96xbf16, #tpu.memory_space<vmem>>, vector<1x8x96xbf16>,
    return
  }
  func.func @transform_0(%arg0: i32) -> (i32, i32, i32) {
    %c0_i32 = arith.constant 0 : i32
    %c0_i32_0 = arith.constant 0 : i32
    %c0_i32_1 = arith.constant 0 : i32
    return %arg0, %c0_i32, %c0_i32_0 : i32, i32, i32
  }
  func.func @transform_1(%arg0: i32) -> (i32, i32, i32) {
    %c0_i32 = arith.constant 0 : i32
    %c0_i32_0 = arith.constant 0 : i32
    %c0_i32_1 = arith.constant 0 : i32
    %c0_i32_2 = arith.constant 0 : i32
    return %c0_i32, %c0_i32_0, %c0_i32_1 : i32, i32, i32
  }
  func.func @transform_2(%arg0: i32) -> (i32, i32) {
    %c0_i32 = arith.constant 0 : i32
    %c0_i32_0 = arith.constant 0 : i32
    %c0_i32_1 = arith.constant 0 : i32
    return %c0_i32, %c0_i32_0 : i32, i32
  }
  func.func @transform_3(%arg0: i32) -> (i32, i32, i32) {
    %c0_i32 = arith.constant 0 : i32
    %c0_i32_0 = arith.constant 0 : i32
    %c0_i32_1 = arith.constant 0 : i32
    return %arg0, %c0_i32, %c0_i32_0 : i32, i32, i32
  }
}

module attributes {stable_mosaic.version = 11 : i64} {
  func.func @_conv_kernel(%arg0: i32, %arg1: memref<1x14x168xbf16, #tpu.memory_space<vmem>>, %arg2: memref<3x168x48xbf16, #tpu.memory_space<vmem>>, %arg3: memref<1x48xf32, #tpu.memory_space<vmem>>, %arg4: memref<1x4x48xbf16, #tpu.memory_space<vmem>>) attributes {dimension_semantics = [#tpu.dimension_semantics<parallel>], iteration_bounds = array<i64: 2>, scalar_prefetch = 0 : i64, scratch_operands = 0 : i64, tpu.core_type = #tpu.core_type<tc>, window_params = [{transform_indices = @transform_0, window_bounds = array<i64: 1, 14, 168>}, {pipeline_mode = #tpu.pipeline_mode<synchronous>, transform_indices = @transform_1, window_bounds = array<i64: 3, 168, 48>}, {pipeline_mode = #tpu.pipeline_mode<synchronous>, transform_indices = @transform_2, window_bounds = array<i64: 1, 48>}, {transform_indices = @transform_3, window_bounds = array<i64: 1, 4, 48>}]} {
    %c0 = arith.constant 0 : index
    %c0_0 = arith.constant 0 : index
    %c0_1 = arith.constant 0 : index
    %0 = vector.load %arg1[%c0, %c0_0, %c0_1] : memref<1x14x168xbf16, #tpu.memory_space<vmem>>, vector<1x4x168xbf16>
    %1 = vector.shape_cast %0 : vector<1x4x168xbf16> to vector<4x168xbf16>
    %c0_2 = arith.constant 0 : index
    %c0_3 = arith.constant 0 : index
    %c0_4 = arith.constant 0 : index
    %2 = vector.load %arg2[%c0_2, %c0_3, %c0_4] : memref<3x168x48xbf16, #tpu.memory_space<vmem>>, vector<1x168x48xbf16>
    %3 = vector.shape_cast %2 : vector<1x168x48xbf16> to vector<168x48xbf16>
    %cst = arith.constant dense<0.000000e+00> : vector<4x48xf32>
    %4 = tpu.matmul %1, %3, %cst {dimension_numbers = #tpu.dot_dimension_numbers<[1], [0], [0], [1], [0, 0, 1, 1], [], []>} : vector<4x168xbf16>, vector<168x48xbf16>, vector<4x48xf32> -> vector<4x48xf32>
    %c0_5 = arith.constant 0 : index
    %c5 = arith.constant 5 : index
    %c0_6 = arith.constant 0 : index
    %5 = vector.load %arg1[%c0_5, %c5, %c0_6] : memref<1x14x168xbf16, #tpu.memory_space<vmem>>, vector<1x4x168xbf16>
    %6 = vector.shape_cast %5 : vector<1x4x168xbf16> to vector<4x168xbf16>
    %c1 = arith.constant 1 : index
    %c0_7 = arith.constant 0 : index
    %c0_8 = arith.constant 0 : index
    %7 = vector.load %arg2[%c1, %c0_7, %c0_8] : memref<3x168x48xbf16, #tpu.memory_space<vmem>>, vector<1x168x48xbf16>
    %8 = vector.shape_cast %7 : vector<1x168x48xbf16> to vector<168x48xbf16>
    %cst_9 = arith.constant dense<0.000000e+00> : vector<4x48xf32>
    %9 = tpu.matmul %6, %8, %cst_9 {dimension_numbers = #tpu.dot_dimension_numbers<[1], [0], [0], [1], [0, 0, 1, 1], [], []>} : vector<4x168xbf16>, vector<168x48xbf16>, vector<4x48xf32> -> vector<4x48xf32>
    %10 = arith.addf %4, %9 : vector<4x48xf32>
    %c0_10 = arith.constant 0 : index
    %c10 = arith.constant 10 : index
    %c0_11 = arith.constant 0 : index
    %11 = vector.load %arg1[%c0_10, %c10, %c0_11] : memref<1x14x168xbf16, #tpu.memory_space<vmem>>, vector<1x4x168xbf16>
    %12 = vector.shape_cast %11 : vector<1x4x168xbf16> to vector<4x168xbf16>
    %c2 = arith.constant 2 : index
    %c0_12 = arith.constant 0 : index
    %c0_13 = arith.constant 0 : index
    %13 = vector.load %arg2[%c2, %c0_12, %c0_13] : memref<3x168x48xbf16, #tpu.memory_space<vmem>>, vector<1x168x48xbf16>
    %14 = vector.shape_cast %13 : vector<1x168x48xbf16> to vector<168x48xbf16>
    %cst_14 = arith.constant dense<0.000000e+00> : vector<4x48xf32>
    %15 = tpu.matmul %12, %14, %cst_14 {dimension_numbers = #tpu.dot_dimension_numbers<[1], [0], [0], [1], [0, 0, 1, 1], [], []>} : vector<4x168xbf16>, vector<168x48xbf16>, vector<4x48xf32> -> vector<4x48xf32>
    %16 = arith.addf %10, %15 : vector<4x48xf32>
    %c0_15 = arith.constant 0 : index
    %c0_16 = arith.constant 0 : index
    %17 = vector.load %arg3[%c0_15, %c0_16] : memref<1x48xf32, #tpu.memory_space<vmem>>, vector<1x48xf32>
    %18 = vector.broadcast %17 : vector<1x48xf32> to vector<4x48xf32>
    %19 = arith.addf %16, %18 : vector<4x48xf32>
    %cst_17 = arith.constant 0.000000e+00 : f32
    %20 = vector.broadcast %cst_17 : f32 to vector<4x48xf32>
    %21 = arith.maximumf %19, %20 : vector<4x48xf32>
    %22 = arith.truncf %21 : vector<4x48xf32> to vector<4x48xbf16>
    %c0_18 = arith.constant 0 : index
    %c0_19 = arith.constant 0 : index
    %c0_20 = arith.constant 0 : index
    %23 = vector.load %arg4[%c0_18, %c0_19, %c0_20] : memref<1x4x48xbf16, #tpu.memory_space<vmem>>, vector<1x4x48xbf16>
    %24 = vector.shape_cast %23 : vector<1x4x48xbf16> to vector<4x48xbf16>
    %25 = vector.shape_cast %22 : vector<4x48xbf16> to vector<1x4x48xbf16>
    tpu.vector_store %arg4[%c0_18, %c0_19, %c0_20], %25 {strides = array<i32>} : memref<1x4x48xbf16, #tpu.memory_space<vmem>>, vector<1x4x48xbf16>,
    return
  }
  func.func @transform_0(%arg0: i32) -> (i32, i32, i32) {
    %c0_i32 = arith.constant 0 : i32
    %c0_i32_0 = arith.constant 0 : i32
    %c0_i32_1 = arith.constant 0 : i32
    return %arg0, %c0_i32, %c0_i32_0 : i32, i32, i32
  }
  func.func @transform_1(%arg0: i32) -> (i32, i32, i32) {
    %c0_i32 = arith.constant 0 : i32
    %c0_i32_0 = arith.constant 0 : i32
    %c0_i32_1 = arith.constant 0 : i32
    %c0_i32_2 = arith.constant 0 : i32
    return %c0_i32, %c0_i32_0, %c0_i32_1 : i32, i32, i32
  }
  func.func @transform_2(%arg0: i32) -> (i32, i32) {
    %c0_i32 = arith.constant 0 : i32
    %c0_i32_0 = arith.constant 0 : i32
    %c0_i32_1 = arith.constant 0 : i32
    return %c0_i32, %c0_i32_0 : i32, i32
  }
  func.func @transform_3(%arg0: i32) -> (i32, i32, i32) {
    %c0_i32 = arith.constant 0 : i32
    %c0_i32_0 = arith.constant 0 : i32
    %c0_i32_1 = arith.constant 0 : i32
    return %arg0, %c0_i32, %c0_i32_0 : i32, i32, i32
  }
}

module attributes {stable_mosaic.version = 11 : i64} {
  func.func @_conv_kernel(%arg0: i32, %arg1: memref<1x4x48xbf16, #tpu.memory_space<vmem>>, %arg2: memref<3x48x24xbf16, #tpu.memory_space<vmem>>, %arg3: memref<1x24xf32, #tpu.memory_space<vmem>>, %arg4: memref<1x2x24xbf16, #tpu.memory_space<vmem>>) attributes {dimension_semantics = [#tpu.dimension_semantics<parallel>], iteration_bounds = array<i64: 2>, scalar_prefetch = 0 : i64, scratch_operands = 0 : i64, tpu.core_type = #tpu.core_type<tc>, window_params = [{transform_indices = @transform_0, window_bounds = array<i64: 1, 4, 48>}, {pipeline_mode = #tpu.pipeline_mode<synchronous>, transform_indices = @transform_1, window_bounds = array<i64: 3, 48, 24>}, {pipeline_mode = #tpu.pipeline_mode<synchronous>, transform_indices = @transform_2, window_bounds = array<i64: 1, 24>}, {transform_indices = @transform_3, window_bounds = array<i64: 1, 2, 24>}]} {
    %c0 = arith.constant 0 : index
    %c0_0 = arith.constant 0 : index
    %c0_1 = arith.constant 0 : index
    %0 = vector.load %arg1[%c0, %c0_0, %c0_1] : memref<1x4x48xbf16, #tpu.memory_space<vmem>>, vector<1x2x48xbf16>
    %1 = vector.shape_cast %0 : vector<1x2x48xbf16> to vector<2x48xbf16>
    %c0_2 = arith.constant 0 : index
    %c0_3 = arith.constant 0 : index
    %c0_4 = arith.constant 0 : index
    %2 = vector.load %arg2[%c0_2, %c0_3, %c0_4] : memref<3x48x24xbf16, #tpu.memory_space<vmem>>, vector<1x48x24xbf16>
    %3 = vector.shape_cast %2 : vector<1x48x24xbf16> to vector<48x24xbf16>
    %cst = arith.constant dense<0.000000e+00> : vector<2x24xf32>
    %4 = tpu.matmul %1, %3, %cst {dimension_numbers = #tpu.dot_dimension_numbers<[1], [0], [0], [1], [0, 0, 1, 1], [], []>} : vector<2x48xbf16>, vector<48x24xbf16>, vector<2x24xf32> -> vector<2x24xf32>
    %c0_5 = arith.constant 0 : index
    %c1 = arith.constant 1 : index
    %c0_6 = arith.constant 0 : index
    %5 = vector.load %arg1[%c0_5, %c1, %c0_6] : memref<1x4x48xbf16, #tpu.memory_space<vmem>>, vector<1x2x48xbf16>
    %6 = vector.shape_cast %5 : vector<1x2x48xbf16> to vector<2x48xbf16>
    %c1_7 = arith.constant 1 : index
    %c0_8 = arith.constant 0 : index
    %c0_9 = arith.constant 0 : index
    %7 = vector.load %arg2[%c1_7, %c0_8, %c0_9] : memref<3x48x24xbf16, #tpu.memory_space<vmem>>, vector<1x48x24xbf16>
    %8 = vector.shape_cast %7 : vector<1x48x24xbf16> to vector<48x24xbf16>
    %cst_10 = arith.constant dense<0.000000e+00> : vector<2x24xf32>
    %9 = tpu.matmul %6, %8, %cst_10 {dimension_numbers = #tpu.dot_dimension_numbers<[1], [0], [0], [1], [0, 0, 1, 1], [], []>} : vector<2x48xbf16>, vector<48x24xbf16>, vector<2x24xf32> -> vector<2x24xf32>
    %10 = arith.addf %4, %9 : vector<2x24xf32>
    %c0_11 = arith.constant 0 : index
    %c2 = arith.constant 2 : index
    %c0_12 = arith.constant 0 : index
    %11 = vector.load %arg1[%c0_11, %c2, %c0_12] : memref<1x4x48xbf16, #tpu.memory_space<vmem>>, vector<1x2x48xbf16>
    %12 = vector.shape_cast %11 : vector<1x2x48xbf16> to vector<2x48xbf16>
    %c2_13 = arith.constant 2 : index
    %c0_14 = arith.constant 0 : index
    %c0_15 = arith.constant 0 : index
    %13 = vector.load %arg2[%c2_13, %c0_14, %c0_15] : memref<3x48x24xbf16, #tpu.memory_space<vmem>>, vector<1x48x24xbf16>
    %14 = vector.shape_cast %13 : vector<1x48x24xbf16> to vector<48x24xbf16>
    %cst_16 = arith.constant dense<0.000000e+00> : vector<2x24xf32>
    %15 = tpu.matmul %12, %14, %cst_16 {dimension_numbers = #tpu.dot_dimension_numbers<[1], [0], [0], [1], [0, 0, 1, 1], [], []>} : vector<2x48xbf16>, vector<48x24xbf16>, vector<2x24xf32> -> vector<2x24xf32>
    %16 = arith.addf %10, %15 : vector<2x24xf32>
    %c0_17 = arith.constant 0 : index
    %c0_18 = arith.constant 0 : index
    %17 = vector.load %arg3[%c0_17, %c0_18] : memref<1x24xf32, #tpu.memory_space<vmem>>, vector<1x24xf32>
    %18 = vector.broadcast %17 : vector<1x24xf32> to vector<2x24xf32>
    %19 = arith.addf %16, %18 : vector<2x24xf32>
    %cst_19 = arith.constant 0.000000e+00 : f32
    %20 = vector.broadcast %cst_19 : f32 to vector<2x24xf32>
    %21 = arith.maximumf %19, %20 : vector<2x24xf32>
    %22 = arith.truncf %21 : vector<2x24xf32> to vector<2x24xbf16>
    %c0_20 = arith.constant 0 : index
    %c0_21 = arith.constant 0 : index
    %c0_22 = arith.constant 0 : index
    %23 = vector.load %arg4[%c0_20, %c0_21, %c0_22] : memref<1x2x24xbf16, #tpu.memory_space<vmem>>, vector<1x2x24xbf16>
    %24 = vector.shape_cast %23 : vector<1x2x24xbf16> to vector<2x24xbf16>
    %25 = vector.shape_cast %22 : vector<2x24xbf16> to vector<1x2x24xbf16>
    tpu.vector_store %arg4[%c0_20, %c0_21, %c0_22], %25 {strides = array<i32>} : memref<1x2x24xbf16, #tpu.memory_space<vmem>>, vector<1x2x24xbf16>,
    return
  }
  func.func @transform_0(%arg0: i32) -> (i32, i32, i32) {
    %c0_i32 = arith.constant 0 : i32
    %c0_i32_0 = arith.constant 0 : i32
    %c0_i32_1 = arith.constant 0 : i32
    return %arg0, %c0_i32, %c0_i32_0 : i32, i32, i32
  }
  func.func @transform_1(%arg0: i32) -> (i32, i32, i32) {
    %c0_i32 = arith.constant 0 : i32
    %c0_i32_0 = arith.constant 0 : i32
    %c0_i32_1 = arith.constant 0 : i32
    %c0_i32_2 = arith.constant 0 : i32
    return %c0_i32, %c0_i32_0, %c0_i32_1 : i32, i32, i32
  }
  func.func @transform_2(%arg0: i32) -> (i32, i32) {
    %c0_i32 = arith.constant 0 : i32
    %c0_i32_0 = arith.constant 0 : i32
    %c0_i32_1 = arith.constant 0 : i32
    return %c0_i32, %c0_i32_0 : i32, i32
  }
  func.func @transform_3(%arg0: i32) -> (i32, i32, i32) {
    %c0_i32 = arith.constant 0 : i32
    %c0_i32_0 = arith.constant 0 : i32
    %c0_i32_1 = arith.constant 0 : i32
    return %arg0, %c0_i32, %c0_i32_0 : i32, i32, i32
  }
}

module attributes {stable_mosaic.version = 11 : i64} {
  func.func @_conv_kernel(%arg0: i32, %arg1: memref<1x5x60xbf16, #tpu.memory_space<vmem>>, %arg2: memref<3x60x12xbf16, #tpu.memory_space<vmem>>, %arg3: memref<1x12xf32, #tpu.memory_space<vmem>>, %arg4: memref<1x1x12xbf16, #tpu.memory_space<vmem>>) attributes {dimension_semantics = [#tpu.dimension_semantics<parallel>], iteration_bounds = array<i64: 2>, scalar_prefetch = 0 : i64, scratch_operands = 0 : i64, tpu.core_type = #tpu.core_type<tc>, window_params = [{transform_indices = @transform_0, window_bounds = array<i64: 1, 5, 60>}, {pipeline_mode = #tpu.pipeline_mode<synchronous>, transform_indices = @transform_1, window_bounds = array<i64: 3, 60, 12>}, {pipeline_mode = #tpu.pipeline_mode<synchronous>, transform_indices = @transform_2, window_bounds = array<i64: 1, 12>}, {transform_indices = @transform_3, window_bounds = array<i64: 1, 1, 12>}]} {
    %c0 = arith.constant 0 : index
    %c0_0 = arith.constant 0 : index
    %c0_1 = arith.constant 0 : index
    %0 = vector.load %arg1[%c0, %c0_0, %c0_1] : memref<1x5x60xbf16, #tpu.memory_space<vmem>>, vector<1x1x60xbf16>
    %1 = vector.shape_cast %0 : vector<1x1x60xbf16> to vector<1x60xbf16>
    %c0_2 = arith.constant 0 : index
    %c0_3 = arith.constant 0 : index
    %c0_4 = arith.constant 0 : index
    %2 = vector.load %arg2[%c0_2, %c0_3, %c0_4] : memref<3x60x12xbf16, #tpu.memory_space<vmem>>, vector<1x60x12xbf16>
    %3 = vector.shape_cast %2 : vector<1x60x12xbf16> to vector<60x12xbf16>
    %cst = arith.constant dense<0.000000e+00> : vector<1x12xf32>
    %4 = tpu.matmul %1, %3, %cst {dimension_numbers = #tpu.dot_dimension_numbers<[1], [0], [0], [1], [0, 0, 1, 1], [], []>} : vector<1x60xbf16>, vector<60x12xbf16>, vector<1x12xf32> -> vector<1x12xf32>
    %c0_5 = arith.constant 0 : index
    %c2 = arith.constant 2 : index
    %c0_6 = arith.constant 0 : index
    %5 = vector.load %arg1[%c0_5, %c2, %c0_6] : memref<1x5x60xbf16, #tpu.memory_space<vmem>>, vector<1x1x60xbf16>
    %6 = vector.shape_cast %5 : vector<1x1x60xbf16> to vector<1x60xbf16>
    %c1 = arith.constant 1 : index
    %c0_7 = arith.constant 0 : index
    %c0_8 = arith.constant 0 : index
    %7 = vector.load %arg2[%c1, %c0_7, %c0_8] : memref<3x60x12xbf16, #tpu.memory_space<vmem>>, vector<1x60x12xbf16>
    %8 = vector.shape_cast %7 : vector<1x60x12xbf16> to vector<60x12xbf16>
    %cst_9 = arith.constant dense<0.000000e+00> : vector<1x12xf32>
    %9 = tpu.matmul %6, %8, %cst_9 {dimension_numbers = #tpu.dot_dimension_numbers<[1], [0], [0], [1], [0, 0, 1, 1], [], []>} : vector<1x60xbf16>, vector<60x12xbf16>, vector<1x12xf32> -> vector<1x12xf32>
    %10 = arith.addf %4, %9 : vector<1x12xf32>
    %c0_10 = arith.constant 0 : index
    %c4 = arith.constant 4 : index
    %c0_11 = arith.constant 0 : index
    %11 = vector.load %arg1[%c0_10, %c4, %c0_11] : memref<1x5x60xbf16, #tpu.memory_space<vmem>>, vector<1x1x60xbf16>
    %12 = vector.shape_cast %11 : vector<1x1x60xbf16> to vector<1x60xbf16>
    %c2_12 = arith.constant 2 : index
    %c0_13 = arith.constant 0 : index
    %c0_14 = arith.constant 0 : index
    %13 = vector.load %arg2[%c2_12, %c0_13, %c0_14] : memref<3x60x12xbf16, #tpu.memory_space<vmem>>, vector<1x60x12xbf16>
    %14 = vector.shape_cast %13 : vector<1x60x12xbf16> to vector<60x12xbf16>
    %cst_15 = arith.constant dense<0.000000e+00> : vector<1x12xf32>
    %15 = tpu.matmul %12, %14, %cst_15 {dimension_numbers = #tpu.dot_dimension_numbers<[1], [0], [0], [1], [0, 0, 1, 1], [], []>} : vector<1x60xbf16>, vector<60x12xbf16>, vector<1x12xf32> -> vector<1x12xf32>
    %16 = arith.addf %10, %15 : vector<1x12xf32>
    %c0_16 = arith.constant 0 : index
    %c0_17 = arith.constant 0 : index
    %17 = vector.load %arg3[%c0_16, %c0_17] : memref<1x12xf32, #tpu.memory_space<vmem>>, vector<1x12xf32>
    %18 = arith.addf %16, %17 : vector<1x12xf32>
    %cst_18 = arith.constant 0.000000e+00 : f32
    %19 = vector.broadcast %cst_18 : f32 to vector<1x12xf32>
    %20 = arith.maximumf %18, %19 : vector<1x12xf32>
    %21 = arith.truncf %20 : vector<1x12xf32> to vector<1x12xbf16>
    %c0_19 = arith.constant 0 : index
    %c0_20 = arith.constant 0 : index
    %c0_21 = arith.constant 0 : index
    %22 = vector.load %arg4[%c0_19, %c0_20, %c0_21] : memref<1x1x12xbf16, #tpu.memory_space<vmem>>, vector<1x1x12xbf16>
    %23 = vector.shape_cast %22 : vector<1x1x12xbf16> to vector<1x12xbf16>
    %24 = vector.shape_cast %21 : vector<1x12xbf16> to vector<1x1x12xbf16>
    tpu.vector_store %arg4[%c0_19, %c0_20, %c0_21], %24 {strides = array<i32>} : memref<1x1x12xbf16, #tpu.memory_space<vmem>>, vector<1x1x12xbf16>,
    return
  }
  func.func @transform_0(%arg0: i32) -> (i32, i32, i32) {
    %c0_i32 = arith.constant 0 : i32
    %c0_i32_0 = arith.constant 0 : i32
    %c0_i32_1 = arith.constant 0 : i32
    return %arg0, %c0_i32, %c0_i32_0 : i32, i32, i32
  }
  func.func @transform_1(%arg0: i32) -> (i32, i32, i32) {
    %c0_i32 = arith.constant 0 : i32
    %c0_i32_0 = arith.constant 0 : i32
    %c0_i32_1 = arith.constant 0 : i32
    %c0_i32_2 = arith.constant 0 : i32
    return %c0_i32, %c0_i32_0, %c0_i32_1 : i32, i32, i32
  }
  func.func @transform_2(%arg0: i32) -> (i32, i32) {
    %c0_i32 = arith.constant 0 : i32
    %c0_i32_0 = arith.constant 0 : i32
    %c0_i32_1 = arith.constant 0 : i32
    return %c0_i32, %c0_i32_0 : i32, i32
  }
  func.func @transform_3(%arg0: i32) -> (i32, i32, i32) {
    %c0_i32 = arith.constant 0 : i32
    %c0_i32_0 = arith.constant 0 : i32
    %c0_i32_1 = arith.constant 0 : i32
    return %arg0, %c0_i32, %c0_i32_0 : i32, i32, i32
  }
}

module attributes {stable_mosaic.version = 11 : i64} {
  func.func @_conv_kernel(%arg0: i32, %arg1: memref<1x11x132xbf16, #tpu.memory_space<vmem>>, %arg2: memref<3x132x12xbf16, #tpu.memory_space<vmem>>, %arg3: memref<1x12xf32, #tpu.memory_space<vmem>>, %arg4: memref<1x1x12xbf16, #tpu.memory_space<vmem>>) attributes {dimension_semantics = [#tpu.dimension_semantics<parallel>], iteration_bounds = array<i64: 2>, scalar_prefetch = 0 : i64, scratch_operands = 0 : i64, tpu.core_type = #tpu.core_type<tc>, window_params = [{transform_indices = @transform_0, window_bounds = array<i64: 1, 11, 132>}, {pipeline_mode = #tpu.pipeline_mode<synchronous>, transform_indices = @transform_1, window_bounds = array<i64: 3, 132, 12>}, {pipeline_mode = #tpu.pipeline_mode<synchronous>, transform_indices = @transform_2, window_bounds = array<i64: 1, 12>}, {transform_indices = @transform_3, window_bounds = array<i64: 1, 1, 12>}]} {
    %c0 = arith.constant 0 : index
    %c0_0 = arith.constant 0 : index
    %c0_1 = arith.constant 0 : index
    %0 = vector.load %arg1[%c0, %c0_0, %c0_1] : memref<1x11x132xbf16, #tpu.memory_space<vmem>>, vector<1x1x132xbf16>
    %1 = vector.shape_cast %0 : vector<1x1x132xbf16> to vector<1x132xbf16>
    %c0_2 = arith.constant 0 : index
    %c0_3 = arith.constant 0 : index
    %c0_4 = arith.constant 0 : index
    %2 = vector.load %arg2[%c0_2, %c0_3, %c0_4] : memref<3x132x12xbf16, #tpu.memory_space<vmem>>, vector<1x132x12xbf16>
    %3 = vector.shape_cast %2 : vector<1x132x12xbf16> to vector<132x12xbf16>
    %cst = arith.constant dense<0.000000e+00> : vector<1x12xf32>
    %4 = tpu.matmul %1, %3, %cst {dimension_numbers = #tpu.dot_dimension_numbers<[1], [0], [0], [1], [0, 0, 1, 1], [], []>} : vector<1x132xbf16>, vector<132x12xbf16>, vector<1x12xf32> -> vector<1x12xf32>
    %c0_5 = arith.constant 0 : index
    %c5 = arith.constant 5 : index
    %c0_6 = arith.constant 0 : index
    %5 = vector.load %arg1[%c0_5, %c5, %c0_6] : memref<1x11x132xbf16, #tpu.memory_space<vmem>>, vector<1x1x132xbf16>
    %6 = vector.shape_cast %5 : vector<1x1x132xbf16> to vector<1x132xbf16>
    %c1 = arith.constant 1 : index
    %c0_7 = arith.constant 0 : index
    %c0_8 = arith.constant 0 : index
    %7 = vector.load %arg2[%c1, %c0_7, %c0_8] : memref<3x132x12xbf16, #tpu.memory_space<vmem>>, vector<1x132x12xbf16>
    %8 = vector.shape_cast %7 : vector<1x132x12xbf16> to vector<132x12xbf16>
    %cst_9 = arith.constant dense<0.000000e+00> : vector<1x12xf32>
    %9 = tpu.matmul %6, %8, %cst_9 {dimension_numbers = #tpu.dot_dimension_numbers<[1], [0], [0], [1], [0, 0, 1, 1], [], []>} : vector<1x132xbf16>, vector<132x12xbf16>, vector<1x12xf32> -> vector<1x12xf32>
    %10 = arith.addf %4, %9 : vector<1x12xf32>
    %c0_10 = arith.constant 0 : index
    %c10 = arith.constant 10 : index
    %c0_11 = arith.constant 0 : index
    %11 = vector.load %arg1[%c0_10, %c10, %c0_11] : memref<1x11x132xbf16, #tpu.memory_space<vmem>>, vector<1x1x132xbf16>
    %12 = vector.shape_cast %11 : vector<1x1x132xbf16> to vector<1x132xbf16>
    %c2 = arith.constant 2 : index
    %c0_12 = arith.constant 0 : index
    %c0_13 = arith.constant 0 : index
    %13 = vector.load %arg2[%c2, %c0_12, %c0_13] : memref<3x132x12xbf16, #tpu.memory_space<vmem>>, vector<1x132x12xbf16>
    %14 = vector.shape_cast %13 : vector<1x132x12xbf16> to vector<132x12xbf16>
    %cst_14 = arith.constant dense<0.000000e+00> : vector<1x12xf32>
    %15 = tpu.matmul %12, %14, %cst_14 {dimension_numbers = #tpu.dot_dimension_numbers<[1], [0], [0], [1], [0, 0, 1, 1], [], []>} : vector<1x132xbf16>, vector<132x12xbf16>, vector<1x12xf32> -> vector<1x12xf32>
    %16 = arith.addf %10, %15 : vector<1x12xf32>
    %c0_15 = arith.constant 0 : index
    %c0_16 = arith.constant 0 : index
    %17 = vector.load %arg3[%c0_15, %c0_16] : memref<1x12xf32, #tpu.memory_space<vmem>>, vector<1x12xf32>
    %18 = arith.addf %16, %17 : vector<1x12xf32>
    %cst_17 = arith.constant 0.000000e+00 : f32
    %19 = vector.broadcast %cst_17 : f32 to vector<1x12xf32>
    %20 = arith.maximumf %18, %19 : vector<1x12xf32>
    %21 = arith.truncf %20 : vector<1x12xf32> to vector<1x12xbf16>
    %c0_18 = arith.constant 0 : index
    %c0_19 = arith.constant 0 : index
    %c0_20 = arith.constant 0 : index
    %22 = vector.load %arg4[%c0_18, %c0_19, %c0_20] : memref<1x1x12xbf16, #tpu.memory_space<vmem>>, vector<1x1x12xbf16>
    %23 = vector.shape_cast %22 : vector<1x1x12xbf16> to vector<1x12xbf16>
    %24 = vector.shape_cast %21 : vector<1x12xbf16> to vector<1x1x12xbf16>
    tpu.vector_store %arg4[%c0_18, %c0_19, %c0_20], %24 {strides = array<i32>} : memref<1x1x12xbf16, #tpu.memory_space<vmem>>, vector<1x1x12xbf16>,
    return
  }
  func.func @transform_0(%arg0: i32) -> (i32, i32, i32) {
    %c0_i32 = arith.constant 0 : i32
    %c0_i32_0 = arith.constant 0 : i32
    %c0_i32_1 = arith.constant 0 : i32
    return %arg0, %c0_i32, %c0_i32_0 : i32, i32, i32
  }
  func.func @transform_1(%arg0: i32) -> (i32, i32, i32) {
    %c0_i32 = arith.constant 0 : i32
    %c0_i32_0 = arith.constant 0 : i32
    %c0_i32_1 = arith.constant 0 : i32
    %c0_i32_2 = arith.constant 0 : i32
    return %c0_i32, %c0_i32_0, %c0_i32_1 : i32, i32, i32
  }
  func.func @transform_2(%arg0: i32) -> (i32, i32) {
    %c0_i32 = arith.constant 0 : i32
    %c0_i32_0 = arith.constant 0 : i32
    %c0_i32_1 = arith.constant 0 : i32
    return %c0_i32, %c0_i32_0 : i32, i32
  }
  func.func @transform_3(%arg0: i32) -> (i32, i32, i32) {
    %c0_i32 = arith.constant 0 : i32
    %c0_i32_0 = arith.constant 0 : i32
    %c0_i32_1 = arith.constant 0 : i32
    return %arg0, %c0_i32, %c0_i32_0 : i32, i32, i32
  }
}

module attributes {stable_mosaic.version = 11 : i64} {
  func.func @_conv_kernel(%arg0: i32, %arg1: memref<1x3x36xbf16, #tpu.memory_space<vmem>>, %arg2: memref<3x36x12xbf16, #tpu.memory_space<vmem>>, %arg3: memref<1x12xf32, #tpu.memory_space<vmem>>, %arg4: memref<1x1x12xbf16, #tpu.memory_space<vmem>>) attributes {dimension_semantics = [#tpu.dimension_semantics<parallel>], iteration_bounds = array<i64: 2>, scalar_prefetch = 0 : i64, scratch_operands = 0 : i64, tpu.core_type = #tpu.core_type<tc>, window_params = [{transform_indices = @transform_0, window_bounds = array<i64: 1, 3, 36>}, {pipeline_mode = #tpu.pipeline_mode<synchronous>, transform_indices = @transform_1, window_bounds = array<i64: 3, 36, 12>}, {pipeline_mode = #tpu.pipeline_mode<synchronous>, transform_indices = @transform_2, window_bounds = array<i64: 1, 12>}, {transform_indices = @transform_3, window_bounds = array<i64: 1, 1, 12>}]} {
    %c0 = arith.constant 0 : index
    %c0_0 = arith.constant 0 : index
    %c0_1 = arith.constant 0 : index
    %0 = vector.load %arg1[%c0, %c0_0, %c0_1] : memref<1x3x36xbf16, #tpu.memory_space<vmem>>, vector<1x1x36xbf16>
    %1 = vector.shape_cast %0 : vector<1x1x36xbf16> to vector<1x36xbf16>
    %c0_2 = arith.constant 0 : index
    %c0_3 = arith.constant 0 : index
    %c0_4 = arith.constant 0 : index
    %2 = vector.load %arg2[%c0_2, %c0_3, %c0_4] : memref<3x36x12xbf16, #tpu.memory_space<vmem>>, vector<1x36x12xbf16>
    %3 = vector.shape_cast %2 : vector<1x36x12xbf16> to vector<36x12xbf16>
    %cst = arith.constant dense<0.000000e+00> : vector<1x12xf32>
    %4 = tpu.matmul %1, %3, %cst {dimension_numbers = #tpu.dot_dimension_numbers<[1], [0], [0], [1], [0, 0, 1, 1], [], []>} : vector<1x36xbf16>, vector<36x12xbf16>, vector<1x12xf32> -> vector<1x12xf32>
    %c0_5 = arith.constant 0 : index
    %c1 = arith.constant 1 : index
    %c0_6 = arith.constant 0 : index
    %5 = vector.load %arg1[%c0_5, %c1, %c0_6] : memref<1x3x36xbf16, #tpu.memory_space<vmem>>, vector<1x1x36xbf16>
    %6 = vector.shape_cast %5 : vector<1x1x36xbf16> to vector<1x36xbf16>
    %c1_7 = arith.constant 1 : index
    %c0_8 = arith.constant 0 : index
    %c0_9 = arith.constant 0 : index
    %7 = vector.load %arg2[%c1_7, %c0_8, %c0_9] : memref<3x36x12xbf16, #tpu.memory_space<vmem>>, vector<1x36x12xbf16>
    %8 = vector.shape_cast %7 : vector<1x36x12xbf16> to vector<36x12xbf16>
    %cst_10 = arith.constant dense<0.000000e+00> : vector<1x12xf32>
    %9 = tpu.matmul %6, %8, %cst_10 {dimension_numbers = #tpu.dot_dimension_numbers<[1], [0], [0], [1], [0, 0, 1, 1], [], []>} : vector<1x36xbf16>, vector<36x12xbf16>, vector<1x12xf32> -> vector<1x12xf32>
    %10 = arith.addf %4, %9 : vector<1x12xf32>
    %c0_11 = arith.constant 0 : index
    %c2 = arith.constant 2 : index
    %c0_12 = arith.constant 0 : index
    %11 = vector.load %arg1[%c0_11, %c2, %c0_12] : memref<1x3x36xbf16, #tpu.memory_space<vmem>>, vector<1x1x36xbf16>
    %12 = vector.shape_cast %11 : vector<1x1x36xbf16> to vector<1x36xbf16>
    %c2_13 = arith.constant 2 : index
    %c0_14 = arith.constant 0 : index
    %c0_15 = arith.constant 0 : index
    %13 = vector.load %arg2[%c2_13, %c0_14, %c0_15] : memref<3x36x12xbf16, #tpu.memory_space<vmem>>, vector<1x36x12xbf16>
    %14 = vector.shape_cast %13 : vector<1x36x12xbf16> to vector<36x12xbf16>
    %cst_16 = arith.constant dense<0.000000e+00> : vector<1x12xf32>
    %15 = tpu.matmul %12, %14, %cst_16 {dimension_numbers = #tpu.dot_dimension_numbers<[1], [0], [0], [1], [0, 0, 1, 1], [], []>} : vector<1x36xbf16>, vector<36x12xbf16>, vector<1x12xf32> -> vector<1x12xf32>
    %16 = arith.addf %10, %15 : vector<1x12xf32>
    %c0_17 = arith.constant 0 : index
    %c0_18 = arith.constant 0 : index
    %17 = vector.load %arg3[%c0_17, %c0_18] : memref<1x12xf32, #tpu.memory_space<vmem>>, vector<1x12xf32>
    %18 = arith.addf %16, %17 : vector<1x12xf32>
    %cst_19 = arith.constant 0.000000e+00 : f32
    %19 = vector.broadcast %cst_19 : f32 to vector<1x12xf32>
    %20 = arith.maximumf %18, %19 : vector<1x12xf32>
    %21 = arith.truncf %20 : vector<1x12xf32> to vector<1x12xbf16>
    %c0_20 = arith.constant 0 : index
    %c0_21 = arith.constant 0 : index
    %c0_22 = arith.constant 0 : index
    %22 = vector.load %arg4[%c0_20, %c0_21, %c0_22] : memref<1x1x12xbf16, #tpu.memory_space<vmem>>, vector<1x1x12xbf16>
    %23 = vector.shape_cast %22 : vector<1x1x12xbf16> to vector<1x12xbf16>
    %24 = vector.shape_cast %21 : vector<1x12xbf16> to vector<1x1x12xbf16>
    tpu.vector_store %arg4[%c0_20, %c0_21, %c0_22], %24 {strides = array<i32>} : memref<1x1x12xbf16, #tpu.memory_space<vmem>>, vector<1x1x12xbf16>,
    return
  }
  func.func @transform_0(%arg0: i32) -> (i32, i32, i32) {
    %c0_i32 = arith.constant 0 : i32
    %c0_i32_0 = arith.constant 0 : i32
    %c0_i32_1 = arith.constant 0 : i32
    return %arg0, %c0_i32, %c0_i32_0 : i32, i32, i32
  }
  func.func @transform_1(%arg0: i32) -> (i32, i32, i32) {
    %c0_i32 = arith.constant 0 : i32
    %c0_i32_0 = arith.constant 0 : i32
    %c0_i32_1 = arith.constant 0 : i32
    %c0_i32_2 = arith.constant 0 : i32
    return %c0_i32, %c0_i32_0, %c0_i32_1 : i32, i32, i32
  }
  func.func @transform_2(%arg0: i32) -> (i32, i32) {
    %c0_i32 = arith.constant 0 : i32
    %c0_i32_0 = arith.constant 0 : i32
    %c0_i32_1 = arith.constant 0 : i32
    return %c0_i32, %c0_i32_0 : i32, i32
  }
  func.func @transform_3(%arg0: i32) -> (i32, i32, i32) {
    %c0_i32 = arith.constant 0 : i32
    %c0_i32_0 = arith.constant 0 : i32
    %c0_i32_1 = arith.constant 0 : i32
    return %arg0, %c0_i32, %c0_i32_0 : i32, i32, i32
  }
}

module attributes {stable_mosaic.version = 11 : i64} {
  func.func @_conv_kernel(%arg0: i32, %arg1: memref<1x6x72xbf16, #tpu.memory_space<vmem>>, %arg2: memref<3x72x48xbf16, #tpu.memory_space<vmem>>, %arg3: memref<1x48xf32, #tpu.memory_space<vmem>>, %arg4: memref<1x4x48xbf16, #tpu.memory_space<vmem>>) attributes {dimension_semantics = [#tpu.dimension_semantics<parallel>], iteration_bounds = array<i64: 2>, scalar_prefetch = 0 : i64, scratch_operands = 0 : i64, tpu.core_type = #tpu.core_type<tc>, window_params = [{transform_indices = @transform_0, window_bounds = array<i64: 1, 6, 72>}, {pipeline_mode = #tpu.pipeline_mode<synchronous>, transform_indices = @transform_1, window_bounds = array<i64: 3, 72, 48>}, {pipeline_mode = #tpu.pipeline_mode<synchronous>, transform_indices = @transform_2, window_bounds = array<i64: 1, 48>}, {transform_indices = @transform_3, window_bounds = array<i64: 1, 4, 48>}]} {
    %c0 = arith.constant 0 : index
    %c0_0 = arith.constant 0 : index
    %c0_1 = arith.constant 0 : index
    %0 = vector.load %arg1[%c0, %c0_0, %c0_1] : memref<1x6x72xbf16, #tpu.memory_space<vmem>>, vector<1x4x72xbf16>
    %1 = vector.shape_cast %0 : vector<1x4x72xbf16> to vector<4x72xbf16>
    %c0_2 = arith.constant 0 : index
    %c0_3 = arith.constant 0 : index
    %c0_4 = arith.constant 0 : index
    %2 = vector.load %arg2[%c0_2, %c0_3, %c0_4] : memref<3x72x48xbf16, #tpu.memory_space<vmem>>, vector<1x72x48xbf16>
    %3 = vector.shape_cast %2 : vector<1x72x48xbf16> to vector<72x48xbf16>
    %cst = arith.constant dense<0.000000e+00> : vector<4x48xf32>
    %4 = tpu.matmul %1, %3, %cst {dimension_numbers = #tpu.dot_dimension_numbers<[1], [0], [0], [1], [0, 0, 1, 1], [], []>} : vector<4x72xbf16>, vector<72x48xbf16>, vector<4x48xf32> -> vector<4x48xf32>
    %c0_5 = arith.constant 0 : index
    %c1 = arith.constant 1 : index
    %c0_6 = arith.constant 0 : index
    %5 = vector.load %arg1[%c0_5, %c1, %c0_6] : memref<1x6x72xbf16, #tpu.memory_space<vmem>>, vector<1x4x72xbf16>
    %6 = vector.shape_cast %5 : vector<1x4x72xbf16> to vector<4x72xbf16>
    %c1_7 = arith.constant 1 : index
    %c0_8 = arith.constant 0 : index
    %c0_9 = arith.constant 0 : index
    %7 = vector.load %arg2[%c1_7, %c0_8, %c0_9] : memref<3x72x48xbf16, #tpu.memory_space<vmem>>, vector<1x72x48xbf16>
    %8 = vector.shape_cast %7 : vector<1x72x48xbf16> to vector<72x48xbf16>
    %cst_10 = arith.constant dense<0.000000e+00> : vector<4x48xf32>
    %9 = tpu.matmul %6, %8, %cst_10 {dimension_numbers = #tpu.dot_dimension_numbers<[1], [0], [0], [1], [0, 0, 1, 1], [], []>} : vector<4x72xbf16>, vector<72x48xbf16>, vector<4x48xf32> -> vector<4x48xf32>
    %10 = arith.addf %4, %9 : vector<4x48xf32>
    %c0_11 = arith.constant 0 : index
    %c2 = arith.constant 2 : index
    %c0_12 = arith.constant 0 : index
    %11 = vector.load %arg1[%c0_11, %c2, %c0_12] : memref<1x6x72xbf16, #tpu.memory_space<vmem>>, vector<1x4x72xbf16>
    %12 = vector.shape_cast %11 : vector<1x4x72xbf16> to vector<4x72xbf16>
    %c2_13 = arith.constant 2 : index
    %c0_14 = arith.constant 0 : index
    %c0_15 = arith.constant 0 : index
    %13 = vector.load %arg2[%c2_13, %c0_14, %c0_15] : memref<3x72x48xbf16, #tpu.memory_space<vmem>>, vector<1x72x48xbf16>
    %14 = vector.shape_cast %13 : vector<1x72x48xbf16> to vector<72x48xbf16>
    %cst_16 = arith.constant dense<0.000000e+00> : vector<4x48xf32>
    %15 = tpu.matmul %12, %14, %cst_16 {dimension_numbers = #tpu.dot_dimension_numbers<[1], [0], [0], [1], [0, 0, 1, 1], [], []>} : vector<4x72xbf16>, vector<72x48xbf16>, vector<4x48xf32> -> vector<4x48xf32>
    %16 = arith.addf %10, %15 : vector<4x48xf32>
    %c0_17 = arith.constant 0 : index
    %c0_18 = arith.constant 0 : index
    %17 = vector.load %arg3[%c0_17, %c0_18] : memref<1x48xf32, #tpu.memory_space<vmem>>, vector<1x48xf32>
    %18 = vector.broadcast %17 : vector<1x48xf32> to vector<4x48xf32>
    %19 = arith.addf %16, %18 : vector<4x48xf32>
    %cst_19 = arith.constant 0.000000e+00 : f32
    %20 = vector.broadcast %cst_19 : f32 to vector<4x48xf32>
    %21 = arith.maximumf %19, %20 : vector<4x48xf32>
    %22 = arith.truncf %21 : vector<4x48xf32> to vector<4x48xbf16>
    %c0_20 = arith.constant 0 : index
    %c0_21 = arith.constant 0 : index
    %c0_22 = arith.constant 0 : index
    %23 = vector.load %arg4[%c0_20, %c0_21, %c0_22] : memref<1x4x48xbf16, #tpu.memory_space<vmem>>, vector<1x4x48xbf16>
    %24 = vector.shape_cast %23 : vector<1x4x48xbf16> to vector<4x48xbf16>
    %25 = vector.shape_cast %22 : vector<4x48xbf16> to vector<1x4x48xbf16>
    tpu.vector_store %arg4[%c0_20, %c0_21, %c0_22], %25 {strides = array<i32>} : memref<1x4x48xbf16, #tpu.memory_space<vmem>>, vector<1x4x48xbf16>,
    return
  }
  func.func @transform_0(%arg0: i32) -> (i32, i32, i32) {
    %c0_i32 = arith.constant 0 : i32
    %c0_i32_0 = arith.constant 0 : i32
    %c0_i32_1 = arith.constant 0 : i32
    return %arg0, %c0_i32, %c0_i32_0 : i32, i32, i32
  }
  func.func @transform_1(%arg0: i32) -> (i32, i32, i32) {
    %c0_i32 = arith.constant 0 : i32
    %c0_i32_0 = arith.constant 0 : i32
    %c0_i32_1 = arith.constant 0 : i32
    %c0_i32_2 = arith.constant 0 : i32
    return %c0_i32, %c0_i32_0, %c0_i32_1 : i32, i32, i32
  }
  func.func @transform_2(%arg0: i32) -> (i32, i32) {
    %c0_i32 = arith.constant 0 : i32
    %c0_i32_0 = arith.constant 0 : i32
    %c0_i32_1 = arith.constant 0 : i32
    return %c0_i32, %c0_i32_0 : i32, i32
  }
  func.func @transform_3(%arg0: i32) -> (i32, i32, i32) {
    %c0_i32 = arith.constant 0 : i32
    %c0_i32_0 = arith.constant 0 : i32
    %c0_i32_1 = arith.constant 0 : i32
    return %arg0, %c0_i32, %c0_i32_0 : i32, i32, i32
  }
}

module attributes {stable_mosaic.version = 11 : i64} {
  func.func @_conv_kernel(%arg0: i32, %arg1: memref<1x10x120xbf16, #tpu.memory_space<vmem>>, %arg2: memref<3x120x96xbf16, #tpu.memory_space<vmem>>, %arg3: memref<1x96xf32, #tpu.memory_space<vmem>>, %arg4: memref<1x8x96xbf16, #tpu.memory_space<vmem>>) attributes {dimension_semantics = [#tpu.dimension_semantics<parallel>], iteration_bounds = array<i64: 2>, scalar_prefetch = 0 : i64, scratch_operands = 0 : i64, tpu.core_type = #tpu.core_type<tc>, window_params = [{transform_indices = @transform_0, window_bounds = array<i64: 1, 10, 120>}, {pipeline_mode = #tpu.pipeline_mode<synchronous>, transform_indices = @transform_1, window_bounds = array<i64: 3, 120, 96>}, {pipeline_mode = #tpu.pipeline_mode<synchronous>, transform_indices = @transform_2, window_bounds = array<i64: 1, 96>}, {transform_indices = @transform_3, window_bounds = array<i64: 1, 8, 96>}]} {
    %c0 = arith.constant 0 : index
    %c0_0 = arith.constant 0 : index
    %c0_1 = arith.constant 0 : index
    %0 = vector.load %arg1[%c0, %c0_0, %c0_1] : memref<1x10x120xbf16, #tpu.memory_space<vmem>>, vector<1x8x120xbf16>
    %1 = vector.shape_cast %0 : vector<1x8x120xbf16> to vector<8x120xbf16>
    %c0_2 = arith.constant 0 : index
    %c0_3 = arith.constant 0 : index
    %c0_4 = arith.constant 0 : index
    %2 = vector.load %arg2[%c0_2, %c0_3, %c0_4] : memref<3x120x96xbf16, #tpu.memory_space<vmem>>, vector<1x120x96xbf16>
    %3 = vector.shape_cast %2 : vector<1x120x96xbf16> to vector<120x96xbf16>
    %cst = arith.constant dense<0.000000e+00> : vector<8x96xf32>
    %4 = tpu.matmul %1, %3, %cst {dimension_numbers = #tpu.dot_dimension_numbers<[1], [0], [0], [1], [0, 0, 1, 1], [], []>} : vector<8x120xbf16>, vector<120x96xbf16>, vector<8x96xf32> -> vector<8x96xf32>
    %c0_5 = arith.constant 0 : index
    %c1 = arith.constant 1 : index
    %c0_6 = arith.constant 0 : index
    %5 = vector.load %arg1[%c0_5, %c1, %c0_6] : memref<1x10x120xbf16, #tpu.memory_space<vmem>>, vector<1x8x120xbf16>
    %6 = vector.shape_cast %5 : vector<1x8x120xbf16> to vector<8x120xbf16>
    %c1_7 = arith.constant 1 : index
    %c0_8 = arith.constant 0 : index
    %c0_9 = arith.constant 0 : index
    %7 = vector.load %arg2[%c1_7, %c0_8, %c0_9] : memref<3x120x96xbf16, #tpu.memory_space<vmem>>, vector<1x120x96xbf16>
    %8 = vector.shape_cast %7 : vector<1x120x96xbf16> to vector<120x96xbf16>
    %cst_10 = arith.constant dense<0.000000e+00> : vector<8x96xf32>
    %9 = tpu.matmul %6, %8, %cst_10 {dimension_numbers = #tpu.dot_dimension_numbers<[1], [0], [0], [1], [0, 0, 1, 1], [], []>} : vector<8x120xbf16>, vector<120x96xbf16>, vector<8x96xf32> -> vector<8x96xf32>
    %10 = arith.addf %4, %9 : vector<8x96xf32>
    %c0_11 = arith.constant 0 : index
    %c2 = arith.constant 2 : index
    %c0_12 = arith.constant 0 : index
    %11 = vector.load %arg1[%c0_11, %c2, %c0_12] : memref<1x10x120xbf16, #tpu.memory_space<vmem>>, vector<1x8x120xbf16>
    %12 = vector.shape_cast %11 : vector<1x8x120xbf16> to vector<8x120xbf16>
    %c2_13 = arith.constant 2 : index
    %c0_14 = arith.constant 0 : index
    %c0_15 = arith.constant 0 : index
    %13 = vector.load %arg2[%c2_13, %c0_14, %c0_15] : memref<3x120x96xbf16, #tpu.memory_space<vmem>>, vector<1x120x96xbf16>
    %14 = vector.shape_cast %13 : vector<1x120x96xbf16> to vector<120x96xbf16>
    %cst_16 = arith.constant dense<0.000000e+00> : vector<8x96xf32>
    %15 = tpu.matmul %12, %14, %cst_16 {dimension_numbers = #tpu.dot_dimension_numbers<[1], [0], [0], [1], [0, 0, 1, 1], [], []>} : vector<8x120xbf16>, vector<120x96xbf16>, vector<8x96xf32> -> vector<8x96xf32>
    %16 = arith.addf %10, %15 : vector<8x96xf32>
    %c0_17 = arith.constant 0 : index
    %c0_18 = arith.constant 0 : index
    %17 = vector.load %arg3[%c0_17, %c0_18] : memref<1x96xf32, #tpu.memory_space<vmem>>, vector<1x96xf32>
    %18 = vector.broadcast %17 : vector<1x96xf32> to vector<8x96xf32>
    %19 = arith.addf %16, %18 : vector<8x96xf32>
    %cst_19 = arith.constant 0.000000e+00 : f32
    %20 = vector.broadcast %cst_19 : f32 to vector<8x96xf32>
    %21 = arith.maximumf %19, %20 : vector<8x96xf32>
    %22 = arith.truncf %21 : vector<8x96xf32> to vector<8x96xbf16>
    %c0_20 = arith.constant 0 : index
    %c0_21 = arith.constant 0 : index
    %c0_22 = arith.constant 0 : index
    %23 = vector.load %arg4[%c0_20, %c0_21, %c0_22] : memref<1x8x96xbf16, #tpu.memory_space<vmem>>, vector<1x8x96xbf16>
    %24 = vector.shape_cast %23 : vector<1x8x96xbf16> to vector<8x96xbf16>
    %25 = vector.shape_cast %22 : vector<8x96xbf16> to vector<1x8x96xbf16>
    tpu.vector_store %arg4[%c0_20, %c0_21, %c0_22], %25 {strides = array<i32>} : memref<1x8x96xbf16, #tpu.memory_space<vmem>>, vector<1x8x96xbf16>,
    return
  }
  func.func @transform_0(%arg0: i32) -> (i32, i32, i32) {
    %c0_i32 = arith.constant 0 : i32
    %c0_i32_0 = arith.constant 0 : i32
    %c0_i32_1 = arith.constant 0 : i32
    return %arg0, %c0_i32, %c0_i32_0 : i32, i32, i32
  }
  func.func @transform_1(%arg0: i32) -> (i32, i32, i32) {
    %c0_i32 = arith.constant 0 : i32
    %c0_i32_0 = arith.constant 0 : i32
    %c0_i32_1 = arith.constant 0 : i32
    %c0_i32_2 = arith.constant 0 : i32
    return %c0_i32, %c0_i32_0, %c0_i32_1 : i32, i32, i32
  }
  func.func @transform_2(%arg0: i32) -> (i32, i32) {
    %c0_i32 = arith.constant 0 : i32
    %c0_i32_0 = arith.constant 0 : i32
    %c0_i32_1 = arith.constant 0 : i32
    return %c0_i32, %c0_i32_0 : i32, i32
  }
  func.func @transform_3(%arg0: i32) -> (i32, i32, i32) {
    %c0_i32 = arith.constant 0 : i32
    %c0_i32_0 = arith.constant 0 : i32
    %c0_i32_1 = arith.constant 0 : i32
    return %arg0, %c0_i32, %c0_i32_0 : i32, i32, i32
  }
}

module attributes {stable_mosaic.version = 11 : i64} {
  func.func @_conv_kernel(%arg0: i32, %arg1: memref<1x34x408xbf16, #tpu.memory_space<vmem>>, %arg2: memref<3x408x96xbf16, #tpu.memory_space<vmem>>, %arg3: memref<1x96xf32, #tpu.memory_space<vmem>>, %arg4: memref<1x32x96xbf16, #tpu.memory_space<vmem>>) attributes {dimension_semantics = [#tpu.dimension_semantics<parallel>], iteration_bounds = array<i64: 2>, scalar_prefetch = 0 : i64, scratch_operands = 0 : i64, tpu.core_type = #tpu.core_type<tc>, window_params = [{transform_indices = @transform_0, window_bounds = array<i64: 1, 34, 408>}, {pipeline_mode = #tpu.pipeline_mode<synchronous>, transform_indices = @transform_1, window_bounds = array<i64: 3, 408, 96>}, {pipeline_mode = #tpu.pipeline_mode<synchronous>, transform_indices = @transform_2, window_bounds = array<i64: 1, 96>}, {transform_indices = @transform_3, window_bounds = array<i64: 1, 32, 96>}]} {
    %c0 = arith.constant 0 : index
    %c0_0 = arith.constant 0 : index
    %c0_1 = arith.constant 0 : index
    %0 = vector.load %arg1[%c0, %c0_0, %c0_1] : memref<1x34x408xbf16, #tpu.memory_space<vmem>>, vector<1x32x408xbf16>
    %1 = vector.shape_cast %0 : vector<1x32x408xbf16> to vector<32x408xbf16>
    %c0_2 = arith.constant 0 : index
    %c0_3 = arith.constant 0 : index
    %c0_4 = arith.constant 0 : index
    %2 = vector.load %arg2[%c0_2, %c0_3, %c0_4] : memref<3x408x96xbf16, #tpu.memory_space<vmem>>, vector<1x408x96xbf16>
    %3 = vector.shape_cast %2 : vector<1x408x96xbf16> to vector<408x96xbf16>
    %cst = arith.constant dense<0.000000e+00> : vector<32x96xf32>
    %4 = tpu.matmul %1, %3, %cst {dimension_numbers = #tpu.dot_dimension_numbers<[1], [0], [0], [1], [0, 0, 1, 1], [], []>} : vector<32x408xbf16>, vector<408x96xbf16>, vector<32x96xf32> -> vector<32x96xf32>
    %c0_5 = arith.constant 0 : index
    %c1 = arith.constant 1 : index
    %c0_6 = arith.constant 0 : index
    %5 = vector.load %arg1[%c0_5, %c1, %c0_6] : memref<1x34x408xbf16, #tpu.memory_space<vmem>>, vector<1x32x408xbf16>
    %6 = vector.shape_cast %5 : vector<1x32x408xbf16> to vector<32x408xbf16>
    %c1_7 = arith.constant 1 : index
    %c0_8 = arith.constant 0 : index
    %c0_9 = arith.constant 0 : index
    %7 = vector.load %arg2[%c1_7, %c0_8, %c0_9] : memref<3x408x96xbf16, #tpu.memory_space<vmem>>, vector<1x408x96xbf16>
    %8 = vector.shape_cast %7 : vector<1x408x96xbf16> to vector<408x96xbf16>
    %cst_10 = arith.constant dense<0.000000e+00> : vector<32x96xf32>
    %9 = tpu.matmul %6, %8, %cst_10 {dimension_numbers = #tpu.dot_dimension_numbers<[1], [0], [0], [1], [0, 0, 1, 1], [], []>} : vector<32x408xbf16>, vector<408x96xbf16>, vector<32x96xf32> -> vector<32x96xf32>
    %10 = arith.addf %4, %9 : vector<32x96xf32>
    %c0_11 = arith.constant 0 : index
    %c2 = arith.constant 2 : index
    %c0_12 = arith.constant 0 : index
    %11 = vector.load %arg1[%c0_11, %c2, %c0_12] : memref<1x34x408xbf16, #tpu.memory_space<vmem>>, vector<1x32x408xbf16>
    %12 = vector.shape_cast %11 : vector<1x32x408xbf16> to vector<32x408xbf16>
    %c2_13 = arith.constant 2 : index
    %c0_14 = arith.constant 0 : index
    %c0_15 = arith.constant 0 : index
    %13 = vector.load %arg2[%c2_13, %c0_14, %c0_15] : memref<3x408x96xbf16, #tpu.memory_space<vmem>>, vector<1x408x96xbf16>
    %14 = vector.shape_cast %13 : vector<1x408x96xbf16> to vector<408x96xbf16>
    %cst_16 = arith.constant dense<0.000000e+00> : vector<32x96xf32>
    %15 = tpu.matmul %12, %14, %cst_16 {dimension_numbers = #tpu.dot_dimension_numbers<[1], [0], [0], [1], [0, 0, 1, 1], [], []>} : vector<32x408xbf16>, vector<408x96xbf16>, vector<32x96xf32> -> vector<32x96xf32>
    %16 = arith.addf %10, %15 : vector<32x96xf32>
    %c0_17 = arith.constant 0 : index
    %c0_18 = arith.constant 0 : index
    %17 = vector.load %arg3[%c0_17, %c0_18] : memref<1x96xf32, #tpu.memory_space<vmem>>, vector<1x96xf32>
    %18 = vector.broadcast %17 : vector<1x96xf32> to vector<32x96xf32>
    %19 = arith.addf %16, %18 : vector<32x96xf32>
    %cst_19 = arith.constant 0.000000e+00 : f32
    %20 = vector.broadcast %cst_19 : f32 to vector<32x96xf32>
    %21 = arith.maximumf %19, %20 : vector<32x96xf32>
    %22 = arith.truncf %21 : vector<32x96xf32> to vector<32x96xbf16>
    %c0_20 = arith.constant 0 : index
    %c0_21 = arith.constant 0 : index
    %c0_22 = arith.constant 0 : index
    %23 = vector.load %arg4[%c0_20, %c0_21, %c0_22] : memref<1x32x96xbf16, #tpu.memory_space<vmem>>, vector<1x32x96xbf16>
    %24 = vector.shape_cast %23 : vector<1x32x96xbf16> to vector<32x96xbf16>
    %25 = vector.shape_cast %22 : vector<32x96xbf16> to vector<1x32x96xbf16>
    tpu.vector_store %arg4[%c0_20, %c0_21, %c0_22], %25 {strides = array<i32>} : memref<1x32x96xbf16, #tpu.memory_space<vmem>>, vector<1x32x96xbf16>,
    return
  }
  func.func @transform_0(%arg0: i32) -> (i32, i32, i32) {
    %c0_i32 = arith.constant 0 : i32
    %c0_i32_0 = arith.constant 0 : i32
    %c0_i32_1 = arith.constant 0 : i32
    return %arg0, %c0_i32, %c0_i32_0 : i32, i32, i32
  }
  func.func @transform_1(%arg0: i32) -> (i32, i32, i32) {
    %c0_i32 = arith.constant 0 : i32
    %c0_i32_0 = arith.constant 0 : i32
    %c0_i32_1 = arith.constant 0 : i32
    %c0_i32_2 = arith.constant 0 : i32
    return %c0_i32, %c0_i32_0, %c0_i32_1 : i32, i32, i32
  }
  func.func @transform_2(%arg0: i32) -> (i32, i32) {
    %c0_i32 = arith.constant 0 : i32
    %c0_i32_0 = arith.constant 0 : i32
    %c0_i32_1 = arith.constant 0 : i32
    return %c0_i32, %c0_i32_0 : i32, i32
  }
  func.func @transform_3(%arg0: i32) -> (i32, i32, i32) {
    %c0_i32 = arith.constant 0 : i32
    %c0_i32_0 = arith.constant 0 : i32
    %c0_i32_1 = arith.constant 0 : i32
    return %arg0, %c0_i32, %c0_i32_0 : i32, i32, i32
  }
}

</mosaic_0001>

<bundles_post_ra>
// kernel: tile.57
= control target key start
LH: loop header
LB: loop body
LE: loop exit
PB: predicated region body
PF: predicated region fallthrough
CT: control target
= control target key end

     0   :  { %s40_s0 = inlined_call_operand.vmem [shape: f32[3], index: 0, kind: input, shape index: {}]   ;;  %s41_s1 = inlined_call_operand.vmem [shape: f32[32,3], index: 1, kind: output, shape index: {}]  }
   0x1   :  { %v4_v0 = vld [vmem:[%s40_s0] ss:$0 sm:$0xff] }
   0x2   :  { %5 = vst [vmem:[%s41_s1] sm:$0xff] %v4_v0  ;;  %12 = vst [vmem:[%s41_s1 + $0x8] sm:$0xff] %v4_v0 }
   0x3   :  { %13 = vst [vmem:[%s41_s1 + $0x10] sm:$0xff] %v4_v0  ;;  %14 = vst [vmem:[%s41_s1 + $0x18] sm:$0xff] %v4_v0 }

// kernel: tile.58
= control target key start
LH: loop header
LB: loop body
LE: loop exit
PB: predicated region body
PF: predicated region fallthrough
CT: control target
= control target key end

     0   :  { %s259_s10 = smov 93   ;;  %s260_s11 = smov 87   ;;  %vm3_vm0 = vcmask 23552   ;;  %vm9_vm1 = vcmask 786152   ;;  %vm15_vm2 = vcmask 761552   ;;  %vm21_vm3 = vcmask 736952   ;;  %s399_s0 = inlined_call_operand.vmem [shape: f32[32,3], index: 0, kind: input, shape index: {}]   ;;  %s400_s1 = inlined_call_operand.vmem [shape: f32[1,96], index: 1, kind: output, shape index: {}]  }
   0x1   :  { %v197_v0 = vld [vmem:[%s399_s0 + $0x1f] sm:$0x1]   ;;  %v199_v1 = vld [vmem:[%s399_s0 + $0x1d] sm:$0x1]   ;;  %v198_v2 = vld [vmem:[%s399_s0 + $0x1e] sm:$0x1]  }
   0x2   :  { %7 = vrot.lane.b32.xlu0 %v197_v0, %s259_s10  ;;  %19 = vrot.lane.b32.xlu1 %v199_v1, %s260_s11  ;;  %v200_v3 = vld [vmem:[%s399_s0 + $0x1c] sm:$0x1]   ;;  %s261_s16 = smov 90   ;;  %s262_s17 = smov 84   ;;  %v201_v4 = vld [vmem:[%s399_s0 + $0x1b] sm:$0x1]  }
   0x3   :  { %v202_v5 = vld [vmem:[%s399_s0 + $0x1a] sm:$0x1]   ;;  %s263_s22 = smov 81   ;;  %s264_s23 = smov 78   ;;  %v203_v6 = vld [vmem:[%s399_s0 + $0x19] sm:$0x1]  }
   0x4   :  { %v204_v7 = vld [vmem:[%s399_s0 + $0x18] sm:$0x1]   ;;  %s265_s28 = smov 75   ;;  %s266_s29 = smov 72   ;;  %v205_v8 = vld [vmem:[%s399_s0 + $0x17] sm:$0x1]  }
   0x5   :  { %v206_v9 = vld [vmem:[%s399_s0 + $0x16] sm:$0x1]   ;;  %v2_v10 = vld [vmem:[%s399_s0] sm:$0x1]   ;;  %s267_s7 = smov 69   ;;  %s268_s8 = smov 66  }
   0x6   :  { %13 = vrot.lane.b32.xlu0 %v198_v2, %s261_s16  ;;  %25 = vrot.lane.b32.xlu1 %v200_v3, %s262_s17  ;;  %4 = vst.msk [vmem:[#allocation0] sm:$0x1] %vm3_vm0, %v2_v10   ;;  %v207_v11 = vld [vmem:[%s399_s0 + $0x15] sm:$0x1]   ;;  %v208_v12 = vld [vmem:[%s399_s0 + $0x14] sm:$0x1]  }
   0x7   :  { %s269_s13 = smov 63   ;;  %s270_s14 = smov 60   ;;  %v209_v13 = vld [vmem:[%s399_s0 + $0x13] sm:$0x1]   ;;  %v210_v14 = vld [vmem:[%s399_s0 + $0x12] sm:$0x1]  }
   0x8   :  { %s271_s19 = smov 57   ;;  %s272_s20 = smov 54   ;;  %v211_v15 = vld [vmem:[%s399_s0 + $0x11] sm:$0x1]   ;;  %v212_v16 = vld [vmem:[%s399_s0 + $0x10] sm:$0x1]  }
   0x9   :  { %s273_s25 = smov 51   ;;  %s274_s26 = smov 48   ;;  %v213_v17 = vld [vmem:[%s399_s0 + $0xf] sm:$0x1]   ;;  %v214_v18 = vld [vmem:[%s399_s0 + $0xe] sm:$0x1]  }
   0xa   :  { %31 = vrot.lane.b32.xlu0 %v201_v4, %s263_s22  ;;  %37 = vrot.lane.b32.xlu1 %v202_v5, %s264_s23  ;;  %s275_s2 = smov 45   ;;  %s276_s3 = smov 42   ;;  %v215_v19 = vld [vmem:[%s399_s0 + $0xd] sm:$0x1]   ;;  %v216_v20 = vld [vmem:[%s399_s0 + $0xc] sm:$0x1]  }
   0xb   :  { %s278_s9 = smov 36   ;;  %v217_v21 = vld [vmem:[%s399_s0 + $0xb] sm:$0x1]   ;;  %v218_v22 = vld [vmem:[%s399_s0 + $0xa] sm:$0x1]   ;;  %s280_s15 = smov 30  }
   0xc   :  { %v219_v23 = vld [vmem:[%s399_s0 + $0x9] sm:$0x1]   ;;  %v220_v24 = vld [vmem:[%s399_s0 + $0x8] sm:$0x1]   ;;  %s282_s21 = smov 24   ;;  %s284_s27 = smov 18  }
   0xd   :  { %v221_v25 = vld [vmem:[%s399_s0 + $0x7] sm:$0x1]   ;;  %v222_v26 = vld [vmem:[%s399_s0 + $0x6] sm:$0x1]   ;;  %v223_v27 = vld [vmem:[%s399_s0 + $0x5] sm:$0x1]  }
   0xe   :  { %43 = vrot.lane.b32.xlu0 %v203_v6, %s265_s28  ;;  %49 = vrot.lane.b32.xlu1 %v204_v7, %s266_s29  ;;  %v224_v28 = vld [vmem:[%s399_s0 + $0x4] sm:$0x1]   ;;  %s286_s4 = smov 12   ;;  %v225_v29 = vld [vmem:[%s399_s0 + $0x3] sm:$0x1]   ;;  %s288_s10 = smov 6  }
   0xf   :  { %v226_v30 = vld [vmem:[%s399_s0 + $0x2] sm:$0x1]   ;;  %v227_v31 = vld [vmem:[%s399_s0 + $0x1] sm:$0x1]   ;;  %s289_s0 = smov 3   ;;  %vm27_vm4 = vcmask 712352  }
  0x10   :  { %vm33_vm5 = vcmask 687752   ;;  %vm39_vm6 = vcmask 663152   ;;  %vm45_vm7 = vcmask 638552   ;;  %vm51_vm8 = vcmask 613952  }
  0x11   :  { %vm57_vm9 = vcmask 589352   ;;  %vm63_vm10 = vcmask 564752   ;;  %vm69_vm11 = vcmask 540152   ;;  %vm75_vm12 = vcmask 515552  }
  0x12   :  { %55 = vrot.lane.b32.xlu0 %v205_v8, %s267_s7  ;;  %61 = vrot.lane.b32.xlu1 %v206_v9, %s268_s8  ;;  %s277_s8 = smov 39   ;;  %vm81_vm13 = vcmask 490952   ;;  %vm87_vm14 = vcmask 466352   ;;  %vm93_vm15 = vcmask 441752   ;;  %vm99_vm0 = vcmask 417152  }
  0x16   :  { %67 = vrot.lane.b32.xlu0 %v207_v11, %s269_s13  ;;  %73 = vrot.lane.b32.xlu1 %v208_v12, %s270_s14  ;;  %s279_s14 = smov 33  }
  0x1a   :  { %79 = vrot.lane.b32.xlu0 %v209_v13, %s271_s19  ;;  %85 = vrot.lane.b32.xlu1 %v210_v14, %s272_s20  ;;  %s281_s20 = smov 27  }
  0x1e   :  { %91 = vrot.lane.b32.xlu0 %v211_v15, %s273_s25  ;;  %97 = vrot.lane.b32.xlu1 %v212_v16, %s274_s26  ;;  %s283_s26 = smov 21  }
  0x22   :  { %103 = vrot.lane.b32.xlu0 %v213_v17, %s275_s2  ;;  %109 = vrot.lane.b32.xlu1 %v214_v18, %s276_s3  ;;  %s285_s3 = smov 15  }
  0x26   :  { %115 = vrot.lane.b32.xlu0 %v215_v19, %s277_s8  ;;  %121 = vrot.lane.b32.xlu1 %v216_v20, %s278_s9  ;;  %s287_s9 = smov 9  }
  0x2a   :  { %127 = vrot.lane.b32.xlu0 %v217_v21, %s279_s14  ;;  %133 = vrot.lane.b32.xlu1 %v218_v22, %s280_s15 }
  0x2e   :  { %139 = vrot.lane.b32.xlu0 %v219_v23, %s281_s20  ;;  %145 = vrot.lane.b32.xlu1 %v220_v24, %s282_s21 }
  0x32   :  { %151 = vrot.lane.b32.xlu0 %v221_v25, %s283_s26  ;;  %157 = vrot.lane.b32.xlu1 %v222_v26, %s284_s27 }
  0x36   :  { %163 = vrot.lane.b32.xlu0 %v223_v27, %s285_s3  ;;  %169 = vrot.lane.b32.xlu1 %v224_v28, %s286_s4 }
  0x3a   :  { %175 = vrot.lane.b32.xlu0 %v225_v29, %s287_s9  ;;  %181 = vrot.lane.b32.xlu1 %v226_v30, %s288_s10 }
  0x3e   :  { %187 = vrot.lane.b32.xlu0 %v227_v31, %s289_s0 }
  0x74   :  { %v8_v32 = vpop.permute.xlu0 %7   ;;  %v20_v33 = vpop.permute.xlu1 %19  }
  0x75   :  { %10 = vst.msk [vmem:[#allocation0] sm:$0x1] %vm9_vm1, %v8_v32   ;;  %vm105_vm1 = vcmask 392552  }
  0x78   :  { %v14_v34 = vpop.permute.xlu0 %13   ;;  %v26_v35 = vpop.permute.xlu1 %25  }
  0x79   :  { %16 = vst.msk [vmem:[#allocation0] sm:$0x1] %vm15_vm2, %v14_v34   ;;  %vm111_vm2 = vcmask 367952  }
  0x7a   :  { %22 = vst.msk [vmem:[#allocation0] sm:$0x1] %vm21_vm3, %v20_v33   ;;  %vm117_vm3 = vcmask 343352  }
  0x7b   :  { %28 = vst.msk [vmem:[#allocation0] sm:$0x1] %vm27_vm4, %v26_v35   ;;  %vm123_vm4 = vcmask 318752  }
  0x7c   :  { %v32_v36 = vpop.permute.xlu0 %31   ;;  %v38_v37 = vpop.permute.xlu1 %37  }
  0x7d   :  { %34 = vst.msk [vmem:[#allocation0] sm:$0x1] %vm33_vm5, %v32_v36   ;;  %vm129_vm5 = vcmask 294152  }
  0x7e   :  { %40 = vst.msk [vmem:[#allocation0] sm:$0x1] %vm39_vm6, %v38_v37   ;;  %vm135_vm6 = vcmask 269552  }
  0x80   :  { %v44_v38 = vpop.permute.xlu0 %43   ;;  %v50_v39 = vpop.permute.xlu1 %49  }
  0x81   :  { %46 = vst.msk [vmem:[#allocation0] sm:$0x1] %vm45_vm7, %v44_v38   ;;  %vm141_vm7 = vcmask 244952  }
  0x82   :  { %52 = vst.msk [vmem:[#allocation0] sm:$0x1] %vm51_vm8, %v50_v39   ;;  %vm147_vm8 = vcmask 220352  }
  0x84   :  { %v56_v40 = vpop.permute.xlu0 %55   ;;  %v62_v41 = vpop.permute.xlu1 %61  }
  0x85   :  { %58 = vst.msk [vmem:[#allocation0] sm:$0x1] %vm57_vm9, %v56_v40   ;;  %vm153_vm9 = vcmask 195752  }
  0x86   :  { %64 = vst.msk [vmem:[#allocation0] sm:$0x1] %vm63_vm10, %v62_v41   ;;  %vm159_vm10 = vcmask 171152  }
  0x88   :  { %v68_v42 = vpop.permute.xlu0 %67   ;;  %v74_v43 = vpop.permute.xlu1 %73  }
  0x89   :  { %70 = vst.msk [vmem:[#allocation0] sm:$0x1] %vm69_vm11, %v68_v42   ;;  %vm165_vm11 = vcmask 146552  }
  0x8a   :  { %76 = vst.msk [vmem:[#allocation0] sm:$0x1] %vm75_vm12, %v74_v43   ;;  %vm171_vm12 = vcmask 121952  }
  0x8c   :  { %v80_v44 = vpop.permute.xlu0 %79   ;;  %v86_v45 = vpop.permute.xlu1 %85  }
  0x8d   :  { %82 = vst.msk [vmem:[#allocation0] sm:$0x1] %vm81_vm13, %v80_v44   ;;  %vm177_vm13 = vcmask 97352  }
  0x8e   :  { %88 = vst.msk [vmem:[#allocation0] sm:$0x1] %vm87_vm14, %v86_v45   ;;  %vm183_vm14 = vcmask 72752  }
  0x90   :  { %v92_v46 = vpop.permute.xlu0 %91   ;;  %v98_v47 = vpop.permute.xlu1 %97  }
  0x91   :  { %94 = vst.msk [vmem:[#allocation0] sm:$0x1] %vm93_vm15, %v92_v46   ;;  %vm189_vm15 = vcmask 48152  }
  0x92   :  { %100 = vst.msk [vmem:[#allocation0] sm:$0x1] %vm99_vm0, %v98_v47  }
  0x94   :  { %v104_v48 = vpop.permute.xlu0 %103   ;;  %v110_v49 = vpop.permute.xlu1 %109  }
  0x95   :  { %106 = vst.msk [vmem:[#allocation0] sm:$0x1] %vm105_vm1, %v104_v48  }
  0x96   :  { %112 = vst.msk [vmem:[#allocation0] sm:$0x1] %vm111_vm2, %v110_v49  }
  0x98   :  { %v116_v50 = vpop.permute.xlu0 %115   ;;  %v122_v51 = vpop.permute.xlu1 %121  }
  0x99   :  { %118 = vst.msk [vmem:[#allocation0] sm:$0x1] %vm117_vm3, %v116_v50  }
  0x9a   :  { %124 = vst.msk [vmem:[#allocation0] sm:$0x1] %vm123_vm4, %v122_v51  }
  0x9c   :  { %v128_v52 = vpop.permute.xlu0 %127   ;;  %v134_v53 = vpop.permute.xlu1 %133  }
  0x9d   :  { %130 = vst.msk [vmem:[#allocation0] sm:$0x1] %vm129_vm5, %v128_v52  }
  0x9e   :  { %136 = vst.msk [vmem:[#allocation0] sm:$0x1] %vm135_vm6, %v134_v53  }
  0xa0   :  { %v140_v54 = vpop.permute.xlu0 %139   ;;  %v146_v55 = vpop.permute.xlu1 %145  }
  0xa1   :  { %142 = vst.msk [vmem:[#allocation0] sm:$0x1] %vm141_vm7, %v140_v54  }
  0xa2   :  { %148 = vst.msk [vmem:[#allocation0] sm:$0x1] %vm147_vm8, %v146_v55  }
  0xa4   :  { %v152_v56 = vpop.permute.xlu0 %151   ;;  %v158_v57 = vpop.permute.xlu1 %157  }
  0xa5   :  { %154 = vst.msk [vmem:[#allocation0] sm:$0x1] %vm153_vm9, %v152_v56  }
  0xa6   :  { %160 = vst.msk [vmem:[#allocation0] sm:$0x1] %vm159_vm10, %v158_v57  }
  0xa8   :  { %v164_v58 = vpop.permute.xlu0 %163   ;;  %v170_v59 = vpop.permute.xlu1 %169  }
  0xa9   :  { %166 = vst.msk [vmem:[#allocation0] sm:$0x1] %vm165_vm11, %v164_v58  }
  0xaa   :  { %172 = vst.msk [vmem:[#allocation0] sm:$0x1] %vm171_vm12, %v170_v59  }
  0xac   :  { %v176_v60 = vpop.permute.xlu0 %175   ;;  %v182_v61 = vpop.permute.xlu1 %181  }
  0xad   :  { %178 = vst.msk [vmem:[#allocation0] sm:$0x1] %vm177_vm13, %v176_v60  }
  0xae   :  { %184 = vst.msk [vmem:[#allocation0] sm:$0x1] %vm183_vm14, %v182_v61  }
  0xb0   :  { %v188_v62 = vpop.permute.xlu0 %187  }
  0xb1   :  { %190 = vst.msk [vmem:[#allocation0] sm:$0x1] %vm189_vm15, %v188_v62  }
  0xb8   :  { %v194_v63 = vld [vmem:[#allocation0] sm:$0x1] }
  0xb9   :  { %196 = vst [vmem:[%s400_s1] sm:$0x1] %v194_v63 }

// kernel: nusunit7s_forward.14
= control target key start
LH: loop header
LB: loop body
LE: loop exit
PB: predicated region body
PF: predicated region fallthrough
CT: control target
= control target key end

     0   :  { %s879_s12 = smov 0   ;;  %s995_s0 = inlined_call_operand.vmem [shape: bf16[2,34,102], index: 0, kind: input, shape index: {}]   ;;  %s996_s1 = inlined_call_operand.vmem [shape: bf16[3,102,96], index: 1, kind: input, shape index: {}]   ;;  %s997_s2 = inlined_call_operand.vmem [shape: f32[1,96], index: 2, kind: input, shape index: {}]   ;;  %s998_s3 = inlined_call_operand.vmem [shape: bf16[2,32,96], index: 3, kind: output, shape index: {}]  }
   0x1 LB: > { %s648_s13 = sadd.s32 4294967295, %s857_s12   ;;  %p652_p0 = scmp.ge.s32.totalorder %s857_s12, 1  ;;  %s857_s12 = sphi %s879_s12, %s13_s12  }
   0x2   : > { %p137_p1 = scmp.lt.s32.totalorder %s857_s12, 3 }
   0x4   : > { %p138_p2 = pnand %p652_p0, %p137_p1 }
   0x5   : > { %v826_v0 = vld [vmem:[%s996_s1] sm:$0xff] (!%p138_p2)   ;;  %v827_v1 = vld [vmem:[%s996_s1 + $0x8] sm:$0xff] (!%p138_p2)   ;;  %p161_p3 = scmp.lt.s32.totalorder (!%p138_p2), %s648_s13, 1  ;;  %v828_v2 = vld [vmem:[%s996_s1 + $0x10] sm:$0xff] (!%p138_p2)   ;;  %vm277_vm0 = vcmask (!%p138_p2), 834560   ;;  %vm284_vm1 = vcmask (!%p138_p2), 1042432  }
   0x6   : > { %141 = sbr.rel (%p138_p2) target bundleno = 286 (0x11e), region = 32  ;;  %770 = vmatprep.subr.bf16.mxu0 (!%p138_p2), %v826_v0  ;;  %v833_v3 = vld [vmem:[%s996_s1 + $0x34] sm:$0xff] (!%p138_p2)   ;;  %v837_v8 = vld [vmem:[%s996_s1 + $0x3c] sm:$0xff] (!%p138_p2)   ;;  %v840_v11 = vld [vmem:[%s996_s1 + $0x44] sm:$0xff] (!%p138_p2)   ;;  %vm217_vm2 = vsmask.f32 (!%p138_p2), 7424 }
   0x7   : > { %771 = vmatpush3.bf16.msra.mxu0 (!%p138_p2), %v826_v0  ;;  %v829_v4 = vld [vmem:[%s996_s1 + $0x18] sm:$0xff] (!%p138_p2)   ;;  %752 = vmatprep.subr.bf16.mxu1 (!%p138_p2), %v833_v3  ;;  %v830_v9 = vld [vmem:[%s996_s1 + $0x20] sm:$0xff] (!%p138_p2)   ;;  %v842_v15 = vld [vmem:[%s996_s1 + $0x4c] sm:$0xff] (!%p138_p2)   ;;  %vm450_vm3 = vcmask (!%p138_p2), 1046528   ;;  %vm588_vm4 = vcmask (!%p138_p2), 781312  }
   0x8   : > { %772 = vmatprep.subr.bf16.mxu0 (!%p138_p2), %v827_v1  ;;  %753 = vmatpush3.bf16.msra.mxu1 (!%p138_p2), %v833_v3  ;;  %v831_v17 = vld [vmem:[%s996_s1 + $0x28] sm:$0xff] (!%p138_p2)   ;;  %v832_v19 = vld [vmem:[%s996_s1 + $0x30] ss:$0 sps:$4 sm:$0x77] (!%p138_p2)   ;;  %v844_v20 = vld [vmem:[%s996_s1 + $0x54] sm:$0xff] (!%p138_p2)  }
   0x9   : > { %754 = vmatprep.subr.bf16.mxu1 (!%p138_p2), %v837_v8  ;;  %v846_v24 = vld [vmem:[%s996_s1 + $0x5c] sm:$0xff] (!%p138_p2)   ;;  %v381_v27 = vsel (!%p138_p2), %vm284_vm1, %v832_v19, 0  ;;  %v836_v29 = vld [vmem:[%s996_s1 + $0x68] sm:$0xff] (!%p138_p2)   ;;  %v848_v33 = vld [vmem:[%s996_s1 + $0x64] ss:$0 sps:$4 sm:$0x77] (!%p138_p2)  }
   0xa   : > { %v839_v34 = vld [vmem:[%s996_s1 + $0x70] sm:$0xff] (!%p138_p2)   ;;  %v286_v38 = vsel (!%p138_p2), %vm284_vm1, %v848_v33, 0  ;;  %v841_v39 = vld [vmem:[%s996_s1 + $0x78] sm:$0xff] (!%p138_p2)   ;;  %v843_v41 = vld [vmem:[%s996_s1 + $0x80] sm:$0xff] (!%p138_p2)  }
   0xb   : > { %773 = vmatpush3.bf16.msra.mxu0 (!%p138_p2), %v827_v1  ;;  %v845_v42 = vld [vmem:[%s996_s1 + $0x88] sm:$0xff] (!%p138_p2)   ;;  %v847_v43 = vld [vmem:[%s996_s1 + $0x90] sm:$0xff] (!%p138_p2)   ;;  %v849_v44 = vld [vmem:[%s996_s1 + $0x98] ss:$0 sps:$4 sm:$0x77] (!%p138_p2)  }
   0xc   : > { %774 = vmatprep.subr.bf16.mxu0 (!%p138_p2), %v828_v2  ;;  %755 = vmatpush3.bf16.msra.mxu1 (!%p138_p2), %v837_v8  ;;  %v502_v46 = vsel (!%p138_p2), %vm284_vm1, %v849_v44, 0  ;;  %v713_v53 = vld [vmem:[%s997_s2] ss:$0 sm:$0xff] (!%p138_p2) }
   0xd   : > { %s1000_s13 = smov (!%p161_p3, %s648_s13), 1  ;;  %756 = vmatprep.subr.bf16.mxu1 %v840_v11 }
   0xe   : > { %s817_s20 = smul.u32 20, %s1000_s13  ;;  %s720_s10 = sshll.u32 %s1000_s13, 4 }
   0xf   : > { %775 = vmatpush3.bf16.msra.mxu0 %v828_v2  ;;  %s170_s15 = scalar_lea.vmem %s998_s3, %s720_s10 }
  0x10   : > { %s905_s25 = scalar_lea.vmem %s995_s0, %s817_s20  ;;  %776 = vmatprep.subr.bf16.mxu0 %v829_v4  ;;  %757 = vmatpush3.bf16.msra.mxu1 %v840_v11 }
  0x11   : > { %v172_v5 = vld [vmem:[%s905_s25] sm:$0xf]  ;;  %v173_v6 = vld [vmem:[%s905_s25 + $0x4] sm:$0xf]  ;;  %v920_v10 = vld [vmem:[%s905_s25 + $0x8] sm:$0xff]   ;;  %758 = vmatprep.subr.bf16.mxu1 %v842_v15 }
  0x12   : > { %v669_v7 = vcombine.low %v172_v5, %v173_v6  ;;  %v226_v14 = vshll.u32 %v920_v10, 16  ;;  %v432_v18 = vld [vmem:[%s905_s25] sm:$0xe]  ;;  %v850_v26 = vld [vmem:[%s905_s25 + $0x10] ss:$0 sps:$4 sm:$0x11]  }
  0x13   : > { %777 = vmatpush3.bf16.msra.mxu0 %v829_v4  ;;  %v703_v23 = vcombine.low %v432_v18, %v173_v6  ;;  %v452_v30 = vrot.slane %v920_v10, 1  ;;  %v230_v31 = vshrl.u32 %v920_v10, 16  ;;  %v234_v32 = vshll.u32 %v850_v26, 16 }
  0x14   : > { %784 = vmatprep.mubr.msk.bf16.mxu0 %vm277_vm0, %v669_v7  ;;  %v221_v12 = vshll.u32 %v669_v7, 16  ;;  %v219_v13 = vshrl.u32 %v669_v7, 16  ;;  %778 = vmatprep.subr.bf16.mxu0 %v830_v9  ;;  %v228_v22 = vrot.slane %v226_v14, 1  ;;  %v454_v45 = vrot.slane %v850_v26, 1 }
  0x15   : > { %759 = vmatpush3.bf16.msra.mxu1 %v842_v15  ;;  %v451_v28 = vrot.slane %v703_v23, 1  ;;  %v236_v37 = vrot.slane %v234_v32, 1 }
  0x16   : > { %v223_v16 = vrot.slane %v221_v12, 1  ;;  %760 = vmatprep.subr.bf16.mxu1 %v844_v20  ;;  %v232_v36 = vor.u32 %v230_v31, %v228_v22  ;;  %v455_v47 = vsel %vm450_vm3, %v452_v30, %v454_v45 }
  0x17   : > { %779 = vmatpush3.bf16.msra.mxu0 %v830_v9  ;;  %v453_v35 = vsel %vm450_vm3, %v451_v28, %v452_v30 }
  0x18   : > { %v224_v21 = vor.u32 %v223_v16, %v219_v13  ;;  %780 = vmatprep.subr.bf16.mxu0 %v831_v17  ;;  %v237_v40 = vsel %vm217_vm2, %v232_v36, %v236_v37 }
  0x19   : > { %761 = vmatpush3.bf16.msra.mxu1 %v844_v20 }
  0x1a   : > { %v229_v25 = vsel %vm217_vm2, %v224_v21, %v228_v22  ;;  %762 = vmatprep.subr.bf16.mxu1 %v846_v24 }
  0x1b   : > { %781 = vmatpush3.bf16.msra.mxu0 %v831_v17  ;;  %766 = vmatprep.mubr.msk.bf16.mxu1 %vm277_vm0, %v229_v25 }
  0x1c   : > { %815 = vmatprep.subr.msk.bf16.mxu0 %vm284_vm1, %v832_v19 }
  0x1d   : > { %763 = vmatpush3.bf16.msra.mxu1 %v846_v24 }
  0x1e   : > { %814 = vmatprep.subr.msk.bf16.mxu1 %vm284_vm1, %v848_v33 }
  0x1f   : > { %783 = vmatpush3.bf16.msra.mxu0 %v381_v27 }
  0x20   : > { %788 = vmatprep.subr.bf16.mxu0 %v836_v29 }
  0x21   : > { %765 = vmatpush3.bf16.msra.mxu1 %v286_v38 }
  0x22   : > { %785 = vmatmul.mubr.msk.bf16.vlgmr.msra.gmra.mrb[0].mxu0 %vm277_vm0, %v920_v10 }
  0x23   : > { %789 = vmatpush3.bf16.msra.mxu0 %v836_v29  ;;  %802 = vmatprep.mubr.msk.bf16.mxu0 %vm277_vm0, %v453_v35 }
  0x24   : > { %790 = vmatprep.subr.bf16.mxu0 %v839_v34  ;;  %767 = vmatmul.mubr.msk.bf16.vlgmr.msra.gmra.mrb[0].mxu1 %vm277_vm0, %v237_v40 }
  0x27   : > { %791 = vmatpush3.bf16.msra.mxu0 %v839_v34 }
  0x28   : > { %792 = vmatprep.subr.bf16.mxu0 %v841_v39 }
  0x2b   : > { %793 = vmatpush3.bf16.msra.mxu0 %v841_v39 }
  0x2c   : > { %794 = vmatprep.subr.bf16.mxu0 %v843_v41 }
  0x2f   : > { %795 = vmatpush3.bf16.msra.mxu0 %v843_v41 }
  0x30   : > { %796 = vmatprep.subr.bf16.mxu0 %v845_v42 }
  0x33   : > { %797 = vmatpush3.bf16.msra.mxu0 %v845_v42 }
  0x34   : > { %798 = vmatprep.subr.bf16.mxu0 %v847_v43 }
  0x37   : > { %799 = vmatpush3.bf16.msra.mxu0 %v847_v43 }
  0x38   : > { %816 = vmatprep.subr.msk.bf16.mxu0 %vm284_vm1, %v849_v44 }
  0x3b   : > { %801 = vmatpush3.bf16.msra.mxu0 %v502_v46 }
  0x3e   : > { %803 = vmatmul.mubr.msk.bf16.vlgmr.msra.gmra.mrb[0].mxu0 %vm277_vm0, %v455_v47 }
  0xf7   : > { %v768_v48 = vpop.f32.mrb[0].mxu1 }
  0xf8   : > { %v322_v49 = vpop.f32.mrb[1].mxu1 }
  0xf9   : > { %v769_v50 = vpop.f32.mrb[2].mxu1 }
  0xfa   : > { %v325_v51 = vpop.f32.mrb[3].mxu1 }
 0x111   : > { %v804_v52 = vpop.f32.mrb[0].mxu0 }
 0x112   : > { %v806_v54 = vadd.f32 %v804_v52, %v768_v48  ;;  %v538_v55 = vpop.f32.mrb[1].mxu0 }
 0x113   : > { %v807_v56 = vadd.f32 %v538_v55, %v322_v49  ;;  %v805_v57 = vpop.f32.mrb[2].mxu0 }
 0x114   : > { %v566_v58 = vadd.f32 %v806_v54, %v713_v53  ;;  %v808_v59 = vadd.f32 %v805_v57, %v769_v50  ;;  %v541_v60 = vpop.f32.mrb[3].mxu0 }
 0x115   : > { %v564_v61 = vadd.f32 %v807_v56, %v713_v53  ;;  %v809_v62 = vadd.f32 %v541_v60, %v325_v51 }
 0x116   : > { %v570_v63 = vmax.f32 %v566_v58, 0.0  ;;  %v567_v0 = vadd.f32 %v808_v59, %v713_v53 }
 0x117   : > { %v568_v1 = vmax.f32 %v564_v61, 0.0  ;;  %v565_v2 = vadd.f32 %v809_v62, %v713_v53 }
 0x118   : > { %v723_v3 = vpack.c.bf16 %v570_v63, %v570_v63  ;;  %v571_v4 = vmax.f32 %v567_v0, 0.0 }
 0x119   : > { %v721_v5 = vpack.c.bf16 %v568_v1, %v568_v1  ;;  %v569_v6 = vmax.f32 %v565_v2, 0.0 }
 0x11a   : > { %591 = vst.msk [vmem:[%s170_s15 + $0x8] sm:$0xf] %vm588_vm4, %v723_v3  ;;  %v724_v7 = vpack.c.bf16 %v571_v4, %v571_v4 }
 0x11b   : > { %589 = vst.msk [vmem:[%s170_s15] sm:$0xf] %vm588_vm4, %v721_v5  ;;  %v722_v8 = vpack.c.bf16 %v569_v6, %v569_v6 }
 0x11c   : > { %592 = vst.msk [vmem:[%s170_s15 + $0xc] sm:$0xf] %vm588_vm4, %v724_v7 }
 0x11d   : > { %590 = vst.msk [vmem:[%s170_s15 + $0x4] sm:$0xf] %vm588_vm4, %v722_v8 }
 0x11e PF: > { %s13_s12 = sadd.s32 1, %s857_s12  }
 0x11f   : > { %p10_p4 = scmp.ge.s32.totalorder %s13_s12, 4  }
 0x121   :  { %12 = sbr.rel (!%p10_p4) target bundleno = 1 (0x1), region = 64 }

// kernel: tile.61
= control target key start
LH: loop header
LB: loop body
LE: loop exit
PB: predicated region body
PF: predicated region fallthrough
CT: control target
= control target key end

     0   :  { %s40_s0 = inlined_call_operand.vmem [shape: f32[12], index: 0, kind: input, shape index: {}]   ;;  %s41_s1 = inlined_call_operand.vmem [shape: f32[32,12], index: 1, kind: output, shape index: {}]  }
   0x1   :  { %v4_v0 = vld [vmem:[%s40_s0] ss:$0 sm:$0xff] }
   0x2   :  { %5 = vst [vmem:[%s41_s1] sm:$0xff] %v4_v0  ;;  %12 = vst [vmem:[%s41_s1 + $0x8] sm:$0xff] %v4_v0 }
   0x3   :  { %13 = vst [vmem:[%s41_s1 + $0x10] sm:$0xff] %v4_v0  ;;  %14 = vst [vmem:[%s41_s1 + $0x18] sm:$0xff] %v4_v0 }

// kernel: tile.62
= control target key start
LH: loop header
LB: loop body
LE: loop exit
PB: predicated region body
PF: predicated region fallthrough
CT: control target
= control target key end

     0   :  { %vm9_vm0 = vcmask 31744   ;;  %vm13_vm1 = vcmask 64512   ;;  %s310_s14 = smov 124   ;;  %s311_s15 = smov 116   ;;  %vm3_vm2 = vcmask 97280   ;;  %vm16_vm3 = vcmask 1048544   ;;  %s466_s0 = inlined_call_operand.vmem [shape: f32[32,12], index: 0, kind: input, shape index: {}]   ;;  %s467_s1 = inlined_call_operand.vmem [shape: f32[1,384], index: 1, kind: output, shape index: {}]  }
   0x1   :  { %v244_v0 = vld [vmem:[%s466_s0 + $0x15] sm:$0x1]   ;;  %v248_v3 = vld [vmem:[%s466_s0 + $0x1f] sm:$0x1]   ;;  %v246_v4 = vld [vmem:[%s466_s0 + $0xa] sm:$0x1]  }
   0x2   :  { %v245_v1 = vld [vmem:[%s466_s0 + $0x15] sm:$0x1]   ;;  %34 = vrot.lane.b32.xlu1 %v248_v3, %s311_s15  ;;  %v247_v5 = vld [vmem:[%s466_s0 + $0xa] sm:$0x1]   ;;  %v249_v7 = vld [vmem:[%s466_s0 + $0x14] sm:$0x1]  }
   0x3   :  { %v10_v2 = vsel %vm9_vm0, %v245_v1, %v244_v0  ;;  %v24_v6 = vsel %vm13_vm1, %v247_v5, %v246_v4  ;;  %s312_s20 = smov 120   ;;  %s313_s21 = smov 112   ;;  %v250_v8 = vld [vmem:[%s466_s0 + $0x9] sm:$0x1]   ;;  %v251_v9 = vld [vmem:[%s466_s0 + $0x1e] sm:$0x1]  }
   0x4   :  { %11 = vrot.lane.b32.xlu0 %v10_v2, %s310_s14  ;;  %s314_s26 = smov 108   ;;  %s315_s27 = smov 104   ;;  %v252_v10 = vld [vmem:[%s466_s0 + $0x13] sm:$0x1]   ;;  %v253_v11 = vld [vmem:[%s466_s0 + $0x8] sm:$0x1]  }
   0x5   :  { %s316_s3 = smov 100   ;;  %s317_s4 = smov 96   ;;  %v254_v12 = vld [vmem:[%s466_s0 + $0x1d] sm:$0x1]   ;;  %v255_v13 = vld [vmem:[%s466_s0 + $0x12] sm:$0x1]  }
   0x6   :  { %41 = vrot.lane.b32.xlu1 %v249_v7, %s313_s21  ;;  %v2_v14 = vld [vmem:[%s466_s0] sm:$0x1]   ;;  %s318_s11 = smov 92   ;;  %s319_s12 = smov 88   ;;  %v256_v15 = vld [vmem:[%s466_s0 + $0x7] sm:$0x1]  }
   0x7   :  { %4 = vst.msk [vmem:[#allocation0] sm:$0x1] %vm3_vm2, %v2_v14   ;;  %v257_v16 = vld [vmem:[%s466_s0 + $0x1c] sm:$0x1]   ;;  %s320_s17 = smov 84   ;;  %s321_s18 = smov 80  }
   0x8   :  { %25 = vrot.lane.b32.xlu0 %v24_v6, %s312_s20  ;;  %v258_v17 = vld [vmem:[%s466_s0 + $0x11] sm:$0x1]   ;;  %v259_v18 = vld [vmem:[%s466_s0 + $0x6] sm:$0x1]   ;;  %s322_s23 = smov 76   ;;  %s323_s24 = smov 72  }
   0x9   :  { %v260_v19 = vld [vmem:[%s466_s0 + $0x1b] sm:$0x1]   ;;  %v261_v20 = vld [vmem:[%s466_s0 + $0x10] sm:$0x1]   ;;  %s324_s29 = smov 68   ;;  %s325_s30 = smov 64  }
   0xa   :  { %54 = vrot.lane.b32.xlu1 %v251_v9, %s315_s27  ;;  %v262_v21 = vld [vmem:[%s466_s0 + $0x5] sm:$0x1]   ;;  %v263_v22 = vld [vmem:[%s466_s0 + $0x1a] sm:$0x1]   ;;  %s326_s6 = smov 60   ;;  %s327_s7 = smov 56  }
   0xb   :  { %v264_v23 = vld [vmem:[%s466_s0 + $0xf] sm:$0x1]   ;;  %v265_v24 = vld [vmem:[%s466_s0 + $0x4] sm:$0x1]   ;;  %s329_s13 = smov 48   ;;  %s331_s19 = smov 40  }
   0xc   :  { %48 = vrot.lane.b32.xlu0 %v250_v8, %s314_s26  ;;  %v266_v25 = vld [vmem:[%s466_s0 + $0x19] sm:$0x1]   ;;  %v267_v26 = vld [vmem:[%s466_s0 + $0xe] sm:$0x1]   ;;  %v268_v27 = vld [vmem:[%s466_s0 + $0x3] sm:$0x1]  }
   0xd   :  { %v269_v28 = vld [vmem:[%s466_s0 + $0x18] sm:$0x1]   ;;  %s333_s25 = smov 32   ;;  %v270_v29 = vld [vmem:[%s466_s0 + $0xd] sm:$0x1]   ;;  %s335_s2 = smov 24  }
   0xe   :  { %68 = vrot.lane.b32.xlu1 %v253_v11, %s317_s4  ;;  %v271_v30 = vld [vmem:[%s466_s0 + $0x2] sm:$0x1]   ;;  %v272_v31 = vld [vmem:[%s466_s0 + $0x17] sm:$0x1]   ;;  %v273_v32 = vld [vmem:[%s466_s0 + $0xc] sm:$0x1]  }
   0xf   :  { %s337_s8 = smov 16   ;;  %v274_v33 = vld [vmem:[%s466_s0 + $0x1] sm:$0x1]   ;;  %v275_v34 = vld [vmem:[%s466_s0 + $0x16] sm:$0x1]   ;;  %s339_s14 = smov 8  }
  0x10   :  { %61 = vrot.lane.b32.xlu0 %v252_v10, %s316_s3  ;;  %v276_v35 = vld [vmem:[%s466_s0 + $0xb] sm:$0x1]   ;;  %s340_s0 = smov 4   ;;  %vm36_vm4 = vcmask 1048480   ;;  %vm30_vm5 = vcmask 1048512   ;;  %vm43_vm6 = vcmask 1015680  }
  0x11   :  { %vm50_vm7 = vcmask 982880   ;;  %vm56_vm8 = vcmask 950080   ;;  %vm63_vm9 = vcmask 917280   ;;  %vm70_vm10 = vcmask 884480  }
  0x12   :  { %81 = vrot.lane.b32.xlu1 %v255_v13, %s319_s12  ;;  %s328_s12 = smov 52   ;;  %vm76_vm11 = vcmask 851680   ;;  %vm83_vm12 = vcmask 818880   ;;  %vm90_vm13 = vcmask 786080   ;;  %vm96_vm14 = vcmask 753280  }
  0x13   :  { %vm103_vm15 = vcmask 720480   ;;  %vm123_vm2 = vcmask 622080  }
  0x14   :  { %74 = vrot.lane.b32.xlu0 %v254_v12, %s318_s11 }
  0x16   :  { %94 = vrot.lane.b32.xlu1 %v257_v16, %s321_s18  ;;  %s330_s18 = smov 44  }
  0x18   :  { %88 = vrot.lane.b32.xlu0 %v256_v15, %s320_s17 }
  0x1a   :  { %108 = vrot.lane.b32.xlu1 %v259_v18, %s323_s24  ;;  %s332_s24 = smov 36  }
  0x1c   :  { %101 = vrot.lane.b32.xlu0 %v258_v17, %s322_s23 }
  0x1e   :  { %121 = vrot.lane.b32.xlu1 %v261_v20, %s325_s30  ;;  %s334_s30 = smov 28  }
  0x20   :  { %114 = vrot.lane.b32.xlu0 %v260_v19, %s324_s29 }
  0x22   :  { %134 = vrot.lane.b32.xlu1 %v263_v22, %s327_s7  ;;  %s336_s7 = smov 20  }
  0x24   :  { %128 = vrot.lane.b32.xlu0 %v262_v21, %s326_s6 }
  0x26   :  { %148 = vrot.lane.b32.xlu1 %v265_v24, %s329_s13  ;;  %s338_s13 = smov 12  }
  0x28   :  { %141 = vrot.lane.b32.xlu0 %v264_v23, %s328_s12 }
  0x2a   :  { %161 = vrot.lane.b32.xlu1 %v267_v26, %s331_s19 }
  0x2c   :  { %154 = vrot.lane.b32.xlu0 %v266_v25, %s330_s18 }
  0x2e   :  { %174 = vrot.lane.b32.xlu1 %v269_v28, %s333_s25 }
  0x30   :  { %168 = vrot.lane.b32.xlu0 %v268_v27, %s332_s24 }
  0x32   :  { %188 = vrot.lane.b32.xlu1 %v271_v30, %s335_s2 }
  0x34   :  { %181 = vrot.lane.b32.xlu0 %v270_v29, %s334_s30 }
  0x36   :  { %201 = vrot.lane.b32.xlu1 %v273_v32, %s337_s8 }
  0x38   :  { %194 = vrot.lane.b32.xlu0 %v272_v31, %s336_s7 }
  0x3a   :  { %214 = vrot.lane.b32.xlu1 %v275_v34, %s339_s14 }
  0x3c   :  { %208 = vrot.lane.b32.xlu0 %v274_v33, %s338_s13 }
  0x40   :  { %221 = vrot.lane.b32.xlu0 %v276_v35, %s340_s0 }
  0x74   :  { %v35_v37 = vpop.permute.xlu1 %34  }
  0x76   :  { %v12_v36 = vpop.permute.xlu0 %11  }
  0x77   :  { %15 = vst.msk [vmem:[#allocation0 + $0x10] sm:$0x1] %vm13_vm1, %v12_v36   ;;  %vm116_vm1 = vcmask 654880  }
  0x78   :  { %18 = vst.msk [vmem:[#allocation0 + $0x8] sm:$0x1] %vm16_vm3, %v12_v36   ;;  %v42_v39 = vpop.permute.xlu1 %41   ;;  %vm130_vm3 = vcmask 589280  }
  0x79   :  { %38 = vst.msk [vmem:[#allocation0 + $0x10] sm:$0x1] %vm36_vm4, %v35_v37   ;;  %vm136_vm4 = vcmask 556480  }
  0x7a   :  { %v26_v38 = vpop.permute.xlu0 %25  }
  0x7b   :  { %29 = vst.msk [vmem:[#allocation0 + $0x8] sm:$0x1] %vm9_vm0, %v26_v38   ;;  %vm110_vm0 = vcmask 687680  }
  0x7c   :  { %31 = vst.msk [vmem:[#allocation0] sm:$0x1] %vm30_vm5, %v26_v38   ;;  %v55_v41 = vpop.permute.xlu1 %54   ;;  %vm143_vm5 = vcmask 523680  }
  0x7d   :  { %45 = vst.msk [vmem:[#allocation0 + $0x8] sm:$0x1] %vm43_vm6, %v42_v39   ;;  %vm150_vm6 = vcmask 490880  }
  0x7e   :  { %v49_v40 = vpop.permute.xlu0 %48   ;;  %58 = vst.msk [vmem:[#allocation0 + $0x10] sm:$0x1] %vm56_vm8, %v55_v41   ;;  %vm163_vm8 = vcmask 425280  }
  0x7f   :  { %51 = vst.msk [vmem:[#allocation0] sm:$0x1] %vm50_vm7, %v49_v40   ;;  %vm156_vm7 = vcmask 458080  }
  0x80   :  { %v69_v43 = vpop.permute.xlu1 %68  }
  0x81   :  { %71 = vst.msk [vmem:[#allocation0] sm:$0x1] %vm70_vm10, %v69_v43   ;;  %vm176_vm10 = vcmask 359680  }
  0x82   :  { %v62_v42 = vpop.permute.xlu0 %61  }
  0x83   :  { %65 = vst.msk [vmem:[#allocation0 + $0x8] sm:$0x1] %vm63_vm9, %v62_v42   ;;  %vm170_vm9 = vcmask 392480  }
  0x84   :  { %v82_v45 = vpop.permute.xlu1 %81  }
  0x85   :  { %85 = vst.msk [vmem:[#allocation0 + $0x8] sm:$0x1] %vm83_vm12, %v82_v45   ;;  %vm190_vm12 = vcmask 294080  }
  0x86   :  { %v75_v44 = vpop.permute.xlu0 %74  }
  0x87   :  { %78 = vst.msk [vmem:[#allocation0 + $0x10] sm:$0x1] %vm76_vm11, %v75_v44   ;;  %vm183_vm11 = vcmask 326880  }
  0x88   :  { %v95_v47 = vpop.permute.xlu1 %94  }
  0x89   :  { %98 = vst.msk [vmem:[#allocation0 + $0x10] sm:$0x1] %vm96_vm14, %v95_v47   ;;  %vm203_vm14 = vcmask 228480  }
  0x8a   :  { %v89_v46 = vpop.permute.xlu0 %88  }
  0x8b   :  { %91 = vst.msk [vmem:[#allocation0] sm:$0x1] %vm90_vm13, %v89_v46   ;;  %vm196_vm13 = vcmask 261280  }
  0x8c   :  { %v109_v49 = vpop.permute.xlu1 %108  }
  0x8d   :  { %111 = vst.msk [vmem:[#allocation0] sm:$0x1] %vm110_vm0, %v109_v49   ;;  %vm216_vm0 = vcmask 162880  }
  0x8e   :  { %v102_v48 = vpop.permute.xlu0 %101  }
  0x8f   :  { %105 = vst.msk [vmem:[#allocation0 + $0x8] sm:$0x1] %vm103_vm15, %v102_v48   ;;  %vm210_vm15 = vcmask 195680  }
  0x90   :  { %v122_v51 = vpop.permute.xlu1 %121  }
  0x91   :  { %125 = vst.msk [vmem:[#allocation0 + $0x8] sm:$0x1] %vm123_vm2, %v122_v51  }
  0x92   :  { %v115_v50 = vpop.permute.xlu0 %114  }
  0x93   :  { %118 = vst.msk [vmem:[#allocation0 + $0x10] sm:$0x1] %vm116_vm1, %v115_v50   ;;  %vm223_vm1 = vcmask 130080  }
  0x94   :  { %v135_v53 = vpop.permute.xlu1 %134  }
  0x95   :  { %138 = vst.msk [vmem:[#allocation0 + $0x10] sm:$0x1] %vm136_vm4, %v135_v53  }
  0x96   :  { %v129_v52 = vpop.permute.xlu0 %128  }
  0x97   :  { %131 = vst.msk [vmem:[#allocation0] sm:$0x1] %vm130_vm3, %v129_v52  }
  0x98   :  { %v149_v55 = vpop.permute.xlu1 %148  }
  0x99   :  { %151 = vst.msk [vmem:[#allocation0] sm:$0x1] %vm150_vm6, %v149_v55  }
  0x9a   :  { %v142_v54 = vpop.permute.xlu0 %141  }
  0x9b   :  { %145 = vst.msk [vmem:[#allocation0 + $0x8] sm:$0x1] %vm143_vm5, %v142_v54  }
  0x9c   :  { %v162_v57 = vpop.permute.xlu1 %161  }
  0x9d   :  { %165 = vst.msk [vmem:[#allocation0 + $0x8] sm:$0x1] %vm163_vm8, %v162_v57  }
  0x9e   :  { %v155_v56 = vpop.permute.xlu0 %154  }
  0x9f   :  { %158 = vst.msk [vmem:[#allocation0 + $0x10] sm:$0x1] %vm156_vm7, %v155_v56  }
  0xa0   :  { %v175_v59 = vpop.permute.xlu1 %174  }
  0xa1   :  { %178 = vst.msk [vmem:[#allocation0 + $0x10] sm:$0x1] %vm176_vm10, %v175_v59  }
  0xa2   :  { %v169_v58 = vpop.permute.xlu0 %168  }
  0xa3   :  { %171 = vst.msk [vmem:[#allocation0] sm:$0x1] %vm170_vm9, %v169_v58  }
  0xa4   :  { %v189_v61 = vpop.permute.xlu1 %188  }
  0xa5   :  { %191 = vst.msk [vmem:[#allocation0] sm:$0x1] %vm190_vm12, %v189_v61  }
  0xa6   :  { %v182_v60 = vpop.permute.xlu0 %181  }
  0xa7   :  { %185 = vst.msk [vmem:[#allocation0 + $0x8] sm:$0x1] %vm183_vm11, %v182_v60  }
  0xa8   :  { %v202_v63 = vpop.permute.xlu1 %201  }
  0xa9   :  { %205 = vst.msk [vmem:[#allocation0 + $0x8] sm:$0x1] %vm203_vm14, %v202_v63  }
  0xaa   :  { %v195_v62 = vpop.permute.xlu0 %194  }
  0xab   :  { %198 = vst.msk [vmem:[#allocation0 + $0x10] sm:$0x1] %vm196_vm13, %v195_v62  }
  0xac   :  { %v215_v1 = vpop.permute.xlu1 %214  }
  0xad   :  { %218 = vst.msk [vmem:[#allocation0 + $0x10] sm:$0x1] %vm216_vm0, %v215_v1  }
  0xae   :  { %v209_v0 = vpop.permute.xlu0 %208  }
  0xaf   :  { %211 = vst.msk [vmem:[#allocation0] sm:$0x1] %vm210_vm15, %v209_v0  }
  0xb2   :  { %v222_v2 = vpop.permute.xlu0 %221  }
  0xb3   :  { %225 = vst.msk [vmem:[#allocation0 + $0x8] sm:$0x1] %vm223_vm1, %v222_v2  }
  0xb4   :  { %v238_v4 = vld [vmem:[#allocation0 + $0x10] sm:$0x1] }
  0xb5   :  { %278 = vst [vmem:[%s467_s1 + $0x2] sm:$0x1] %v238_v4 }
  0xb6   :  { %v229_v3 = vld [vmem:[#allocation0] sm:$0x1] }
  0xb7   :  { %231 = vst [vmem:[%s467_s1] sm:$0x1] %v229_v3 }
  0xba   :  { %v233_v5 = vld [vmem:[#allocation0 + $0x8] sm:$0x1] }
  0xbb   :  { %277 = vst [vmem:[%s467_s1 + $0x1] sm:$0x1] %v233_v5 }

// kernel: nusunit7s_forward.15
= control target key start
LH: loop header
LB: loop body
LE: loop exit
PB: predicated region body
PF: predicated region fallthrough
CT: control target
= control target key end

     0   :  { %s1512_s12 = smov 0   ;;  %s1792_s0 = inlined_call_operand.vmem [shape: bf16[2,34,102], index: 0, kind: input, shape index: {}]   ;;  %s1793_s1 = inlined_call_operand.vmem [shape: bf16[3,102,384], index: 1, kind: input, shape index: {}]   ;;  %s1794_s2 = inlined_call_operand.vmem [shape: f32[1,384], index: 2, kind: input, shape index: {}]   ;;  %s1795_s3 = inlined_call_operand.vmem [shape: bf16[2,32,384], index: 3, kind: output, shape index: {}]  }
   0x1 LB: > { %s1120_s13 = sadd.s32 4294967295, %s1489_s12   ;;  %p1124_p0 = scmp.ge.s32.totalorder %s1489_s12, 1  ;;  %s1489_s12 = sphi %s1512_s12, %s13_s12  }
   0x2   : > { %p137_p1 = scmp.lt.s32.totalorder %s1489_s12, 3 }
   0x4   : > { %p138_p2 = pnand %p1124_p0, %p137_p1 }
   0x5   : > { %v1398_v0 = vld [vmem:[%s1793_s1 + $0xa0] ss:$12 sps:$4 sm:$0xff] (!%p138_p2)   ;;  %v1400_v1 = vld [vmem:[%s1793_s1 + $0xa4] ss:$12 sps:$4 sm:$0xff] (!%p138_p2)   ;;  %v1491_v2 = vmov (!%p138_p2), 0   ;;  %p161_p3 = scmp.lt.s32.totalorder (!%p138_p2), %s1120_s13, 1 }
   0x6   : > { %141 = sbr.rel (%p138_p2) target bundleno = 320 (0x140), region = 32  ;;  %417 = vmatprep.mubr.bf16.mxu0 (!%p138_p2), %v1491_v2  ;;  %385 = vmatprep.subr.bf16.mxu0 (!%p138_p2), %v1398_v0  ;;  %v1401_v3 = vld [vmem:[%s1793_s1 + $0x9c] ss:$12 sps:$4 sm:$0xff] (!%p138_p2)   ;;  %v1402_v4 = vld [vmem:[%s1793_s1 + $0xb8] ss:$12 sps:$4 sm:$0xff] (!%p138_p2)   ;;  %vm375_vm0 = vcmask (!%p138_p2), 1042432  }
   0x7   : > { %1306 = vmatprep.subr.bf16.mxu1 (!%p138_p2), %v1400_v1  ;;  %386 = vmatpush1.bf16.msra.mxu0 (!%p138_p2), %v1401_v3  ;;  %v1404_v5 = vld [vmem:[%s1793_s1 + $0xbc] ss:$12 sps:$4 sm:$0xff] (!%p138_p2)   ;;  %v1405_v6 = vld [vmem:[%s1793_s1 + $0xb4] ss:$12 sps:$4 sm:$0xff] (!%p138_p2)   ;;  %v1409_v9 = vld [vmem:[%s1793_s1 + $0xcc] ss:$12 sps:$4 sm:$0xff] (!%p138_p2)  }
   0x8   : > { %1307 = vmatpush3.bf16.msra.mxu1 (!%p138_p2), %v1400_v1  ;;  %387 = vmatprep.subr.bf16.mxu0 (!%p138_p2), %v1402_v4  ;;  %v1406_v7 = vld [vmem:[%s1793_s1 + $0xd0] ss:$12 sps:$4 sm:$0xff] (!%p138_p2)   ;;  %v1408_v8 = vld [vmem:[%s1793_s1 + $0xd4] ss:$12 sps:$4 sm:$0xff] (!%p138_p2)   ;;  %v1412_v11 = vld [vmem:[%s1793_s1 + $0xec] ss:$12 sps:$4 sm:$0xff] (!%p138_p2)  }
   0x9   : > { %1308 = vmatprep.subr.bf16.mxu1 (!%p138_p2), %v1404_v5  ;;  %v1410_v10 = vld [vmem:[%s1793_s1 + $0xe8] ss:$12 sps:$4 sm:$0xff] (!%p138_p2)   ;;  %v1413_v12 = vld [vmem:[%s1793_s1 + $0xe4] ss:$12 sps:$4 sm:$0xff] (!%p138_p2)   ;;  %v1414_v13 = vld [vmem:[%s1793_s1 + $0x100] ss:$12 sps:$4 sm:$0xff] (!%p138_p2)  }
   0xa   : > { %v1416_v14 = vld [vmem:[%s1793_s1 + $0x104] ss:$12 sps:$4 sm:$0xff] (!%p138_p2)   ;;  %v1417_v15 = vld [vmem:[%s1793_s1 + $0xfc] ss:$12 sps:$4 sm:$0xff] (!%p138_p2)   ;;  %v1421_v24 = vld [vmem:[%s1793_s1 + $0x114] ss:$12 sps:$4 sm:$0xff] (!%p138_p2)  }
   0xb   : > { %388 = vmatpush1.bf16.msra.mxu0 (!%p138_p2), %v1405_v6  ;;  %v1418_v17 = vld [vmem:[%s1793_s1 + $0x118] ss:$12 sps:$4 sm:$0xff] (!%p138_p2)   ;;  %v1420_v18 = vld [vmem:[%s1793_s1 + $0x11c] ss:$12 sps:$4 sm:$0xff] (!%p138_p2)   ;;  %v1151_v22 = vld [vmem:[%s1793_s1 + $0x12c] sm:$0x77] (!%p138_p2) }
   0xc   : > { %1309 = vmatpush3.bf16.msra.mxu1 (!%p138_p2), %v1404_v5  ;;  %389 = vmatprep.subr.bf16.mxu0 (!%p138_p2), %v1406_v7  ;;  %v1423_v25 = vld [vmem:[%s1793_s1 + $0x134] ss:$0 sps:$4 sm:$0x77] (!%p138_p2)   ;;  %v1174_v28 = vcombine.low (!%p138_p2), %v1151_v22, %v1151_v22  ;;  %v1175_v32 = vcombine.high (!%p138_p2), %v1151_v22, %v1151_v22  ;;  %vm243_vm1 = vsmask.f32 (!%p138_p2), 7424  ;;  %vm368_vm2 = vcmask (!%p138_p2), 834560  }
   0xd   : > { %s1797_s13 = smov (!%p161_p3, %s1120_s13), 1  ;;  %1310 = vmatprep.subr.bf16.mxu1 %v1408_v8  ;;  %v383_v37 = vsel %vm375_vm0, %v1423_v25, 0  ;;  %v1429_v40 = vld [vmem:[%s1793_s1 + $0x4] ss:$12 sps:$4 sm:$0xff]   ;;  %v1430_v41 = vld [vmem:[%s1793_s1 + $0x8] ss:$12 sps:$4 sm:$0xff]  }
   0xe   : > { %s1387_s5 = smul.u32 20, %s1797_s13  ;;  %v377_v36 = vsel %vm375_vm0, %v1174_v28, 0  ;;  %v1427_v43 = vld [vmem:[%s1793_s1] ss:$12 sps:$4 sm:$0xff]   ;;  %v1434_v45 = vld [vmem:[%s1793_s1 + $0x1c] ss:$12 sps:$4 sm:$0xff]  }
   0xf   : > { %390 = vmatpush1.bf16.msra.mxu0 %v1409_v9  ;;  %v1435_v46 = vld [vmem:[%s1793_s1 + $0x20] ss:$12 sps:$4 sm:$0xff]   ;;  %v1432_v47 = vld [vmem:[%s1793_s1 + $0x18] ss:$12 sps:$4 sm:$0xff]   ;;  %v1436_v50 = vld [vmem:[%s1793_s1 + $0x30] ss:$12 sps:$4 sm:$0xff]  }
  0x10   : > { %s1560_s14 = scalar_lea.vmem %s1792_s0, %s1387_s5  ;;  %1311 = vmatpush3.bf16.msra.mxu1 %v1408_v8  ;;  %391 = vmatprep.subr.bf16.mxu0 %v1410_v10  ;;  %v1438_v48 = vld [vmem:[%s1793_s1 + $0x34] ss:$12 sps:$4 sm:$0xff]   ;;  %v1439_v49 = vld [vmem:[%s1793_s1 + $0x38] ss:$12 sps:$4 sm:$0xff]   ;;  %v1443_v52 = vld [vmem:[%s1793_s1 + $0x50] ss:$12 sps:$4 sm:$0xff]  }
  0x11   : > { %1312 = vmatprep.subr.bf16.mxu1 %v1412_v11  ;;  %v172_v16 = vld [vmem:[%s1560_s14] sm:$0xf]  ;;  %v1582_v19 = vld [vmem:[%s1560_s14 + $0x4] sm:$0xf]  ;;  %v1585_v20 = vld [vmem:[%s1560_s14 + $0x8] sm:$0xff]   ;;  %vm737_vm3 = vcmask 1046528  }
  0x12   : > { %v1588_v21 = vcombine.low %v172_v16, %v1582_v19  ;;  %v252_v23 = vshll.u32 %v1585_v20, 16  ;;  %v256_v31 = vshrl.u32 %v1585_v20, 16  ;;  %v1604_v33 = vld [vmem:[%s1560_s14 + $0x10] ss:$0 sps:$4 sm:$0x11]   ;;  %v739_v8 = vrot.slane %v1585_v20, 1 }
  0x13   : > { %392 = vmatpush1.bf16.msra.mxu0 %v1413_v12  ;;  %v260_v35 = vshll.u32 %v1604_v33, 16  ;;  %v1442_v51 = vld [vmem:[%s1793_s1 + $0x4c] ss:$12 sps:$4 sm:$0xff]   ;;  %v1440_v53 = vld [vmem:[%s1793_s1 + $0x48] ss:$12 sps:$4 sm:$0xff]   ;;  %s1388_s17 = smul.u32 48, %s1797_s13 }
  0x14   : > { %1313 = vmatpush3.bf16.msra.mxu1 %v1412_v11  ;;  %393 = vmatprep.subr.bf16.mxu0 %v1414_v13  ;;  %v245_v26 = vshrl.u32 %v1588_v21, 16  ;;  %v247_v27 = vshll.u32 %v1588_v21, 16  ;;  %v254_v30 = vrot.slane %v252_v23, 1  ;;  %v1446_v54 = vld [vmem:[%s1793_s1 + $0x64] ss:$12 sps:$4 sm:$0xff]  }
  0x15   : > { %1314 = vmatprep.subr.bf16.mxu1 %v1416_v14  ;;  %v262_v42 = vrot.slane %v260_v35, 1  ;;  %v1447_v55 = vld [vmem:[%s1793_s1 + $0x68] ss:$12 sps:$4 sm:$0xff]   ;;  %v1444_v56 = vld [vmem:[%s1793_s1 + $0x60] ss:$12 sps:$4 sm:$0xff]   ;;  %s1779_s20 = scalar_lea.vmem %s1795_s3, %s1388_s17 }
  0x16   : > { %v249_v29 = vrot.slane %v247_v27, 1  ;;  %v258_v39 = vor.u32 %v256_v31, %v254_v30  ;;  %v1450_v57 = vld [vmem:[%s1793_s1 + $0x7c] ss:$12 sps:$4 sm:$0xff]   ;;  %v1451_v58 = vld [vmem:[%s1793_s1 + $0x80] ss:$12 sps:$4 sm:$0xff]   ;;  %v741_v31 = vrot.slane %v1604_v33, 1  ;;  %v978_v33 = vlaneseq }
  0x17   : > { %394 = vmatpush1.bf16.msra.mxu0 %v1417_v15  ;;  %v200_v59 = vld [vmem:[%s1793_s1 + $0x90] sm:$0x77]  ;;  %v1448_v60 = vld [vmem:[%s1793_s1 + $0x78] ss:$12 sps:$4 sm:$0xff]   ;;  %v706_v61 = vld [vmem:[%s1560_s14] sm:$0xe] }
  0x18   : > { %1315 = vmatpush3.bf16.msra.mxu1 %v1416_v14  ;;  %395 = vmatprep.subr.bf16.mxu0 %v1418_v17  ;;  %v250_v34 = vor.u32 %v249_v29, %v245_v26  ;;  %v263_v44 = vsel %vm243_vm1, %v258_v39, %v262_v42  ;;  %v1201_v62 = vcombine.high %v200_v59, %v200_v59  ;;  %v1453_v63 = vld [vmem:[%s1793_s1 + $0x98] ss:$0 sps:$4 sm:$0x77]   ;;  %v1457_v5 = vld [vmem:[%s1793_s1 + $0x13c] ss:$12 sps:$4 sm:$0xff]  }
  0x19   : > { %1316 = vmatprep.subr.bf16.mxu1 %v1420_v18  ;;  %v1200_v0 = vcombine.low %v200_v59, %v200_v59  ;;  %v1234_v1 = vcombine.low %v706_v61, %v1582_v19  ;;  %v602_v4 = vsel %vm375_vm0, %v1453_v63, 0  ;;  %v1458_v6 = vld [vmem:[%s1793_s1 + $0x140] ss:$12 sps:$4 sm:$0xff]   ;;  %v1455_v9 = vld [vmem:[%s1793_s1 + $0x138] ss:$12 sps:$4 sm:$0xff]   ;;  %v742_v35 = vsel %vm737_vm3, %v739_v8, %v741_v31 }
  0x1a   : > { %v255_v38 = vsel %vm243_vm1, %v250_v34, %v254_v30  ;;  %v1461_v10 = vld [vmem:[%s1793_s1 + $0x154] ss:$12 sps:$4 sm:$0xff]   ;;  %v1462_v11 = vld [vmem:[%s1793_s1 + $0x158] ss:$12 sps:$4 sm:$0xff]   ;;  %v1459_v13 = vld [vmem:[%s1793_s1 + $0x150] ss:$12 sps:$4 sm:$0xff]  }
  0x1b   : > { %396 = vmatpush1.bf16.msra.mxu0 %v1421_v24  ;;  %1320 = vmatprep.mubr.msk.bf16.mxu1 %vm368_vm2, %v255_v38  ;;  %v596_v3 = vsel %vm375_vm0, %v1200_v0, 0  ;;  %v738_v7 = vrot.slane %v1234_v1, 1  ;;  %v1465_v14 = vld [vmem:[%s1793_s1 + $0x16c] ss:$12 sps:$4 sm:$0xff]   ;;  %v1466_v15 = vld [vmem:[%s1793_s1 + $0x170] ss:$12 sps:$4 sm:$0xff]  }
  0x1c   : > { %1317 = vmatpush3.bf16.msra.mxu1 %v1420_v18  ;;  %1177 = vmatprep.subr.msk.bf16.mxu0 %vm375_vm0, %v1175_v32  ;;  %v1463_v16 = vld [vmem:[%s1793_s1 + $0x168] ss:$12 sps:$4 sm:$0xff]   ;;  %v1469_v17 = vld [vmem:[%s1793_s1 + $0x184] ss:$12 sps:$4 sm:$0xff]   ;;  %v1467_v19 = vld [vmem:[%s1793_s1 + $0x180] ss:$12 sps:$4 sm:$0xff]  }
  0x1d   : > { %1384 = vmatprep.subr.msk.bf16.mxu1 %vm375_vm0, %v1423_v25  ;;  %v740_v12 = vsel %vm737_vm3, %v738_v7, %v739_v8  ;;  %v1470_v18 = vld [vmem:[%s1793_s1 + $0x188] ss:$12 sps:$4 sm:$0xff]   ;;  %v1474_v22 = vld [vmem:[%s1793_s1 + $0x1a0] ss:$12 sps:$4 sm:$0xff]   ;;  %v1471_v23 = vld [vmem:[%s1793_s1 + $0x198] ss:$12 sps:$4 sm:$0xff]  }
  0x1e   : > { %v1477_v24 = vld [vmem:[%s1793_s1 + $0x1b4] ss:$12 sps:$4 sm:$0xff]   ;;  %v1478_v25 = vld [vmem:[%s1793_s1 + $0x1b8] ss:$12 sps:$4 sm:$0xff]   ;;  %v1232_v26 = vld [vmem:[%s1793_s1 + $0x1c8] sm:$0x77] }
  0x1f   : > { %398 = vmatpush1.bf16.msra.mxu0 %v377_v36  ;;  %v1475_v27 = vld [vmem:[%s1793_s1 + $0x1b0] ss:$12 sps:$4 sm:$0xff]   ;;  %v1254_v28 = vcombine.high %v1232_v26, %v1232_v26  ;;  %v1253_v30 = vcombine.low %v1232_v26, %v1232_v26  ;;  %v979_v36 = vshrl.u32 %v978_v33, 7  ;;  %v976_v39 = vld [vmem:[%s1794_s2] sm:$0x7] }
  0x20   : > { %1319 = vmatpush3.bf16.msra.mxu1 %v383_v37  ;;  %604 = vmatprep.subr.bf16.mxu0 %v1429_v40  ;;  %v1480_v29 = vld [vmem:[%s1793_s1 + $0x1d0] ss:$0 sps:$4 sm:$0x77]  }
  0x21   : > { %1324 = vmatprep.subr.bf16.mxu1 %v1430_v41  ;;  %v854_v32 = vsel %vm375_vm0, %v1253_v30, 0  ;;  %v860_v34 = vsel %vm375_vm0, %v1480_v29, 0  ;;  %v980_v37 = vsub.s32 0, %v979_v36 }
  0x22   : > { %1178 = vmatmul.mubr.msk.bf16.vlgmr.msra.gmra.mrb[0].mxu0 %vm368_vm2, %v255_v38  ;;  %v988_v38 = vsub.s32 2, %v979_v36 }
  0x23   : > { %1321 = vmatmul.mubr.msk.bf16.vlgmr.msra.gmra.mrb[0].mxu1 %vm368_vm2, %v263_v44  ;;  %605 = vmatpush1.bf16.msra.mxu0 %v1427_v43  ;;  %v981_v40 = vrot.slane %v976_v39, %v980_v37 }
  0x24   : > { %1325 = vmatpush3.bf16.msra.mxu1 %v1430_v41  ;;  %606 = vmatprep.subr.bf16.mxu0 %v1434_v45  ;;  %v989_v41 = vrot.slane %v976_v39, %v988_v38 }
  0x25   : > { %1326 = vmatprep.subr.bf16.mxu1 %v1435_v46  ;;  %427 = vmatprep.mubr.bf16.mxu0 %v1491_v2 }
  0x26   : > { %1338 = vmatprep.mubr.msk.bf16.mxu1 %vm368_vm2, %v1588_v21 }
  0x27   : > { %607 = vmatpush1.bf16.msra.mxu0 %v1432_v47 }
  0x28   : > { %1327 = vmatpush3.bf16.msra.mxu1 %v1435_v46  ;;  %608 = vmatprep.subr.bf16.mxu0 %v1438_v48 }
  0x29   : > { %1328 = vmatprep.subr.bf16.mxu1 %v1439_v49 }
  0x2a   : > { %1179 = vmatmul.mubr.msk.bf16.gmra.mrb[4].mxu0 %vm368_vm2, %v263_v44 }
  0x2b   : > { %609 = vmatpush1.bf16.msra.mxu0 %v1436_v50  ;;  %636 = vmatprep.mubr.bf16.mxu0 %v1491_v2 }
  0x2c   : > { %1329 = vmatpush3.bf16.msra.mxu1 %v1439_v49  ;;  %610 = vmatprep.subr.bf16.mxu0 %v1442_v51 }
  0x2d   : > { %1330 = vmatprep.subr.bf16.mxu1 %v1443_v52 }
  0x2f   : > { %611 = vmatpush1.bf16.msra.mxu0 %v1440_v53 }
  0x30   : > { %1331 = vmatpush3.bf16.msra.mxu1 %v1443_v52  ;;  %612 = vmatprep.subr.bf16.mxu0 %v1446_v54 }
  0x31   : > { %1332 = vmatprep.subr.bf16.mxu1 %v1447_v55 }
  0x33   : > { %613 = vmatpush1.bf16.msra.mxu0 %v1444_v56 }
  0x34   : > { %1333 = vmatpush3.bf16.msra.mxu1 %v1447_v55  ;;  %614 = vmatprep.subr.bf16.mxu0 %v1450_v57 }
  0x35   : > { %1334 = vmatprep.subr.bf16.mxu1 %v1451_v58 }
  0x37   : > { %615 = vmatpush1.bf16.msra.mxu0 %v1448_v60 }
  0x38   : > { %1335 = vmatpush3.bf16.msra.mxu1 %v1451_v58  ;;  %1203 = vmatprep.subr.msk.bf16.mxu0 %vm375_vm0, %v1201_v62 }
  0x39   : > { %1385 = vmatprep.subr.msk.bf16.mxu1 %vm375_vm0, %v1453_v63 }
  0x3b   : > { %617 = vmatpush1.bf16.msra.mxu0 %v596_v3 }
  0x3c   : > { %1337 = vmatpush3.bf16.msra.mxu1 %v602_v4  ;;  %862 = vmatprep.subr.bf16.mxu0 %v1457_v5 }
  0x3d   : > { %1342 = vmatprep.subr.bf16.mxu1 %v1458_v6 }
  0x3e   : > { %1204 = vmatmul.mubr.msk.bf16.vlgmr.msra.gmra.mrb[0].mxu0 %vm368_vm2, %v1588_v21  ;;  %v1473_v21 = vld [vmem:[%s1793_s1 + $0x19c] ss:$12 sps:$4 sm:$0xff]  }
  0x3f   : > { %1339 = vmatmul.mubr.msk.bf16.vlgmr.msra.gmra.mrb[0].mxu1 %vm368_vm2, %v1585_v20  ;;  %863 = vmatpush1.bf16.msra.mxu0 %v1455_v9 }
  0x40   : > { %1343 = vmatpush3.bf16.msra.mxu1 %v1458_v6  ;;  %864 = vmatprep.subr.bf16.mxu0 %v1461_v10 }
  0x41   : > { %1344 = vmatprep.subr.bf16.mxu1 %v1462_v11  ;;  %646 = vmatprep.mubr.bf16.mxu0 %v1491_v2 }
  0x42   : > { %1356 = vmatprep.mubr.msk.bf16.mxu1 %vm368_vm2, %v740_v12 }
  0x43   : > { %865 = vmatpush1.bf16.msra.mxu0 %v1459_v13 }
  0x44   : > { %1345 = vmatpush3.bf16.msra.mxu1 %v1462_v11  ;;  %866 = vmatprep.subr.bf16.mxu0 %v1465_v14 }
  0x45   : > { %1346 = vmatprep.subr.bf16.mxu1 %v1466_v15 }
  0x46   : > { %1205 = vmatmul.mubr.msk.bf16.gmra.mrb[4].mxu0 %vm368_vm2, %v1585_v20  ;;  %v984_v20 = vsub.s32 1, %v979_v36 }
  0x47   : > { %867 = vmatpush1.bf16.msra.mxu0 %v1463_v16  ;;  %894 = vmatprep.mubr.bf16.mxu0 %v1491_v2 }
  0x48   : > { %1347 = vmatpush3.bf16.msra.mxu1 %v1466_v15  ;;  %868 = vmatprep.subr.bf16.mxu0 %v1469_v17  ;;  %v985_v42 = vrot.slane %v976_v39, %v984_v20 }
  0x49   : > { %1348 = vmatprep.subr.bf16.mxu1 %v1470_v18 }
  0x4b   : > { %869 = vmatpush1.bf16.msra.mxu0 %v1467_v19 }
  0x4c   : > { %1349 = vmatpush3.bf16.msra.mxu1 %v1470_v18  ;;  %870 = vmatprep.subr.bf16.mxu0 %v1473_v21 }
  0x4d   : > { %1350 = vmatprep.subr.bf16.mxu1 %v1474_v22 }
  0x4f   : > { %871 = vmatpush1.bf16.msra.mxu0 %v1471_v23 }
  0x50   : > { %1351 = vmatpush3.bf16.msra.mxu1 %v1474_v22  ;;  %872 = vmatprep.subr.bf16.mxu0 %v1477_v24 }
  0x51   : > { %1352 = vmatprep.subr.bf16.mxu1 %v1478_v25 }
  0x53   : > { %873 = vmatpush1.bf16.msra.mxu0 %v1475_v27 }
  0x54   : > { %1353 = vmatpush3.bf16.msra.mxu1 %v1478_v25  ;;  %1256 = vmatprep.subr.msk.bf16.mxu0 %vm375_vm0, %v1254_v28 }
  0x55   : > { %1386 = vmatprep.subr.msk.bf16.mxu1 %vm375_vm0, %v1480_v29 }
  0x57   : > { %875 = vmatpush1.bf16.msra.mxu0 %v854_v32 }
  0x58   : > { %1355 = vmatpush3.bf16.msra.mxu1 %v860_v34 }
  0x5a   : > { %1257 = vmatmul.mubr.msk.bf16.vlgmr.msra.gmra.mrb[0].mxu0 %vm368_vm2, %v740_v12 }
  0x5b   : > { %1357 = vmatmul.mubr.msk.bf16.vlgmr.msra.gmra.mrb[0].mxu1 %vm368_vm2, %v742_v35  ;;  %904 = vmatprep.mubr.bf16.mxu0 %v1491_v2 }
  0x62   : > { %1258 = vmatmul.mubr.msk.bf16.gmra.mrb[4].mxu0 %vm368_vm2, %v742_v35 }
 0x12d   : > { %v896_v43 = vpop.f32.mrb[0].mxu0 }
 0x12e   : > { %v1358_v44 = vpop.f32.mrb[0].mxu1  ;;  %v993_v45 = vadd.f32 %v981_v40, %v896_v43  ;;  %v898_v2 = vpop.f32.mrb[1].mxu0 }
 0x12f   : > { %v1001_v46 = vadd.f32 %v1358_v44, %v989_v41  ;;  %v949_v47 = vpop.f32.mrb[1].mxu1  ;;  %v994_v48 = vadd.f32 %v985_v42, %v898_v2  ;;  %v900_v50 = vpop.f32.mrb[2].mxu0 }
 0x130   : > { %v995_v49 = vadd.f32 %v989_v41, %v949_v47  ;;  %v1359_v51 = vpop.f32.mrb[2].mxu1  ;;  %v1005_v52 = vmax.f32 %v993_v45, 0.0  ;;  %v996_v54 = vadd.f32 %v981_v40, %v900_v50  ;;  %v902_v56 = vpop.f32.mrb[3].mxu0 }
 0x131   : > { %v1013_v53 = vmax.f32 %v1001_v46, 0.0  ;;  %v1004_v55 = vadd.f32 %v1359_v51, %v989_v41  ;;  %v952_v57 = vpop.f32.mrb[3].mxu1  ;;  %v1006_v58 = vmax.f32 %v994_v48, 0.0  ;;  %v997_v60 = vadd.f32 %v985_v42, %v902_v56 }
 0x132   : > { %v1007_v59 = vmax.f32 %v995_v49, 0.0  ;;  %v998_v61 = vadd.f32 %v989_v41, %v952_v57  ;;  %v1008_v63 = vmax.f32 %v996_v54, 0.0 }
 0x133   : > { %v1276_v62 = vpack.c.bf16 %v1013_v53, %v1013_v53  ;;  %v1016_v0 = vmax.f32 %v1004_v55, 0.0  ;;  %v1271_v1 = vpack.c.bf16 %v1006_v58, %v1005_v52  ;;  %v1009_v4 = vmax.f32 %v997_v60, 0.0 }
 0x134   : > { %v1272_v3 = vpack.c.bf16 %v1007_v59, %v1007_v59  ;;  %v1010_v5 = vmax.f32 %v998_v61, 0.0 }
 0x135   : > { %1062 = vst [vmem:[%s1779_s20 + $0x20] sm:$0xf] %v1276_v62  ;;  %v1278_v6 = vpack.c.bf16 %v1016_v0, %v1016_v0  ;;  %1057 = vst [vmem:[%s1779_s20] sm:$0xff] %v1271_v1  ;;  %v1273_v7 = vpack.c.bf16 %v1009_v4, %v1008_v63  ;;  %v906_v9 = vpop.f32.mrb[4].mxu0 }
 0x136   : > { %1058 = vst [vmem:[%s1779_s20 + $0x8] sm:$0xf] %v1272_v3  ;;  %v1274_v8 = vpack.c.bf16 %v1010_v5, %v1010_v5  ;;  %v999_v10 = vadd.f32 %v981_v40, %v906_v9  ;;  %v908_v11 = vpop.f32.mrb[5].mxu0 }
 0x137   : > { %1064 = vst [vmem:[%s1779_s20 + $0x2c] sm:$0xf] %v1278_v6  ;;  %1059 = vst [vmem:[%s1779_s20 + $0xc] sm:$0xff] %v1273_v7  ;;  %v1000_v12 = vadd.f32 %v985_v42, %v908_v11  ;;  %v910_v13 = vpop.f32.mrb[6].mxu0 }
 0x138   : > { %1060 = vst [vmem:[%s1779_s20 + $0x14] sm:$0xf] %v1274_v8  ;;  %v1011_v14 = vmax.f32 %v999_v10, 0.0  ;;  %v1002_v15 = vadd.f32 %v981_v40, %v910_v13  ;;  %v912_v16 = vpop.f32.mrb[7].mxu0 }
 0x139   : > { %v1012_v17 = vmax.f32 %v1000_v12, 0.0  ;;  %v1003_v18 = vadd.f32 %v985_v42, %v912_v16 }
 0x13a   : > { %v1014_v19 = vmax.f32 %v1002_v15, 0.0 }
 0x13b   : > { %v1275_v21 = vpack.c.bf16 %v1012_v17, %v1011_v14  ;;  %v1015_v22 = vmax.f32 %v1003_v18, 0.0 }
 0x13d   : > { %1061 = vst [vmem:[%s1779_s20 + $0x18] sm:$0xff] %v1275_v21  ;;  %v1277_v23 = vpack.c.bf16 %v1015_v22, %v1014_v19 }
 0x13f   : > { %1063 = vst [vmem:[%s1779_s20 + $0x24] sm:$0xff] %v1277_v23 }
 0x140 PF: > { %s13_s12 = sadd.s32 1, %s1489_s12  }
 0x141   : > { %p10_p4 = scmp.ge.s32.totalorder %s13_s12, 4  }
 0x143   :  { %12 = sbr.rel (!%p10_p4) target bundleno = 1 (0x1), region = 64 }

// kernel: tile.66
= control target key start
LH: loop header
LB: loop body
LE: loop exit
PB: predicated region body
PF: predicated region fallthrough
CT: control target
= control target key end

     0   :  { %s28_s0 = inlined_call_operand.vmem [shape: f32[12], index: 0, kind: input, shape index: {}]   ;;  %s29_s1 = inlined_call_operand.vmem [shape: f32[16,12], index: 1, kind: output, shape index: {}]  }
   0x1   :  { %v4_v0 = vld [vmem:[%s28_s0] ss:$0 sm:$0xff] }
   0x2   :  { %5 = vst [vmem:[%s29_s1] sm:$0xff] %v4_v0  ;;  %8 = vst [vmem:[%s29_s1 + $0x8] sm:$0xff] %v4_v0 }

// kernel: tile.67
= control target key start
LH: loop header
LB: loop body
LE: loop exit
PB: predicated region body
PF: predicated region fallthrough
CT: control target
= control target key end

     0   :  { %vm9_vm0 = vcmask 64512   ;;  %s150_s12 = smov 120   ;;  %s151_s13 = smov 96   ;;  %vm3_vm1 = vcmask 97280   ;;  %vm13_vm2 = vcmask 31744   ;;  %vm16_vm3 = vcmask 1048512   ;;  %s232_s0 = inlined_call_operand.vmem [shape: f32[16,12], index: 0, kind: input, shape index: {}]   ;;  %s233_s1 = inlined_call_operand.vmem [shape: f32[1,192], index: 1, kind: output, shape index: {}]  }
   0x1   :  { %v118_v0 = vld [vmem:[%s232_s0 + $0xa] sm:$0x1]   ;;  %v121_v3 = vld [vmem:[%s232_s0 + $0x8] sm:$0x1]   ;;  %v120_v4 = vld [vmem:[%s232_s0 + $0x9] sm:$0x1]  }
   0x2   :  { %v119_v1 = vld [vmem:[%s232_s0 + $0xa] sm:$0x1]   ;;  %26 = vrot.lane.b32.xlu1 %v121_v3, %s151_s13  ;;  %v122_v5 = vld [vmem:[%s232_s0 + $0x7] sm:$0x1]   ;;  %s152_s18 = smov 108   ;;  %s153_s19 = smov 84  }
   0x3   :  { %v10_v2 = vsel %vm9_vm0, %v119_v1, %v118_v0  ;;  %v123_v6 = vld [vmem:[%s232_s0 + $0x6] sm:$0x1]   ;;  %v124_v7 = vld [vmem:[%s232_s0 + $0x5] sm:$0x1]   ;;  %v2_v8 = vld [vmem:[%s232_s0] sm:$0x1]  }
   0x4   :  { %11 = vrot.lane.b32.xlu0 %v10_v2, %s150_s12  ;;  %4 = vst.msk [vmem:[#allocation0] sm:$0x1] %vm3_vm1, %v2_v8   ;;  %s154_s26 = smov 72   ;;  %s155_s27 = smov 60   ;;  %v125_v9 = vld [vmem:[%s232_s0 + $0xf] sm:$0x1]  }
   0x5   :  { %v126_v10 = vld [vmem:[%s232_s0 + $0x4] sm:$0x1]   ;;  %s156_s3 = smov 52   ;;  %s157_s4 = smov 48   ;;  %v127_v11 = vld [vmem:[%s232_s0 + $0xe] sm:$0x1]  }
   0x6   :  { %32 = vrot.lane.b32.xlu1 %v122_v5, %s153_s19  ;;  %v128_v12 = vld [vmem:[%s232_s0 + $0x3] sm:$0x1]   ;;  %s158_s9 = smov 40   ;;  %s159_s10 = smov 36   ;;  %v129_v13 = vld [vmem:[%s232_s0 + $0xd] sm:$0x1]  }
   0x7   :  { %v130_v14 = vld [vmem:[%s232_s0 + $0x2] sm:$0x1]   ;;  %s160_s15 = smov 28   ;;  %s161_s16 = smov 24   ;;  %v131_v15 = vld [vmem:[%s232_s0 + $0xc] sm:$0x1]  }
   0x8   :  { %20 = vrot.lane.b32.xlu0 %v120_v4, %s152_s18  ;;  %v132_v16 = vld [vmem:[%s232_s0 + $0x1] sm:$0x1]   ;;  %s162_s21 = smov 16   ;;  %s163_s22 = smov 12   ;;  %v133_v17 = vld [vmem:[%s232_s0 + $0xb] sm:$0x1]  }
   0x9   :  { %s164_s0 = smov 4   ;;  %vm22_vm4 = vcmask 982880   ;;  %vm28_vm5 = vcmask 884480   ;;  %vm34_vm6 = vcmask 786080   ;;  %vm40_vm7 = vcmask 687680  }
   0xa   :  { %44 = vrot.lane.b32.xlu1 %v124_v7, %s155_s27  ;;  %vm46_vm8 = vcmask 589280   ;;  %vm52_vm9 = vcmask 523680   ;;  %vm59_vm10 = vcmask 490880   ;;  %vm65_vm11 = vcmask 425280  }
   0xb   :  { %vm72_vm12 = vcmask 392480   ;;  %vm78_vm13 = vcmask 326880   ;;  %vm85_vm14 = vcmask 294080   ;;  %vm91_vm15 = vcmask 228480  }
   0xc   :  { %38 = vrot.lane.b32.xlu0 %v123_v6, %s154_s26  ;;  %vm98_vm0 = vcmask 195680   ;;  %vm104_vm1 = vcmask 130080  }
   0xe   :  { %57 = vrot.lane.b32.xlu1 %v126_v10, %s157_s4 }
  0x10   :  { %50 = vrot.lane.b32.xlu0 %v125_v9, %s156_s3 }
  0x12   :  { %70 = vrot.lane.b32.xlu1 %v128_v12, %s159_s10 }
  0x14   :  { %63 = vrot.lane.b32.xlu0 %v127_v11, %s158_s9 }
  0x16   :  { %83 = vrot.lane.b32.xlu1 %v130_v14, %s161_s16 }
  0x18   :  { %76 = vrot.lane.b32.xlu0 %v129_v13, %s160_s15 }
  0x1a   :  { %96 = vrot.lane.b32.xlu1 %v132_v16, %s163_s22 }
  0x1c   :  { %89 = vrot.lane.b32.xlu0 %v131_v15, %s162_s21 }
  0x20   :  { %102 = vrot.lane.b32.xlu0 %v133_v17, %s164_s0 }
  0x74   :  { %v27_v19 = vpop.permute.xlu1 %26  }
  0x76   :  { %v12_v18 = vpop.permute.xlu0 %11  }
  0x77   :  { %15 = vst.msk [vmem:[#allocation0 + $0x8] sm:$0x1] %vm13_vm2, %v12_v18  }
  0x78   :  { %17 = vst.msk [vmem:[#allocation0] sm:$0x1] %vm16_vm3, %v12_v18   ;;  %v33_v21 = vpop.permute.xlu1 %32  }
  0x7a   :  { %v21_v20 = vpop.permute.xlu0 %20  }
  0x7b   :  { %23 = vst.msk [vmem:[#allocation0] sm:$0x1] %vm22_vm4, %v21_v20  }
  0x7c   :  { %29 = vst.msk [vmem:[#allocation0] sm:$0x1] %vm28_vm5, %v27_v19   ;;  %v45_v23 = vpop.permute.xlu1 %44  }
  0x7d   :  { %35 = vst.msk [vmem:[#allocation0] sm:$0x1] %vm34_vm6, %v33_v21  }
  0x7e   :  { %v39_v22 = vpop.permute.xlu0 %38  }
  0x7f   :  { %41 = vst.msk [vmem:[#allocation0] sm:$0x1] %vm40_vm7, %v39_v22  }
  0x80   :  { %47 = vst.msk [vmem:[#allocation0] sm:$0x1] %vm46_vm8, %v45_v23   ;;  %v58_v25 = vpop.permute.xlu1 %57  }
  0x81   :  { %60 = vst.msk [vmem:[#allocation0] sm:$0x1] %vm59_vm10, %v58_v25  }
  0x82   :  { %v51_v24 = vpop.permute.xlu0 %50  }
  0x83   :  { %54 = vst.msk [vmem:[#allocation0 + $0x8] sm:$0x1] %vm52_vm9, %v51_v24  }
  0x84   :  { %v71_v27 = vpop.permute.xlu1 %70  }
  0x85   :  { %73 = vst.msk [vmem:[#allocation0] sm:$0x1] %vm72_vm12, %v71_v27  }
  0x86   :  { %v64_v26 = vpop.permute.xlu0 %63  }
  0x87   :  { %67 = vst.msk [vmem:[#allocation0 + $0x8] sm:$0x1] %vm65_vm11, %v64_v26  }
  0x88   :  { %v84_v29 = vpop.permute.xlu1 %83  }
  0x89   :  { %86 = vst.msk [vmem:[#allocation0] sm:$0x1] %vm85_vm14, %v84_v29  }
  0x8a   :  { %v77_v28 = vpop.permute.xlu0 %76  }
  0x8b   :  { %80 = vst.msk [vmem:[#allocation0 + $0x8] sm:$0x1] %vm78_vm13, %v77_v28  }
  0x8c   :  { %v97_v31 = vpop.permute.xlu1 %96  }
  0x8d   :  { %99 = vst.msk [vmem:[#allocation0] sm:$0x1] %vm98_vm0, %v97_v31  }
  0x8e   :  { %v90_v30 = vpop.permute.xlu0 %89  }
  0x8f   :  { %93 = vst.msk [vmem:[#allocation0 + $0x8] sm:$0x1] %vm91_vm15, %v90_v30  }
  0x92   :  { %v103_v32 = vpop.permute.xlu0 %102  }
  0x93   :  { %106 = vst.msk [vmem:[#allocation0 + $0x8] sm:$0x1] %vm104_vm1, %v103_v32  }
  0x94   :  { %v110_v33 = vld [vmem:[#allocation0] sm:$0x1] }
  0x95   :  { %112 = vst [vmem:[%s233_s1] sm:$0x1] %v110_v33 }
  0x9a   :  { %v114_v34 = vld [vmem:[#allocation0 + $0x8] sm:$0x1] }
  0x9b   :  { %134 = vst [vmem:[%s233_s1 + $0x1] sm:$0x1] %v114_v34 }

// kernel: nusunit7s_forward.16
= control target key start
LH: loop header
LB: loop body
LE: loop exit
PB: predicated region body
PF: predicated region fallthrough
CT: control target
= control target key end

     0   :  { %s1308_s12 = smov 0   ;;  %s1618_s0 = inlined_call_operand.vmem [shape: bf16[2,18,216], index: 0, kind: input, shape index: {}]   ;;  %s1619_s1 = inlined_call_operand.vmem [shape: bf16[3,216,192], index: 1, kind: input, shape index: {}]   ;;  %s1620_s2 = inlined_call_operand.vmem [shape: f32[1,192], index: 2, kind: input, shape index: {}]   ;;  %s1621_s3 = inlined_call_operand.vmem [shape: bf16[2,16,192], index: 3, kind: output, shape index: {}]  }
   0x1 LB: > { %s969_s13 = sadd.s32 4294967295, %s1286_s12   ;;  %p973_p0 = scmp.ge.s32.totalorder %s1286_s12, 1  ;;  %s1286_s12 = sphi %s1308_s12, %s13_s12  }
   0x2   : > { %p137_p1 = scmp.lt.s32.totalorder %s1286_s12, 3 }
   0x4   : > { %p138_p2 = pnand %p973_p0, %p137_p1 }
   0x5   : > { %v1151_v0 = vld [vmem:[%s1619_s1 + $0x4] ss:$8 sps:$4 sm:$0xff] (!%p138_p2)   ;;  %v1153_v1 = vld [vmem:[%s1619_s1] ss:$8 sps:$4 sm:$0xff] (!%p138_p2)   ;;  %v1154_v2 = vld [vmem:[%s1619_s1 + $0x14] ss:$8 sps:$4 sm:$0xff] (!%p138_p2)  }
   0x6   : > { %141 = sbr.rel (%p138_p2) target bundleno = 342 (0x156), region = 32  ;;  %602 = vmatprep.subr.bf16.mxu0 (!%p138_p2), %v1151_v0  ;;  %v1156_v3 = vld [vmem:[%s1619_s1 + $0x10] ss:$8 sps:$4 sm:$0xff] (!%p138_p2)   ;;  %v1157_v4 = vld [vmem:[%s1619_s1 + $0x24] ss:$8 sps:$4 sm:$0xff] (!%p138_p2)   ;;  %p161_p3 = scmp.lt.s32.totalorder (!%p138_p2), %s969_s13, 1 }
   0x7   : > { %603 = vmatpush1.bf16.msra.mxu0 (!%p138_p2), %v1153_v1  ;;  %v1159_v5 = vld [vmem:[%s1619_s1 + $0x20] ss:$8 sps:$4 sm:$0xff] (!%p138_p2)   ;;  %v1160_v6 = vld [vmem:[%s1619_s1 + $0x34] ss:$8 sps:$4 sm:$0xff] (!%p138_p2)   ;;  %v1162_v7 = vld [vmem:[%s1619_s1 + $0x30] ss:$8 sps:$4 sm:$0xff] (!%p138_p2)  }
   0x8   : > { %604 = vmatprep.subr.bf16.mxu0 (!%p138_p2), %v1154_v2  ;;  %v1163_v8 = vld [vmem:[%s1619_s1 + $0x44] ss:$8 sps:$4 sm:$0xff] (!%p138_p2)   ;;  %v1165_v9 = vld [vmem:[%s1619_s1 + $0x40] ss:$8 sps:$4 sm:$0xff] (!%p138_p2)   ;;  %v1166_v10 = vld [vmem:[%s1619_s1 + $0x54] ss:$8 sps:$4 sm:$0xff] (!%p138_p2)  }
   0x9   : > { %v1168_v11 = vld [vmem:[%s1619_s1 + $0x50] ss:$8 sps:$4 sm:$0xff] (!%p138_p2)   ;;  %v1191_v12 = vld [vmem:[%s1619_s1 + $0xdc] ss:$8 sps:$4 sm:$0xff] (!%p138_p2)   ;;  %vm404_vm0 = vcmask (!%p138_p2), 719872   ;;  %vm408_vm1 = vcmask (!%p138_p2), 1043456  }
   0xa   : > { %v1194_v13 = vld [vmem:[%s1619_s1 + $0xd8] ss:$8 sps:$4 sm:$0xff] (!%p138_p2)   ;;  %v1169_v16 = vld [vmem:[%s1619_s1 + $0x64] ss:$8 sps:$4 sm:$0xff] (!%p138_p2)   ;;  %415 = vmatprep.subr.bf16.mxu1 (!%p138_p2), %v1191_v12  ;;  %v1202_v19 = vld [vmem:[%s1619_s1 + $0xe8] ss:$8 sps:$4 sm:$0xff] (!%p138_p2)  }
   0xb   : > { %605 = vmatpush1.bf16.msra.mxu0 (!%p138_p2), %v1156_v3  ;;  %416 = vmatpush1.bf16.msra.mxu1 (!%p138_p2), %v1194_v13  ;;  %v1199_v18 = vld [vmem:[%s1619_s1 + $0xec] ss:$8 sps:$4 sm:$0xff] (!%p138_p2)   ;;  %v1171_v20 = vld [vmem:[%s1619_s1 + $0x60] ss:$8 sps:$4 sm:$0xff] (!%p138_p2)   ;;  %v1206_v22 = vld [vmem:[%s1619_s1 + $0xfc] ss:$8 sps:$4 sm:$0xff] (!%p138_p2)  }
   0xc   : > { %606 = vmatprep.subr.bf16.mxu0 (!%p138_p2), %v1157_v4  ;;  %417 = vmatprep.subr.bf16.mxu1 (!%p138_p2), %v1199_v18  ;;  %v1172_v21 = vld [vmem:[%s1619_s1 + $0x74] ss:$8 sps:$4 sm:$0xff] (!%p138_p2)   ;;  %v1208_v23 = vld [vmem:[%s1619_s1 + $0xf8] ss:$8 sps:$4 sm:$0xff] (!%p138_p2)   ;;  %v1175_v26 = vld [vmem:[%s1619_s1 + $0x84] ss:$8 sps:$4 sm:$0xff] (!%p138_p2)  }
   0xd   : > { %s1623_s13 = smov (!%p161_p3, %s969_s13), 1  ;;  %v1174_v24 = vld [vmem:[%s1619_s1 + $0x70] ss:$8 sps:$4 sm:$0xff]   ;;  %v1212_v25 = vld [vmem:[%s1619_s1 + $0x10c] ss:$8 sps:$4 sm:$0xff]   ;;  %vm679_vm2 = vcmask 1046528  }
   0xe   : > { %s1142_s5 = smul.u32 24, %s1623_s13  ;;  %v1214_v27 = vld [vmem:[%s1619_s1 + $0x108] ss:$8 sps:$4 sm:$0xff]   ;;  %v1218_v28 = vld [vmem:[%s1619_s1 + $0x11c] ss:$8 sps:$4 sm:$0xff]   ;;  %s1131_s7 = sshll.u32 %s1623_s13, 4 }
   0xf   : > { %607 = vmatpush1.bf16.msra.mxu0 %v1159_v5  ;;  %418 = vmatpush1.bf16.msra.mxu1 %v1202_v19  ;;  %v1177_v29 = vld [vmem:[%s1619_s1 + $0x80] ss:$8 sps:$4 sm:$0xff]   ;;  %v1178_v30 = vld [vmem:[%s1619_s1 + $0x94] ss:$8 sps:$4 sm:$0xff]   ;;  %v1180_v33 = vld [vmem:[%s1619_s1 + $0x90] ss:$8 sps:$4 sm:$0xff]   ;;  %s170_s10 = scalar_lea.vmem %s1621_s3, %s1131_s7 }
  0x10   : > { %608 = vmatprep.subr.bf16.mxu0 %v1160_v6  ;;  %s1355_s14 = scalar_lea.vmem %s1618_s0, %s1142_s5  ;;  %419 = vmatprep.subr.bf16.mxu1 %v1206_v22  ;;  %v1220_v31 = vld [vmem:[%s1619_s1 + $0x118] ss:$8 sps:$4 sm:$0xff]   ;;  %v1224_v32 = vld [vmem:[%s1619_s1 + $0x12c] ss:$8 sps:$4 sm:$0xff]   ;;  %v1226_v35 = vld [vmem:[%s1619_s1 + $0x128] ss:$8 sps:$4 sm:$0xff]  }
  0x11   : > { %v1367_v14 = vld [vmem:[%s1355_s14] sm:$0xff]  ;;  %v1370_v15 = vld [vmem:[%s1355_s14 + $0x8] sm:$0xff]  ;;  %v1184_v38 = vld [vmem:[%s1619_s1 + $0xb4] ss:$8 sps:$4 sm:$0xff]   ;;  %vm243_vm3 = vsmask.f32 7424 }
  0x12   : > { %v1377_v17 = vcombine.high %v1367_v14, %v1370_v15  ;;  %v1181_v34 = vld [vmem:[%s1619_s1 + $0xa4] ss:$8 sps:$4 sm:$0xff]   ;;  %v1183_v37 = vld [vmem:[%s1619_s1 + $0xa0] ss:$8 sps:$4 sm:$0xff]   ;;  %v1186_v41 = vld [vmem:[%s1619_s1 + $0xb0] ss:$8 sps:$4 sm:$0xff]   ;;  %v1004_v58 = vcombine.low %v1367_v14, %v1370_v15 }
  0x13   : > { %609 = vmatpush1.bf16.msra.mxu0 %v1162_v7  ;;  %420 = vmatpush1.bf16.msra.mxu1 %v1208_v23  ;;  %v1230_v36 = vld [vmem:[%s1619_s1 + $0x13c] ss:$8 sps:$4 sm:$0xff]   ;;  %v1232_v39 = vld [vmem:[%s1619_s1 + $0x138] ss:$8 sps:$4 sm:$0xff]   ;;  %v1236_v40 = vld [vmem:[%s1619_s1 + $0x14c] ss:$8 sps:$4 sm:$0xff]  }
  0x14   : > { %610 = vmatprep.subr.bf16.mxu0 %v1163_v8  ;;  %1067 = vmatprep.mubr.msk.bf16.mxu0 %vm404_vm0, %v1377_v17  ;;  %v1187_v42 = vld [vmem:[%s1619_s1 + $0xc4] ss:$8 sps:$4 sm:$0xff]   ;;  %v200_v43 = vld [vmem:[%s1619_s1 + $0xd0] sm:$0xff]  ;;  %v1189_v46 = vld [vmem:[%s1619_s1 + $0xc0] ss:$8 sps:$4 sm:$0xff]   ;;  %v259_v49 = vshll.u32 %v1377_v17, 16 }
  0x15   : > { %421 = vmatprep.subr.bf16.mxu1 %v1212_v25  ;;  %v1238_v44 = vld [vmem:[%s1619_s1 + $0x148] ss:$8 sps:$4 sm:$0xff]   ;;  %v1242_v45 = vld [vmem:[%s1619_s1 + $0x15c] ss:$8 sps:$4 sm:$0xff]   ;;  %v1065_v47 = vcombine.high %v200_v43, %v200_v43  ;;  %v1064_v48 = vcombine.low %v200_v43, %v200_v43  ;;  %v1244_v50 = vld [vmem:[%s1619_s1 + $0x158] ss:$8 sps:$4 sm:$0xff]  }
  0x16   : > { %v1248_v51 = vld [vmem:[%s1619_s1 + $0x16c] ss:$8 sps:$4 sm:$0xff]   ;;  %v257_v54 = vshrl.u32 %v1377_v17, 16  ;;  %v261_v55 = vrot.slane %v259_v49, 1  ;;  %v1250_v56 = vld [vmem:[%s1619_s1 + $0x168] ss:$8 sps:$4 sm:$0xff]  }
  0x17   : > { %611 = vmatpush1.bf16.msra.mxu0 %v1165_v9  ;;  %422 = vmatpush1.bf16.msra.mxu1 %v1214_v27  ;;  %v597_v52 = vsel %vm408_vm1, %v1064_v48, 0  ;;  %v1198_v53 = vld [vmem:[%s1619_s1 + $0x1b4] ss:$8 sps:$4 sm:$0xff]   ;;  %v1491_v61 = vld [vmem:[%s1355_s14] sm:$0xee]  ;;  %v247_v12 = vshll.u32 %v1004_v58, 16 }
  0x18   : > { %612 = vmatprep.subr.bf16.mxu0 %v1166_v10  ;;  %423 = vmatprep.subr.bf16.mxu1 %v1218_v28  ;;  %v201_v57 = vld [vmem:[%s1355_s14 + $0x10] sm:$0x11]  ;;  %v1254_v59 = vld [vmem:[%s1619_s1 + $0x17c] ss:$8 sps:$4 sm:$0xff]   ;;  %v1096_v63 = vcombine.high %v1491_v61, %v1370_v15  ;;  %v262_v1 = vor.u32 %v261_v55, %v257_v54  ;;  %v1256_v4 = vld [vmem:[%s1619_s1 + $0x178] ss:$8 sps:$4 sm:$0xff]  }
  0x19   : > { %v1007_v60 = vcombine.high %v201_v57, %v201_v57  ;;  %v1196_v62 = vld [vmem:[%s1619_s1 + $0x1b0] ss:$8 sps:$4 sm:$0xff]   ;;  %v1205_v0 = vld [vmem:[%s1619_s1 + $0x1c4] ss:$8 sps:$4 sm:$0xff]   ;;  %v1203_v8 = vld [vmem:[%s1619_s1 + $0x1c0] ss:$8 sps:$4 sm:$0xff]   ;;  %v1520_v14 = vcombine.low %v201_v57, %v201_v57 }
  0x1a   : > { %v683_v5 = vrot.slane %v1096_v63, 1  ;;  %v1260_v6 = vld [vmem:[%s1619_s1 + $0x18c] ss:$8 sps:$4 sm:$0xff]   ;;  %v1262_v13 = vld [vmem:[%s1619_s1 + $0x188] ss:$8 sps:$4 sm:$0xff]   ;;  %v249_v22 = vrot.slane %v247_v12, 1 }
  0x1b   : > { %613 = vmatpush1.bf16.msra.mxu0 %v1168_v11  ;;  %424 = vmatpush1.bf16.msra.mxu1 %v1220_v31  ;;  %v264_v2 = vshll.u32 %v1007_v60, 16  ;;  %v684_v3 = vrot.slane %v1007_v60, 1  ;;  %v1211_v10 = vld [vmem:[%s1619_s1 + $0x1d4] ss:$8 sps:$4 sm:$0xff]   ;;  %v1209_v17 = vld [vmem:[%s1619_s1 + $0x1d0] ss:$8 sps:$4 sm:$0xff]  }
  0x1c   : > { %614 = vmatprep.subr.bf16.mxu0 %v1169_v16  ;;  %425 = vmatprep.subr.bf16.mxu1 %v1224_v32  ;;  %v1266_v16 = vld [vmem:[%s1619_s1 + $0x19c] ss:$8 sps:$4 sm:$0xff]   ;;  %v1003_v18 = vld [vmem:[%s1619_s1 + $0x1a8] sm:$0xff]  ;;  %v252_v23 = vshll.u32 %v1520_v14, 16  ;;  %v1221_v31 = vld [vmem:[%s1619_s1 + $0x1f0] ss:$8 sps:$4 sm:$0xff]  }
  0x1d   : > { %v266_v7 = vrot.slane %v264_v2, 1  ;;  %v685_v9 = vsel %vm679_vm2, %v683_v5, %v684_v3  ;;  %v1217_v19 = vld [vmem:[%s1619_s1 + $0x1e4] ss:$8 sps:$4 sm:$0xff]   ;;  %v1034_v25 = vcombine.low %v1003_v18, %v1003_v18  ;;  %v1223_v27 = vld [vmem:[%s1619_s1 + $0x1f4] ss:$8 sps:$4 sm:$0xff]   ;;  %v681_v54 = vrot.slane %v1520_v14, 1 }
  0x1e   : > { %v1229_v32 = vld [vmem:[%s1619_s1 + $0x204] ss:$8 sps:$4 sm:$0xff]   ;;  %v1259_v43 = vld [vmem:[%s1619_s1 + $0x254] ss:$8 sps:$4 sm:$0xff]   ;;  %v1269_v49 = vld [vmem:[%s1619_s1 + $0x270] ss:$8 sps:$4 sm:$0xff]  }
  0x1f   : > { %615 = vmatpush1.bf16.msra.mxu0 %v1171_v20  ;;  %426 = vmatpush1.bf16.msra.mxu1 %v1226_v35  ;;  %v267_v11 = vsel %vm243_vm3, %v262_v1, %v266_v7  ;;  %v1268_v20 = vld [vmem:[%s1619_s1 + $0x198] ss:$8 sps:$4 sm:$0xff]   ;;  %v1235_v35 = vld [vmem:[%s1619_s1 + $0x214] ss:$8 sps:$4 sm:$0xff]   ;;  %vm910_vm4 = vcmask 523268  }
  0x20   : > { %616 = vmatprep.subr.bf16.mxu0 %v1172_v21  ;;  %427 = vmatprep.subr.bf16.mxu1 %v1230_v36  ;;  %v245_v21 = vshrl.u32 %v1004_v58, 16  ;;  %v1233_v36 = vld [vmem:[%s1619_s1 + $0x210] ss:$8 sps:$4 sm:$0xff]   ;;  %v1094_v48 = vld [vmem:[%s1619_s1 + $0x280] sm:$0xff]  ;;  %vm911_vm5 = vmor %vm910_vm4, %vm408_vm1 }
  0x21   : > { %1037 = vmatprep.mubr.msk.bf16.mxu1 %vm404_vm0, %v267_v11  ;;  %v878_v63 = vld [vmem:[%s1620_s2] sm:$0x3] }
  0x22   : > { %v250_v28 = vor.u32 %v249_v22, %v245_v21 }
  0x23   : > { %617 = vmatpush1.bf16.msra.mxu0 %v1174_v24  ;;  %428 = vmatpush1.bf16.msra.mxu1 %v1232_v39  ;;  %v1035_v24 = vcombine.high %v1003_v18, %v1003_v18  ;;  %v1247_v39 = vld [vmem:[%s1619_s1 + $0x234] ss:$8 sps:$4 sm:$0xff]  }
  0x24   : > { %618 = vmatprep.subr.bf16.mxu0 %v1175_v26  ;;  %429 = vmatprep.subr.bf16.mxu1 %v1236_v40  ;;  %v1215_v26 = vld [vmem:[%s1619_s1 + $0x1e0] ss:$8 sps:$4 sm:$0xff]   ;;  %v1245_v40 = vld [vmem:[%s1619_s1 + $0x230] ss:$8 sps:$4 sm:$0xff]  }
  0x27   : > { %619 = vmatpush1.bf16.msra.mxu0 %v1177_v29  ;;  %430 = vmatpush1.bf16.msra.mxu1 %v1238_v44  ;;  %v254_v29 = vrot.slane %v252_v23, 1  ;;  %v1257_v44 = vld [vmem:[%s1619_s1 + $0x250] ss:$8 sps:$4 sm:$0xff]  }
  0x28   : > { %620 = vmatprep.subr.bf16.mxu0 %v1178_v30  ;;  %431 = vmatprep.subr.bf16.mxu1 %v1242_v45  ;;  %v410_v30 = vsel %vm408_vm1, %v1034_v25, 0  ;;  %v1265_v45 = vld [vmem:[%s1619_s1 + $0x264] ss:$8 sps:$4 sm:$0xff]  }
  0x2b   : > { %621 = vmatpush1.bf16.msra.mxu0 %v1180_v33  ;;  %432 = vmatpush1.bf16.msra.mxu1 %v1244_v50  ;;  %v255_v33 = vsel %vm243_vm3, %v250_v28, %v254_v29  ;;  %v1095_v50 = vcombine.low %v1491_v61, %v1370_v15  ;;  %v880_v15 = vlaneseq }
  0x2c   : > { %622 = vmatprep.subr.bf16.mxu0 %v1181_v34  ;;  %433 = vmatprep.subr.bf16.mxu1 %v1248_v51  ;;  %v1227_v34 = vld [vmem:[%s1619_s1 + $0x200] ss:$8 sps:$4 sm:$0xff]   ;;  %v1124_v51 = vcombine.high %v1094_v48, %v1094_v48 }
  0x2d   : > { %v881_v61 = vshrl.u32 %v880_v15, 7 }
  0x2f   : > { %623 = vmatpush1.bf16.msra.mxu0 %v1183_v37  ;;  %434 = vmatpush1.bf16.msra.mxu1 %v1250_v56  ;;  %v1241_v37 = vld [vmem:[%s1619_s1 + $0x224] ss:$8 sps:$4 sm:$0xff]  }
  0x30   : > { %624 = vmatprep.subr.bf16.mxu0 %v1184_v38  ;;  %435 = vmatprep.subr.bf16.mxu1 %v1254_v59  ;;  %v1239_v38 = vld [vmem:[%s1619_s1 + $0x220] ss:$8 sps:$4 sm:$0xff]  }
  0x33   : > { %625 = vmatpush1.bf16.msra.mxu0 %v1186_v41  ;;  %436 = vmatpush1.bf16.msra.mxu1 %v1256_v4  ;;  %v1253_v41 = vld [vmem:[%s1619_s1 + $0x244] ss:$8 sps:$4 sm:$0xff]  }
  0x34   : > { %626 = vmatprep.subr.bf16.mxu0 %v1187_v42  ;;  %437 = vmatprep.subr.bf16.mxu1 %v1260_v6  ;;  %v1251_v42 = vld [vmem:[%s1619_s1 + $0x240] ss:$8 sps:$4 sm:$0xff]  }
  0x37   : > { %627 = vmatpush1.bf16.msra.mxu0 %v1189_v46  ;;  %438 = vmatpush1.bf16.msra.mxu1 %v1262_v13  ;;  %v1263_v46 = vld [vmem:[%s1619_s1 + $0x260] ss:$8 sps:$4 sm:$0xff]  }
  0x38   : > { %1066 = vmatprep.subr.msk.bf16.mxu0 %vm408_vm1, %v1065_v47  ;;  %439 = vmatprep.subr.bf16.mxu1 %v1266_v16  ;;  %v1271_v47 = vld [vmem:[%s1619_s1 + $0x274] ss:$8 sps:$4 sm:$0xff]  }
  0x3b   : > { %629 = vmatpush1.bf16.msra.mxu0 %v597_v52  ;;  %440 = vmatpush1.bf16.msra.mxu1 %v1268_v20  ;;  %v1123_v52 = vcombine.low %v1094_v48, %v1094_v48 }
  0x3c   : > { %831 = vmatprep.subr.bf16.mxu0 %v1198_v53  ;;  %1036 = vmatprep.subr.msk.bf16.mxu1 %vm408_vm1, %v1035_v24  ;;  %v680_v53 = vrot.slane %v1095_v50, 1 }
  0x3d   : > { %v826_v55 = vsel %vm408_vm1, %v1123_v52, 0 }
  0x3e   : > { %635 = vmatmul.mubr.bf16.vlgmr.msra.gmra.mrb[0].mxu0 %v1004_v58  ;;  %v682_v56 = vsel %vm679_vm2, %v680_v53, %v681_v54 }
  0x3f   : > { %832 = vmatpush1.bf16.msra.mxu0 %v1196_v62  ;;  %1126 = vmatprep.mubr.msk.bf16.mxu0 %vm404_vm0, %v685_v9  ;;  %v882_v62 = vsub.s32 0, %v881_v61 }
  0x40   : > { %833 = vmatprep.subr.bf16.mxu0 %v1205_v0  ;;  %442 = vmatpush1.bf16.msra.mxu1 %v410_v30  ;;  %v886_v0 = vsub.s32 1, %v881_v61 }
  0x41   : > { %v883_v1 = vrot.slane %v878_v63, %v882_v62 }
  0x42   : > { %v887_v3 = vrot.slane %v878_v63, %v886_v0 }
  0x43   : > { %834 = vmatpush1.bf16.msra.mxu0 %v1203_v8  ;;  %448 = vmatmul.mubr.bf16.vlgmr.msra.gmra.mrb[0].mxu1 %v255_v33 }
  0x44   : > { %835 = vmatprep.subr.bf16.mxu0 %v1211_v10 }
  0x47   : > { %836 = vmatpush1.bf16.msra.mxu0 %v1209_v17 }
  0x48   : > { %837 = vmatprep.subr.bf16.mxu0 %v1217_v19 }
  0x4b   : > { %838 = vmatpush1.bf16.msra.mxu0 %v1215_v26 }
  0x4c   : > { %839 = vmatprep.subr.bf16.mxu0 %v1223_v27 }
  0x4f   : > { %840 = vmatpush1.bf16.msra.mxu0 %v1221_v31 }
  0x50   : > { %841 = vmatprep.subr.bf16.mxu0 %v1229_v32 }
  0x53   : > { %842 = vmatpush1.bf16.msra.mxu0 %v1227_v34 }
  0x54   : > { %843 = vmatprep.subr.bf16.mxu0 %v1235_v35 }
  0x57   : > { %844 = vmatpush1.bf16.msra.mxu0 %v1233_v36 }
  0x58   : > { %845 = vmatprep.subr.bf16.mxu0 %v1241_v37 }
  0x5b   : > { %846 = vmatpush1.bf16.msra.mxu0 %v1239_v38 }
  0x5c   : > { %847 = vmatprep.subr.bf16.mxu0 %v1247_v39 }
  0x5f   : > { %848 = vmatpush1.bf16.msra.mxu0 %v1245_v40 }
  0x60   : > { %849 = vmatprep.subr.bf16.mxu0 %v1253_v41 }
  0x63   : > { %850 = vmatpush1.bf16.msra.mxu0 %v1251_v42 }
  0x64   : > { %851 = vmatprep.subr.bf16.mxu0 %v1259_v43 }
  0x67   : > { %852 = vmatpush1.bf16.msra.mxu0 %v1257_v44 }
  0x68   : > { %853 = vmatprep.subr.bf16.mxu0 %v1265_v45 }
  0x6b   : > { %854 = vmatpush1.bf16.msra.mxu0 %v1263_v46 }
  0x6c   : > { %855 = vmatprep.subr.bf16.mxu0 %v1271_v47 }
  0x6f   : > { %856 = vmatpush1.bf16.msra.mxu0 %v1269_v49 }
  0x70   : > { %1125 = vmatprep.subr.msk.bf16.mxu0 %vm408_vm1, %v1124_v51 }
  0x73   : > { %858 = vmatpush1.bf16.msra.mxu0 %v826_v55 }
  0x76   : > { %864 = vmatmul.mubr.bf16.vlgmr.msra.gmra.mrb[0].mxu0 %v682_v56 }
 0x116   : > { %v449_v57 = vpop.f32.mrb[0].mxu1 }
 0x117   : > { %v451_v58 = vpop.f32.mrb[1].mxu1 }
 0x118   : > { %v453_v59 = vpop.f32.mrb[2].mxu1 }
 0x119   : > { %v455_v60 = vpop.f32.mrb[3].mxu1 }
 0x149   : > { %v865_v2 = vpop.f32.mrb[0].mxu0 }
 0x14a   : > { %v1134_v4 = vadd.f32 %v865_v2, %v449_v57  ;;  %v867_v5 = vpop.f32.mrb[1].mxu0 }
 0x14b   : > { %v1135_v6 = vadd.f32 %v867_v5, %v451_v58  ;;  %v869_v7 = vpop.f32.mrb[2].mxu0 }
 0x14c   : > { %v890_v8 = vadd.f32 %v1134_v4, %v883_v1  ;;  %v1136_v9 = vadd.f32 %v869_v7, %v453_v59  ;;  %v871_v10 = vpop.f32.mrb[3].mxu0 }
 0x14d   : > { %v891_v11 = vadd.f32 %v1135_v6, %v887_v3  ;;  %v1137_v12 = vadd.f32 %v871_v10, %v455_v60 }
 0x14e   : > { %v894_v13 = vmax.f32 %v890_v8, 0.0  ;;  %v892_v14 = vadd.f32 %v1136_v9, %v883_v1 }
 0x14f   : > { %v895_v16 = vmax.f32 %v891_v11, 0.0  ;;  %v893_v17 = vadd.f32 %v1137_v12, %v887_v3 }
 0x150   : > { %v896_v18 = vmax.f32 %v892_v14, 0.0 }
 0x151   : > { %v1132_v19 = vpack.c.bf16 %v895_v16, %v894_v13  ;;  %v897_v20 = vmax.f32 %v893_v17, 0.0 }
 0x153   : > { %912 = vst.msk [vmem:[%s170_s10] sm:$0xff] %vm911_vm5, %v1132_v19  ;;  %v1133_v21 = vpack.c.bf16 %v897_v20, %v896_v18 }
 0x155   : > { %913 = vst.msk [vmem:[%s170_s10 + $0x8] sm:$0xff] %vm911_vm5, %v1133_v21 }
 0x156 PF: > { %s13_s12 = sadd.s32 1, %s1286_s12  }
 0x157   : > { %p10_p4 = scmp.ge.s32.totalorder %s13_s12, 4  }
 0x159   :  { %12 = sbr.rel (!%p10_p4) target bundleno = 1 (0x1), region = 64 }

// kernel: tile.71
= control target key start
LH: loop header
LB: loop body
LE: loop exit
PB: predicated region body
PF: predicated region fallthrough
CT: control target
= control target key end

     0   :  { %s22_s0 = inlined_call_operand.vmem [shape: f32[12], index: 0, kind: input, shape index: {}]   ;;  %s23_s1 = inlined_call_operand.vmem [shape: f32[8,12], index: 1, kind: output, shape index: {}]  }
   0x1   :  { %v4_v0 = vld [vmem:[%s22_s0] ss:$0 sm:$0xff] }
   0x2   :  { %5 = vst [vmem:[%s23_s1] sm:$0xff] %v4_v0 }

// kernel: tile.72
= control target key start
LH: loop header
LB: loop body
LE: loop exit
PB: predicated region body
PF: predicated region fallthrough
CT: control target
= control target key end

     0   :  { %s67_s10 = smov 84   ;;  %s68_s11 = smov 60   ;;  %vm3_vm0 = vcmask 97280   ;;  %vm9_vm1 = vcmask 786080   ;;  %vm15_vm2 = vcmask 687680   ;;  %vm21_vm3 = vcmask 589280   ;;  %s111_s0 = inlined_call_operand.vmem [shape: f32[8,12], index: 0, kind: input, shape index: {}]   ;;  %s112_s1 = inlined_call_operand.vmem [shape: f32[1,96], index: 1, kind: output, shape index: {}]  }
   0x1   :  { %v53_v0 = vld [vmem:[%s111_s0 + $0x7] sm:$0x1]   ;;  %v55_v1 = vld [vmem:[%s111_s0 + $0x5] sm:$0x1]   ;;  %v54_v2 = vld [vmem:[%s111_s0 + $0x6] sm:$0x1]  }
   0x2   :  { %7 = vrot.lane.b32.xlu0 %v53_v0, %s67_s10  ;;  %19 = vrot.lane.b32.xlu1 %v55_v1, %s68_s11  ;;  %v56_v3 = vld [vmem:[%s111_s0 + $0x4] sm:$0x1]   ;;  %v2_v4 = vld [vmem:[%s111_s0] sm:$0x1]   ;;  %s69_s18 = smov 72   ;;  %s70_s19 = smov 48  }
   0x3   :  { %4 = vst.msk [vmem:[#allocation0] sm:$0x1] %vm3_vm0, %v2_v4   ;;  %v57_v5 = vld [vmem:[%s111_s0 + $0x3] sm:$0x1]   ;;  %v58_v6 = vld [vmem:[%s111_s0 + $0x2] sm:$0x1]  }
   0x4   :  { %s71_s24 = smov 36   ;;  %s72_s25 = smov 24   ;;  %v59_v7 = vld [vmem:[%s111_s0 + $0x1] sm:$0x1]   ;;  %vm27_vm4 = vcmask 490880   ;;  %vm33_vm5 = vcmask 392480  }
   0x5   :  { %s73_s0 = smov 12   ;;  %vm39_vm6 = vcmask 294080   ;;  %vm45_vm7 = vcmask 195680  }
   0x6   :  { %13 = vrot.lane.b32.xlu0 %v54_v2, %s69_s18  ;;  %25 = vrot.lane.b32.xlu1 %v56_v3, %s70_s19 }
   0xa   :  { %31 = vrot.lane.b32.xlu0 %v57_v5, %s71_s24  ;;  %37 = vrot.lane.b32.xlu1 %v58_v6, %s72_s25 }
   0xe   :  { %43 = vrot.lane.b32.xlu0 %v59_v7, %s73_s0 }
  0x74   :  { %v8_v8 = vpop.permute.xlu0 %7   ;;  %v20_v9 = vpop.permute.xlu1 %19  }
  0x75   :  { %10 = vst.msk [vmem:[#allocation0] sm:$0x1] %vm9_vm1, %v8_v8  }
  0x78   :  { %v14_v10 = vpop.permute.xlu0 %13   ;;  %v26_v11 = vpop.permute.xlu1 %25  }
  0x79   :  { %16 = vst.msk [vmem:[#allocation0] sm:$0x1] %vm15_vm2, %v14_v10  }
  0x7a   :  { %22 = vst.msk [vmem:[#allocation0] sm:$0x1] %vm21_vm3, %v20_v9  }
  0x7b   :  { %28 = vst.msk [vmem:[#allocation0] sm:$0x1] %vm27_vm4, %v26_v11  }
  0x7c   :  { %v32_v12 = vpop.permute.xlu0 %31   ;;  %v38_v13 = vpop.permute.xlu1 %37  }
  0x7d   :  { %34 = vst.msk [vmem:[#allocation0] sm:$0x1] %vm33_vm5, %v32_v12  }
  0x7e   :  { %40 = vst.msk [vmem:[#allocation0] sm:$0x1] %vm39_vm6, %v38_v13  }
  0x80   :  { %v44_v14 = vpop.permute.xlu0 %43  }
  0x81   :  { %46 = vst.msk [vmem:[#allocation0] sm:$0x1] %vm45_vm7, %v44_v14  }
  0x88   :  { %v50_v15 = vld [vmem:[#allocation0] sm:$0x1] }
  0x89   :  { %52 = vst [vmem:[%s112_s1] sm:$0x1] %v50_v15 }

// kernel: nusunit7s_forward.17
= control target key start
LH: loop header
LB: loop body
LE: loop exit
PB: predicated region body
PF: predicated region fallthrough
CT: control target
= control target key end

     0   :  { %s774_s12 = smov 0   ;;  %s916_s0 = inlined_call_operand.vmem [shape: bf16[2,12,144], index: 0, kind: input, shape index: {}]   ;;  %s917_s1 = inlined_call_operand.vmem [shape: bf16[3,144,96], index: 1, kind: input, shape index: {}]   ;;  %s918_s2 = inlined_call_operand.vmem [shape: f32[1,96], index: 2, kind: input, shape index: {}]   ;;  %s919_s3 = inlined_call_operand.vmem [shape: bf16[2,8,96], index: 3, kind: output, shape index: {}]  }
   0x1 LB: > { %s617_s13 = sadd.s32 4294967295, %s751_s12   ;;  %p621_p0 = scmp.ge.s32.totalorder %s751_s12, 1  ;;  %s751_s12 = sphi %s774_s12, %s13_s12  }
   0x2   : > { %p137_p1 = scmp.lt.s32.totalorder %s751_s12, 3 }
   0x4   : > { %p138_p2 = pnand %p621_p0, %p137_p1 }
   0x5   : > { %v710_v0 = vld [vmem:[%s917_s1 + $0x48] sm:$0xff] (!%p138_p2)   ;;  %v753_v1 = vmov (!%p138_p2), 0   ;;  %v711_v2 = vld [vmem:[%s917_s1] sm:$0xff] (!%p138_p2)   ;;  %v712_v3 = vld [vmem:[%s917_s1 + $0x50] sm:$0xff] (!%p138_p2)   ;;  %p160_p3 = scmp.lt.s32.totalorder (!%p138_p2), %s617_s13, 1  ;;  %vm275_vm0 = vcmask (!%p138_p2), 130048  }
   0x6   : > { %141 = sbr.rel (%p138_p2) target bundleno = 299 (0x12b), region = 32  ;;  %279 = vmatprep.subr.bf16.mxu0 (!%p138_p2), %v753_v1  ;;  %382 = vmatprep.subr.bf16.mxu1 (!%p138_p2), %v753_v1  ;;  %v713_v4 = vld [vmem:[%s917_s1 + $0x8] sm:$0xff] (!%p138_p2)   ;;  %v714_v5 = vld [vmem:[%s917_s1 + $0x58] sm:$0xff] (!%p138_p2)   ;;  %v715_v6 = vld [vmem:[%s917_s1 + $0x10] sm:$0xff] (!%p138_p2)   ;;  %vm562_vm1 = vcmask (!%p138_p2), 781312  }
   0x7   : > { %280 = vmatpush1.bf16.msra.mxu0 (!%p138_p2), %v710_v0  ;;  %383 = vmatpush1.bf16.msra.mxu1 (!%p138_p2), %v711_v2  ;;  %v716_v7 = vld [vmem:[%s917_s1 + $0x60] sm:$0xff] (!%p138_p2)   ;;  %v717_v8 = vld [vmem:[%s917_s1 + $0x18] sm:$0xff] (!%p138_p2)   ;;  %v718_v9 = vld [vmem:[%s917_s1 + $0x68] sm:$0xff] (!%p138_p2)  }
   0x8   : > { %281 = vmatprep.subr.bf16.mxu0 (!%p138_p2), %v753_v1  ;;  %384 = vmatprep.subr.bf16.mxu1 (!%p138_p2), %v753_v1  ;;  %v719_v10 = vld [vmem:[%s917_s1 + $0x20] sm:$0xff] (!%p138_p2)   ;;  %v720_v11 = vld [vmem:[%s917_s1 + $0x70] sm:$0xff] (!%p138_p2)   ;;  %v721_v13 = vld [vmem:[%s917_s1 + $0x28] sm:$0xff] (!%p138_p2)  }
   0x9   : > { %v722_v17 = vld [vmem:[%s917_s1 + $0x78] sm:$0xff] (!%p138_p2)   ;;  %v723_v18 = vld [vmem:[%s917_s1 + $0x30] sm:$0xff] (!%p138_p2)   ;;  %v724_v19 = vld [vmem:[%s917_s1 + $0x80] sm:$0xff] (!%p138_p2)  }
   0xa   : > { %v725_v20 = vld [vmem:[%s917_s1 + $0x38] sm:$0xff] (!%p138_p2)   ;;  %v726_v22 = vld [vmem:[%s917_s1 + $0x88] sm:$0xff] (!%p138_p2)   ;;  %v727_v23 = vld [vmem:[%s917_s1 + $0x40] sm:$0xff] (!%p138_p2)  }
   0xb   : > { %282 = vmatpush1.bf16.msra.mxu0 (!%p138_p2), %v712_v3  ;;  %385 = vmatpush1.bf16.msra.mxu1 (!%p138_p2), %v713_v4  ;;  %v733_v27 = vld [vmem:[%s917_s1 + $0x90] sm:$0xff] (!%p138_p2)   ;;  %v734_v29 = vld [vmem:[%s917_s1 + $0x98] sm:$0xff] (!%p138_p2)   ;;  %v735_v30 = vld [vmem:[%s917_s1 + $0xa0] sm:$0xff] (!%p138_p2)  }
   0xc   : > { %283 = vmatprep.subr.bf16.mxu0 (!%p138_p2), %v753_v1  ;;  %386 = vmatprep.subr.bf16.mxu1 (!%p138_p2), %v753_v1  ;;  %v736_v31 = vld [vmem:[%s917_s1 + $0xa8] sm:$0xff] (!%p138_p2)   ;;  %v737_v32 = vld [vmem:[%s917_s1 + $0xb0] sm:$0xff] (!%p138_p2)   ;;  %v738_v33 = vld [vmem:[%s917_s1 + $0xb8] sm:$0xff] (!%p138_p2)  }
   0xd   : > { %s921_s13 = smov (!%p160_p3, %s617_s13), 1  ;;  %v739_v34 = vld [vmem:[%s917_s1 + $0xc0] sm:$0xff]   ;;  %v740_v35 = vld [vmem:[%s917_s1 + $0xc8] sm:$0xff]   ;;  %v741_v37 = vld [vmem:[%s917_s1 + $0xd0] sm:$0xff]  }
   0xe   : > { %s700_s30 = sshll.u32 %s921_s13, 4  ;;  %v697_v49 = vld [vmem:[%s918_s2] ss:$0 sm:$0xff]  ;;  %s624_s24 = sshll.u32 %s921_s13, 2 }
   0xf   : > { %284 = vmatpush1.bf16.msra.mxu0 %v714_v5  ;;  %387 = vmatpush1.bf16.msra.mxu1 %v715_v6  ;;  %s828_s10 = scalar_lea.vmem %s916_s0, %s700_s30  ;;  %s168_s27 = scalar_lea.vmem %s919_s3, %s624_s24 }
  0x10   : > { %285 = vmatprep.subr.bf16.mxu0 %v753_v1  ;;  %388 = vmatprep.subr.bf16.mxu1 %v753_v1  ;;  %v170_v12 = vld [vmem:[%s828_s10] sm:$0xff] }
  0x11   : > { %v730_v14 = vld [vmem:[%s828_s10 + $0x4] ss:$8 sps:$4 sm:$0x1e]   ;;  %v656_v15 = vcombine.high %v170_v12, %v170_v12  ;;  %v728_v21 = vld [vmem:[%s828_s10] ss:$8 sps:$4 sm:$0x1e]   ;;  %v655_v26 = vcombine.low %v170_v12, %v170_v12 }
  0x12   : > { %v219_v16 = vrot.slane %v730_v14, 1  ;;  %v742_v24 = vld [vmem:[%s828_s10 + $0x4] ss:$8 sps:$4 sm:$0x3c]   ;;  %v218_v25 = vrot.slane %v728_v21, 1 }
  0x13   : > { %286 = vmatpush1.bf16.msra.mxu0 %v716_v7  ;;  %389 = vmatpush1.bf16.msra.mxu1 %v717_v8  ;;  %v452_v28 = vrot.slane %v742_v24, 2  ;;  %v744_v36 = vld [vmem:[%s828_s10] ss:$8 sps:$4 sm:$0x3c]  }
  0x14   : > { %287 = vmatprep.subr.bf16.mxu0 %v753_v1  ;;  %390 = vmatprep.subr.bf16.mxu1 %v753_v1  ;;  %v451_v38 = vrot.slane %v744_v36, 2 }
  0x15   : > { %666 = vmatprep.mubr.msk.bf16.mxu1 %vm275_vm0, %v656_v15  ;;  %654 = vmatprep.mubr.msk.bf16.mxu0 %vm275_vm0, %v219_v16 }
  0x17   : > { %288 = vmatpush1.bf16.msra.mxu0 %v718_v9  ;;  %391 = vmatpush1.bf16.msra.mxu1 %v719_v10 }
  0x18   : > { %289 = vmatprep.subr.bf16.mxu0 %v753_v1  ;;  %392 = vmatprep.subr.bf16.mxu1 %v753_v1 }
  0x1b   : > { %290 = vmatpush1.bf16.msra.mxu0 %v720_v11  ;;  %393 = vmatpush1.bf16.msra.mxu1 %v721_v13 }
  0x1c   : > { %291 = vmatprep.subr.bf16.mxu0 %v753_v1  ;;  %394 = vmatprep.subr.bf16.mxu1 %v753_v1 }
  0x1f   : > { %292 = vmatpush1.bf16.msra.mxu0 %v722_v17  ;;  %395 = vmatpush1.bf16.msra.mxu1 %v723_v18 }
  0x20   : > { %293 = vmatprep.subr.bf16.mxu0 %v753_v1  ;;  %396 = vmatprep.subr.bf16.mxu1 %v753_v1 }
  0x23   : > { %294 = vmatpush1.bf16.msra.mxu0 %v724_v19  ;;  %397 = vmatpush1.bf16.msra.mxu1 %v725_v20 }
  0x24   : > { %295 = vmatprep.subr.bf16.mxu0 %v753_v1  ;;  %398 = vmatprep.subr.bf16.mxu1 %v753_v1 }
  0x27   : > { %296 = vmatpush1.bf16.msra.mxu0 %v726_v22  ;;  %399 = vmatpush1.bf16.msra.mxu1 %v727_v23 }
  0x28   : > { %511 = vmatprep.subr.bf16.mxu0 %v753_v1 }
  0x2a   : > { %312 = vmatmul.mubr.bf16.vlgmr.msra.gmra.mrb[0].mxu0 %v218_v25  ;;  %415 = vmatmul.mubr.bf16.vlgmr.msra.gmra.mrb[0].mxu1 %v655_v26 }
  0x2b   : > { %512 = vmatpush1.bf16.msra.mxu0 %v733_v27  ;;  %696 = vmatprep.mubr.msk.bf16.mxu0 %vm275_vm0, %v452_v28 }
  0x2c   : > { %513 = vmatprep.subr.bf16.mxu0 %v753_v1 }
  0x2f   : > { %514 = vmatpush1.bf16.msra.mxu0 %v734_v29 }
  0x30   : > { %515 = vmatprep.subr.bf16.mxu0 %v753_v1 }
  0x33   : > { %516 = vmatpush1.bf16.msra.mxu0 %v735_v30 }
  0x34   : > { %517 = vmatprep.subr.bf16.mxu0 %v753_v1 }
  0x37   : > { %518 = vmatpush1.bf16.msra.mxu0 %v736_v31 }
  0x38   : > { %519 = vmatprep.subr.bf16.mxu0 %v753_v1 }
  0x3b   : > { %520 = vmatpush1.bf16.msra.mxu0 %v737_v32 }
  0x3c   : > { %521 = vmatprep.subr.bf16.mxu0 %v753_v1 }
  0x3f   : > { %522 = vmatpush1.bf16.msra.mxu0 %v738_v33 }
  0x40   : > { %523 = vmatprep.subr.bf16.mxu0 %v753_v1 }
  0x43   : > { %524 = vmatpush1.bf16.msra.mxu0 %v739_v34 }
  0x44   : > { %525 = vmatprep.subr.bf16.mxu0 %v753_v1 }
  0x47   : > { %526 = vmatpush1.bf16.msra.mxu0 %v740_v35 }
  0x48   : > { %527 = vmatprep.subr.bf16.mxu0 %v753_v1 }
  0x4b   : > { %528 = vmatpush1.bf16.msra.mxu0 %v741_v37 }
  0x4e   : > { %544 = vmatmul.mubr.bf16.vlgmr.msra.gmra.mrb[4].mxu0 %v451_v38 }
  0xfd   : > { %v313_v39 = vpop.f32.mrb[0].mxu0  ;;  %v416_v41 = vpop.f32.mrb[0].mxu1 }
  0xfe   : > { %v315_v40 = vpop.f32.mrb[1].mxu0  ;;  %v417_v42 = vadd.f32 %v416_v41, %v313_v39  ;;  %v418_v44 = vpop.f32.mrb[1].mxu1 }
  0xff   : > { %v316_v43 = vpop.f32.mrb[2].mxu0  ;;  %v419_v46 = vpop.f32.mrb[2].mxu1 }
 0x100   : > { %v317_v45 = vpop.f32.mrb[3].mxu0  ;;  %v420_v47 = vpop.f32.mrb[3].mxu1 }
 0x121   : > { %v545_v48 = vpop.f32.mrb[4].mxu0 }
 0x122   : > { %v551_v50 = vadd.f32 %v545_v48, %v417_v42  ;;  %v547_v51 = vpop.f32.mrb[5].mxu0 }
 0x123   : > { %v548_v52 = vpop.f32.mrb[6].mxu0 }
 0x124   : > { %v559_v53 = vadd.f32 %v697_v49, %v551_v50  ;;  %v549_v54 = vpop.f32.mrb[7].mxu0 }
 0x126   : > { %v560_v55 = vmax.f32 %v559_v53, 0.0 }
 0x128   : > { %v561_v56 = vpack.c.bf16 %v560_v55, %v560_v55 }
 0x12a   : > { %563 = vst.msk [vmem:[%s168_s27] sm:$0xf] %vm562_vm1, %v561_v56 }
 0x12b PF: > { %s13_s12 = sadd.s32 1, %s751_s12  }
 0x12c   : > { %p10_p4 = scmp.ge.s32.totalorder %s13_s12, 4  }
 0x12e   :  { %12 = sbr.rel (!%p10_p4) target bundleno = 1 (0x1), region = 64 }

// kernel: tile.76
= control target key start
LH: loop header
LB: loop body
LE: loop exit
PB: predicated region body
PF: predicated region fallthrough
CT: control target
= control target key end

     0   :  { %s22_s0 = inlined_call_operand.vmem [shape: f32[12], index: 0, kind: input, shape index: {}]   ;;  %s23_s1 = inlined_call_operand.vmem [shape: f32[4,12], index: 1, kind: output, shape index: {}]  }
   0x1   :  { %v4_v0 = vld [vmem:[%s22_s0] ss:$0 sm:$0xff] }
   0x2   :  { %5 = vst [vmem:[%s23_s1] sm:$0xf] %v4_v0 }

// kernel: tile.77
= control target key start
LH: loop header
LB: loop body
LE: loop exit
PB: predicated region body
PF: predicated region fallthrough
CT: control target
= control target key end

     0   :  { %vm7_vm0 = vcmask 97280   ;;  %s37_s8 = smov 12   ;;  %s38_s9 = smov 24   ;;  %vm13_vm1 = vcmask 392480   ;;  %vm19_vm2 = vcmask 294080   ;;  %vm25_vm3 = vcmask 195680   ;;  %s55_s0 = inlined_call_operand.vmem [shape: f32[4,12], index: 0, kind: input, shape index: {}]   ;;  %s56_s1 = inlined_call_operand.vmem [shape: f32[1,48], index: 1, kind: output, shape index: {}]  }
   0x1   :  { %v4_v0 = vld [vmem:[%s55_s0] sm:$0xf]  ;;  %s36_s0 = smov 36  }
   0x2   :  { %5 = vst [vmem:[#allocation1] sm:$0xf] %v4_v0 }
   0x9   :  { %v10_v1 = vld [vmem:[#allocation1 + $0x3] sm:$0x1]   ;;  %v22_v2 = vld [vmem:[#allocation1 + $0x1] sm:$0x1]   ;;  %v6_v3 = vld [vmem:[#allocation1] sm:$0x1]  }
   0xa   :  { %11 = vrot.lane.b32.xlu0 %v10_v1, %s36_s0  ;;  %23 = vrot.lane.b32.xlu1 %v22_v2, %s37_s8  ;;  %v16_v4 = vld [vmem:[#allocation1 + $0x2] sm:$0x1]   ;;  %8 = vst.msk [vmem:[#allocation0] sm:$0x1] %vm7_vm0, %v6_v3  }
   0xe   :  { %17 = vrot.lane.b32.xlu0 %v16_v4, %s38_s9 }
  0x7c   :  { %v12_v5 = vpop.permute.xlu0 %11   ;;  %v24_v6 = vpop.permute.xlu1 %23  }
  0x7d   :  { %14 = vst.msk [vmem:[#allocation0] sm:$0x1] %vm13_vm1, %v12_v5  }
  0x80   :  { %v18_v7 = vpop.permute.xlu0 %17  }
  0x81   :  { %20 = vst.msk [vmem:[#allocation0] sm:$0x1] %vm19_vm2, %v18_v7  }
  0x82   :  { %26 = vst.msk [vmem:[#allocation0] sm:$0x1] %vm25_vm3, %v24_v6  }
  0x89   :  { %v30_v8 = vld [vmem:[#allocation0] sm:$0x1] }
  0x8a   :  { %32 = vst [vmem:[%s56_s1] sm:$0x1] %v30_v8 }

// kernel: nusunit7s_forward.18
= control target key start
LH: loop header
LB: loop body
LE: loop exit
PB: predicated region body
PF: predicated region fallthrough
CT: control target
= control target key end

     0   :  { %s847_s12 = smov 0   ;;  %s1015_s0 = inlined_call_operand.vmem [shape: bf16[2,14,168], index: 0, kind: input, shape index: {}]   ;;  %s1016_s1 = inlined_call_operand.vmem [shape: bf16[3,168,48], index: 1, kind: input, shape index: {}]   ;;  %s1017_s2 = inlined_call_operand.vmem [shape: f32[1,48], index: 2, kind: input, shape index: {}]   ;;  %s1018_s3 = inlined_call_operand.vmem [shape: bf16[2,4,48], index: 3, kind: output, shape index: {}]  }
   0x1 LB: > { %s673_s13 = sadd.s32 4294967295, %s824_s12   ;;  %p677_p0 = scmp.ge.s32.totalorder %s824_s12, 1  ;;  %s824_s12 = sphi %s847_s12, %s13_s12  }
   0x2   : > { %p137_p1 = scmp.lt.s32.totalorder %s824_s12, 3 }
   0x4   : > { %p138_p2 = pnand %p677_p0, %p137_p1 }
   0x5   : > { %v778_v0 = vld [vmem:[%s1016_s1 + $0x54] sm:$0xff] (!%p138_p2)   ;;  %v826_v1 = vmov (!%p138_p2), 0   ;;  %v779_v2 = vld [vmem:[%s1016_s1] sm:$0xff] (!%p138_p2)   ;;  %v781_v4 = vld [vmem:[%s1016_s1 + $0x8] sm:$0xff] (!%p138_p2)   ;;  %p160_p3 = scmp.lt.s32.totalorder (!%p138_p2), %s673_s13, 1  ;;  %vm304_vm0 = vcmask (!%p138_p2), 326656  }
   0x6   : > { %141 = sbr.rel (%p138_p2) target bundleno = 315 (0x13b), region = 32  ;;  %312 = vmatprep.subr.bf16.mxu0 (!%p138_p2), %v826_v1  ;;  %427 = vmatprep.subr.bf16.mxu1 (!%p138_p2), %v826_v1  ;;  %v780_v3 = vld [vmem:[%s1016_s1 + $0x5c] sm:$0xff] (!%p138_p2)   ;;  %v782_v5 = vld [vmem:[%s1016_s1 + $0x64] sm:$0xff] (!%p138_p2)   ;;  %v783_v6 = vld [vmem:[%s1016_s1 + $0x10] sm:$0xff] (!%p138_p2)   ;;  %vm308_vm1 = vcmask (!%p138_p2), 1043456   ;;  %vm618_vm2 = vcmask (!%p138_p2), 386048  }
   0x7   : > { %313 = vmatpush1.bf16.msra.mxu0 (!%p138_p2), %v778_v0  ;;  %428 = vmatpush1.bf16.msra.mxu1 (!%p138_p2), %v779_v2  ;;  %v784_v7 = vld [vmem:[%s1016_s1 + $0x6c] sm:$0xff] (!%p138_p2)   ;;  %v785_v8 = vld [vmem:[%s1016_s1 + $0x18] sm:$0xff] (!%p138_p2)   ;;  %v787_v10 = vld [vmem:[%s1016_s1 + $0x20] sm:$0xff] (!%p138_p2)  }
   0x8   : > { %314 = vmatprep.subr.bf16.mxu0 (!%p138_p2), %v826_v1  ;;  %429 = vmatprep.subr.bf16.mxu1 (!%p138_p2), %v826_v1  ;;  %v786_v9 = vld [vmem:[%s1016_s1 + $0x74] sm:$0xff] (!%p138_p2)   ;;  %v788_v11 = vld [vmem:[%s1016_s1 + $0x7c] sm:$0xff] (!%p138_p2)   ;;  %v789_v12 = vld [vmem:[%s1016_s1 + $0x28] sm:$0xff] (!%p138_p2)  }
   0x9   : > { %v790_v13 = vld [vmem:[%s1016_s1 + $0x84] sm:$0xff] (!%p138_p2)   ;;  %v791_v15 = vld [vmem:[%s1016_s1 + $0x30] sm:$0xff] (!%p138_p2)   ;;  %v793_v21 = vld [vmem:[%s1016_s1 + $0x38] sm:$0xff] (!%p138_p2)  }
   0xa   : > { %v792_v20 = vld [vmem:[%s1016_s1 + $0x8c] sm:$0xff] (!%p138_p2)   ;;  %v794_v26 = vld [vmem:[%s1016_s1 + $0x94] sm:$0xff] (!%p138_p2)   ;;  %v795_v27 = vld [vmem:[%s1016_s1 + $0x40] sm:$0xff] (!%p138_p2)  }
   0xb   : > { %315 = vmatpush1.bf16.msra.mxu0 (!%p138_p2), %v780_v3  ;;  %430 = vmatpush1.bf16.msra.mxu1 (!%p138_p2), %v781_v4  ;;  %v796_v30 = vld [vmem:[%s1016_s1 + $0x9c] sm:$0xff] (!%p138_p2)   ;;  %v797_v31 = vld [vmem:[%s1016_s1 + $0x48] sm:$0xff] (!%p138_p2)   ;;  %v798_v32 = vld [vmem:[%s1016_s1 + $0xa4] ss:$0 sps:$4 sm:$0xff] (!%p138_p2)  }
   0xc   : > { %316 = vmatprep.subr.bf16.mxu0 (!%p138_p2), %v826_v1  ;;  %431 = vmatprep.subr.bf16.mxu1 (!%p138_p2), %v826_v1  ;;  %v799_v33 = vld [vmem:[%s1016_s1 + $0x50] ss:$0 sps:$4 sm:$0xff] (!%p138_p2)   ;;  %v310_v37 = vsel (!%p138_p2), %vm308_vm1, %v798_v32, 0  ;;  %v805_v42 = vld [vmem:[%s1016_s1 + $0xa8] sm:$0xff] (!%p138_p2)   ;;  %v807_v45 = vld [vmem:[%s1016_s1 + $0xb8] sm:$0xff] (!%p138_p2)  }
   0xd   : > { %s1020_s13 = smov (!%p160_p3, %s673_s13), 1  ;;  %v425_v39 = vsel %vm308_vm1, %v799_v33, 0  ;;  %v806_v44 = vld [vmem:[%s1016_s1 + $0xb0] sm:$0xff]   ;;  %v808_v46 = vld [vmem:[%s1016_s1 + $0xc0] sm:$0xff]   ;;  %v809_v47 = vld [vmem:[%s1016_s1 + $0xc8] sm:$0xff]  }
   0xe   : > { %s768_s7 = sshll.u32 %s1020_s13, 4  ;;  %v810_v48 = vld [vmem:[%s1016_s1 + $0xd0] sm:$0xff]   ;;  %v811_v49 = vld [vmem:[%s1016_s1 + $0xd8] sm:$0xff]   ;;  %v812_v50 = vld [vmem:[%s1016_s1 + $0xe0] sm:$0xff]   ;;  %s680_s9 = sshll.u32 %s1020_s13, 1 }
   0xf   : > { %317 = vmatpush1.bf16.msra.mxu0 %v782_v5  ;;  %432 = vmatpush1.bf16.msra.mxu1 %v783_v6  ;;  %s909_s16 = scalar_lea.vmem %s1015_s0, %s768_s7  ;;  %v813_v51 = vld [vmem:[%s1016_s1 + $0xe8] sm:$0xff]   ;;  %v814_v52 = vld [vmem:[%s1016_s1 + $0xf0] sm:$0xff]   ;;  %v815_v53 = vld [vmem:[%s1016_s1 + $0xf8] ss:$0 sps:$4 sm:$0xff]   ;;  %s168_s14 = scalar_lea.vmem %s1018_s3, %s680_s9 }
  0x10   : > { %318 = vmatprep.subr.bf16.mxu0 %v826_v1  ;;  %433 = vmatprep.subr.bf16.mxu1 %v826_v1  ;;  %v170_v14 = vld [vmem:[%s909_s16] sm:$0x33]  ;;  %v802_v16 = vld [vmem:[%s909_s16 + $0x4] ss:$8 sps:$4 sm:$0x1c]   ;;  %v565_v55 = vsel %vm308_vm1, %v815_v53, 0 }
  0x11   : > { %v717_v17 = vcombine.high %v170_v14, %v170_v14  ;;  %v233_v18 = vshrl.u32 %v802_v16, 16  ;;  %v236_v19 = vshll.u32 %v802_v16, 16  ;;  %v800_v22 = vld [vmem:[%s909_s16] ss:$8 sps:$4 sm:$0x1c]   ;;  %v716_v41 = vcombine.low %v170_v14, %v170_v14 }
  0x12   : > { %v225_v28 = vshrl.u32 %v800_v22, 16  ;;  %v228_v29 = vshll.u32 %v800_v22, 16  ;;  %v467_v34 = vld [vmem:[%s909_s16 + $0x8] sm:$0x66] }
  0x13   : > { %319 = vmatpush1.bf16.msra.mxu0 %v784_v7  ;;  %434 = vmatpush1.bf16.msra.mxu1 %v785_v8  ;;  %v235_v23 = vrot.slane %v233_v18, 2  ;;  %v238_v24 = vrot.slane %v236_v19, 3  ;;  %v752_v38 = vcombine.high %v467_v34, %v467_v34  ;;  %v751_v54 = vcombine.low %v467_v34, %v467_v34 }
  0x14   : > { %320 = vmatprep.subr.bf16.mxu0 %v826_v1  ;;  %435 = vmatprep.subr.bf16.mxu1 %v826_v1  ;;  %v227_v35 = vrot.slane %v225_v28, 2  ;;  %v230_v36 = vrot.slane %v228_v29, 3 }
  0x15   : > { %729 = vmatprep.mubr.msk.bf16.mxu1 %vm304_vm0, %v717_v17  ;;  %v239_v25 = vor.u32 %v238_v24, %v235_v23  ;;  %v496_v43 = vrot.slane %v752_v38, 1  ;;  %v495_v56 = vrot.slane %v751_v54, 1 }
  0x16   : > { %v231_v40 = vor.u32 %v230_v36, %v227_v35 }
  0x17   : > { %321 = vmatpush1.bf16.msra.mxu0 %v786_v9  ;;  %436 = vmatpush1.bf16.msra.mxu1 %v787_v10 }
  0x18   : > { %322 = vmatprep.subr.bf16.mxu0 %v826_v1  ;;  %437 = vmatprep.subr.bf16.mxu1 %v826_v1 }
  0x19   : > { %715 = vmatprep.mubr.msk.bf16.mxu0 %vm304_vm0, %v239_v25 }
  0x1b   : > { %323 = vmatpush1.bf16.msra.mxu0 %v788_v11  ;;  %438 = vmatpush1.bf16.msra.mxu1 %v789_v12 }
  0x1c   : > { %324 = vmatprep.subr.bf16.mxu0 %v826_v1  ;;  %439 = vmatprep.subr.bf16.mxu1 %v826_v1 }
  0x1f   : > { %325 = vmatpush1.bf16.msra.mxu0 %v790_v13  ;;  %440 = vmatpush1.bf16.msra.mxu1 %v791_v15 }
  0x20   : > { %326 = vmatprep.subr.bf16.mxu0 %v826_v1  ;;  %441 = vmatprep.subr.bf16.mxu1 %v826_v1 }
  0x23   : > { %327 = vmatpush1.bf16.msra.mxu0 %v792_v20  ;;  %442 = vmatpush1.bf16.msra.mxu1 %v793_v21 }
  0x24   : > { %328 = vmatprep.subr.bf16.mxu0 %v826_v1  ;;  %443 = vmatprep.subr.bf16.mxu1 %v826_v1 }
  0x27   : > { %329 = vmatpush1.bf16.msra.mxu0 %v794_v26  ;;  %444 = vmatpush1.bf16.msra.mxu1 %v795_v27 }
  0x28   : > { %330 = vmatprep.subr.bf16.mxu0 %v826_v1  ;;  %445 = vmatprep.subr.bf16.mxu1 %v826_v1 }
  0x2b   : > { %331 = vmatpush1.bf16.msra.mxu0 %v796_v30  ;;  %446 = vmatpush1.bf16.msra.mxu1 %v797_v31 }
  0x2c   : > { %332 = vmatprep.subr.bf16.mxu0 %v826_v1  ;;  %447 = vmatprep.subr.bf16.mxu1 %v826_v1 }
  0x2f   : > { %333 = vmatpush1.bf16.msra.mxu0 %v310_v37  ;;  %448 = vmatpush1.bf16.msra.mxu1 %v425_v39 }
  0x30   : > { %567 = vmatprep.subr.bf16.mxu0 %v826_v1 }
  0x32   : > { %345 = vmatmul.mubr.bf16.vlgmr.msra.gmra.mrb[0].mxu0 %v231_v40  ;;  %460 = vmatmul.mubr.bf16.vlgmr.msra.gmra.mrb[0].mxu1 %v716_v41 }
  0x33   : > { %568 = vmatpush1.bf16.msra.mxu0 %v805_v42  ;;  %764 = vmatprep.mubr.msk.bf16.mxu0 %vm304_vm0, %v496_v43 }
  0x34   : > { %569 = vmatprep.subr.bf16.mxu0 %v826_v1 }
  0x37   : > { %570 = vmatpush1.bf16.msra.mxu0 %v806_v44 }
  0x38   : > { %571 = vmatprep.subr.bf16.mxu0 %v826_v1 }
  0x3b   : > { %572 = vmatpush1.bf16.msra.mxu0 %v807_v45 }
  0x3c   : > { %573 = vmatprep.subr.bf16.mxu0 %v826_v1 }
  0x3f   : > { %574 = vmatpush1.bf16.msra.mxu0 %v808_v46 }
  0x40   : > { %575 = vmatprep.subr.bf16.mxu0 %v826_v1 }
  0x43   : > { %576 = vmatpush1.bf16.msra.mxu0 %v809_v47 }
  0x44   : > { %577 = vmatprep.subr.bf16.mxu0 %v826_v1 }
  0x47   : > { %578 = vmatpush1.bf16.msra.mxu0 %v810_v48 }
  0x48   : > { %579 = vmatprep.subr.bf16.mxu0 %v826_v1 }
  0x4b   : > { %580 = vmatpush1.bf16.msra.mxu0 %v811_v49 }
  0x4c   : > { %581 = vmatprep.subr.bf16.mxu0 %v826_v1 }
  0x4f   : > { %582 = vmatpush1.bf16.msra.mxu0 %v812_v50 }
  0x50   : > { %583 = vmatprep.subr.bf16.mxu0 %v826_v1 }
  0x53   : > { %584 = vmatpush1.bf16.msra.mxu0 %v813_v51 }
  0x54   : > { %585 = vmatprep.subr.bf16.mxu0 %v826_v1 }
  0x57   : > { %586 = vmatpush1.bf16.msra.mxu0 %v814_v52 }
  0x58   : > { %587 = vmatprep.subr.bf16.mxu0 %v826_v1  ;;  %v765_v1 = vld [vmem:[%s1017_s2] ss:$0 sm:$0xff] }
  0x5b   : > { %588 = vmatpush1.bf16.msra.mxu0 %v565_v55 }
  0x5e   : > { %600 = vmatmul.mubr.bf16.vlgmr.msra.gmra.mrb[4].mxu0 %v495_v56 }
 0x105   : > { %v346_v57 = vpop.f32.mrb[0].mxu0  ;;  %v461_v59 = vpop.f32.mrb[0].mxu1 }
 0x106   : > { %v348_v58 = vpop.f32.mrb[1].mxu0  ;;  %v462_v60 = vadd.f32 %v461_v59, %v346_v57  ;;  %v463_v62 = vpop.f32.mrb[1].mxu1 }
 0x107   : > { %v349_v61 = vpop.f32.mrb[2].mxu0  ;;  %v464_v0 = vpop.f32.mrb[2].mxu1 }
 0x108   : > { %v350_v63 = vpop.f32.mrb[3].mxu0  ;;  %v465_v2 = vpop.f32.mrb[3].mxu1 }
 0x131   : > { %v601_v3 = vpop.f32.mrb[4].mxu0 }
 0x132   : > { %v607_v4 = vadd.f32 %v601_v3, %v462_v60  ;;  %v603_v5 = vpop.f32.mrb[5].mxu0 }
 0x133   : > { %v604_v6 = vpop.f32.mrb[6].mxu0 }
 0x134   : > { %v615_v7 = vadd.f32 %v765_v1, %v607_v4  ;;  %v605_v8 = vpop.f32.mrb[7].mxu0 }
 0x136   : > { %v616_v9 = vmax.f32 %v615_v7, 0.0 }
 0x138   : > { %v617_v10 = vpack.c.bf16 %v616_v9, %v616_v9 }
 0x13a   : > { %619 = vst.msk [vmem:[%s168_s14] sm:$0x3] %vm618_vm2, %v617_v10 }
 0x13b PF: > { %s13_s12 = sadd.s32 1, %s824_s12  }
 0x13c   : > { %p10_p4 = scmp.ge.s32.totalorder %s13_s12, 4  }
 0x13e   :  { %12 = sbr.rel (!%p10_p4) target bundleno = 1 (0x1), region = 64 }

// kernel: tile.81
= control target key start
LH: loop header
LB: loop body
LE: loop exit
PB: predicated region body
PF: predicated region fallthrough
CT: control target
= control target key end

     0   :  { %s22_s0 = inlined_call_operand.vmem [shape: f32[12], index: 0, kind: input, shape index: {}]   ;;  %s23_s1 = inlined_call_operand.vmem [shape: f32[2,12], index: 1, kind: output, shape index: {}]  }
   0x1   :  { %v4_v0 = vld [vmem:[%s22_s0] ss:$0 sm:$0xff] }
   0x2   :  { %5 = vst [vmem:[%s23_s1] sm:$0x3] %v4_v0 }

// kernel: tile.82
= control target key start
LH: loop header
LB: loop body
LE: loop exit
PB: predicated region body
PF: predicated region fallthrough
CT: control target
= control target key end

     0   :  { %vm7_vm0 = vcmask 97280   ;;  %vm13_vm1 = vcmask 195680   ;;  %s39_s0 = inlined_call_operand.vmem [shape: f32[2,12], index: 0, kind: input, shape index: {}]   ;;  %s40_s1 = inlined_call_operand.vmem [shape: f32[1,24], index: 1, kind: output, shape index: {}]  }
   0x1   :  { %v4_v0 = vld [vmem:[%s39_s0] sm:$0x3]  ;;  %s22_s0 = smov 12  }
   0x2   :  { %5 = vst [vmem:[#allocation1] sm:$0x3] %v4_v0 }
   0x9   :  { %v10_v1 = vld [vmem:[#allocation1 + $0x1] sm:$0x1]   ;;  %v6_v2 = vld [vmem:[#allocation1] sm:$0x1]  }
   0xa   :  { %11 = vrot.lane.b32.xlu0 %v10_v1, %s22_s0  ;;  %8 = vst.msk [vmem:[#allocation0] sm:$0x1] %vm7_vm0, %v6_v2  }
  0x7c   :  { %v12_v3 = vpop.permute.xlu0 %11  }
  0x7d   :  { %14 = vst.msk [vmem:[#allocation0] sm:$0x1] %vm13_vm1, %v12_v3  }
  0x84   :  { %v18_v4 = vld [vmem:[#allocation0] sm:$0x1] }
  0x85   :  { %20 = vst [vmem:[%s40_s1] sm:$0x1] %v18_v4 }

// kernel: nusunit7s_forward.19
= control target key start
LH: loop header
LB: loop body
LE: loop exit
PB: predicated region body
PF: predicated region fallthrough
CT: control target
= control target key end

     0   :  { %s582_s12 = smov 0   ;;  %s639_s0 = inlined_call_operand.vmem [shape: bf16[2,4,48], index: 0, kind: input, shape index: {}]   ;;  %s640_s1 = inlined_call_operand.vmem [shape: bf16[3,48,24], index: 1, kind: input, shape index: {}]   ;;  %s641_s2 = inlined_call_operand.vmem [shape: f32[1,24], index: 2, kind: input, shape index: {}]   ;;  %s642_s3 = inlined_call_operand.vmem [shape: bf16[2,2,24], index: 3, kind: output, shape index: {}]  }
   0x1 LB: > { %s456_s13 = sadd.s32 4294967295, %s558_s12   ;;  %p460_p0 = scmp.ge.s32.totalorder %s558_s12, 1  ;;  %s558_s12 = sphi %s582_s12, %s13_s12  }
   0x2   : > { %p136_p1 = scmp.lt.s32.totalorder %s558_s12, 3 }
   0x4   : > { %p137_p2 = pnand %p460_p0, %p136_p1 }
   0x5   : > { %v543_v0 = vld [vmem:[%s640_s1 + $0x18] sm:$0xff] (!%p137_p2)   ;;  %v560_v1 = vmov (!%p137_p2), 0.0   ;;  %v544_v2 = vld [vmem:[%s640_s1] sm:$0xff] (!%p137_p2)   ;;  %vm561_vm0 = vmmov (!%p137_p2), 0   ;;  %p157_p3 = scmp.lt.s32.totalorder (!%p137_p2), %s456_s13, 1  ;;  %v546_v4 = vld [vmem:[%s640_s1 + $0x8] sm:$0xff] (!%p137_p2)  }
   0x6   : > { %140 = sbr.rel (%p137_p2) target bundleno = 256 (0x100), region = 32  ;;  %503 = vmatprep.subr.bf16.mxu0 (!%p137_p2), %v560_v1  ;;  %513 = vmatprep.subr.bf16.mxu1 (!%p137_p2), %v560_v1  ;;  %v545_v3 = vld [vmem:[%s640_s1 + $0x20] sm:$0xff] (!%p137_p2)   ;;  %v547_v5 = vld [vmem:[%s640_s1 + $0x28] sm:$0xff] (!%p137_p2)   ;;  %v548_v6 = vld [vmem:[%s640_s1 + $0x10] sm:$0xff] (!%p137_p2)   ;;  %vm213_vm1 = vcmask (!%p137_p2), 392192   ;;  %vm407_vm2 = vcmask (!%p137_p2), 188416  }
   0x7   : > { %504 = vmatpush3.bf16.msra.mxu0 (!%p137_p2), %v543_v0  ;;  %509 = vmatprep.mubr.msk.bf16.mxu0 (!%p137_p2), %vm561_vm0, %v560_v1  ;;  %v549_v12 = vld [vmem:[%s640_s1 + $0x30] sm:$0xff] (!%p137_p2)   ;;  %v550_v14 = vld [vmem:[%s640_s1 + $0x38] sm:$0xff] (!%p137_p2)   ;;  %v551_v15 = vld [vmem:[%s640_s1 + $0x40] sm:$0xff] (!%p137_p2)  }
   0x8   : > { %514 = vmatpush3.bf16.msra.mxu1 (!%p137_p2), %v544_v2  ;;  %505 = vmatprep.subr.bf16.mxu0 (!%p137_p2), %v560_v1  ;;  %v488_v28 = vld [vmem:[%s641_s2] ss:$0 sm:$0xff] (!%p137_p2) }
   0x9   : > { %515 = vmatprep.subr.bf16.mxu1 (!%p137_p2), %v560_v1  ;;  %519 = vmatprep.mubr.msk.bf16.mxu1 (!%p137_p2), %vm561_vm0, %v560_v1 }
   0xb   : > { %506 = vmatpush3.bf16.msra.mxu0 (!%p137_p2), %v545_v3 }
   0xc   : > { %516 = vmatpush3.bf16.msra.mxu1 (!%p137_p2), %v546_v4  ;;  %507 = vmatprep.subr.bf16.mxu0 (!%p137_p2), %v560_v1 }
   0xd   : > { %s644_s13 = smov (!%p157_p3, %s456_s13), 1  ;;  %517 = vmatprep.subr.bf16.mxu1 %v560_v1 }
   0xe   : > { %s461_s24 = sshll.u32 %s644_s13, 1  ;;  %s163_s15 = scalar_lea.vmem %s642_s3, %s644_s13 }
   0xf   : > { %s160_s29 = scalar_lea.vmem %s639_s0, %s461_s24  ;;  %508 = vmatpush3.bf16.msra.mxu0 %v547_v5 }
  0x10   : > { %v468_v7 = vld.sshfl [vmem:[%s160_s29] sm:$0x3 pattern:$0x76325410]  ;;  %518 = vmatpush3.bf16.msra.mxu1 %v548_v6  ;;  %523 = vmatprep.subr.bf16.mxu0 %v560_v1 }
  0x11   : > { %v189_v8 = vshrl.u32 %v468_v7, 16  ;;  %v191_v9 = vshll.u32 %v468_v7, 16  ;;  %v165_v11 = vld [vmem:[%s160_s29] sm:$0x1] }
  0x12   : > { %v483_v16 = vld.sshfl [vmem:[%s160_s29] sm:$0x2 pattern:$0x76325410] }
  0x13   : > { %v193_v10 = vrot.slane %v191_v9, 1  ;;  %520 = vmatmul.mubr.msk.bf16.vlgmr.msra.gmra.mrb[0].mxu1 %vm213_vm1, %v165_v11  ;;  %v334_v17 = vrot.slane %v483_v16, 1 }
  0x15   : > { %v194_v13 = vor.u32 %v193_v10, %v189_v8 }
  0x17   : > { %510 = vmatmul.mubr.msk.bf16.vlgmr.msra.gmra.mrb[0].mxu0 %vm213_vm1, %v194_v13 }
  0x18   : > { %524 = vmatpush3.bf16.msra.mxu0 %v549_v12  ;;  %529 = vmatprep.mubr.msk.bf16.mxu0 %vm561_vm0, %v560_v1 }
  0x19   : > { %525 = vmatprep.subr.bf16.mxu0 %v560_v1 }
  0x1c   : > { %526 = vmatpush3.bf16.msra.mxu0 %v550_v14 }
  0x1d   : > { %527 = vmatprep.subr.bf16.mxu0 %v560_v1 }
  0x20   : > { %528 = vmatpush3.bf16.msra.mxu0 %v551_v15 }
  0x23   : > { %530 = vmatmul.mubr.msk.bf16.vlgmr.msra.gmra.mrb[4].mxu0 %vm213_vm1, %v334_v17 }
  0xe6   : > { %v312_v18 = vpop.f32.mrb[0].mxu1 }
  0xe7   : > { %v521_v20 = vpop.f32.mrb[1].mxu1 }
  0xe8   : > { %v315_v23 = vpop.f32.mrb[2].mxu1 }
  0xe9   : > { %v522_v25 = vpop.f32.mrb[3].mxu1 }
  0xea   : > { %v251_v19 = vpop.f32.mrb[0].mxu0 }
  0xeb   : > { %v511_v21 = vpop.f32.mrb[1].mxu0  ;;  %v313_v22 = vadd.f32 %v312_v18, %v251_v19 }
  0xec   : > { %v254_v24 = vpop.f32.mrb[2].mxu0 }
  0xed   : > { %v512_v26 = vpop.f32.mrb[3].mxu0 }
  0xf6   : > { %v390_v27 = vpop.f32.mrb[4].mxu0 }
  0xf7   : > { %v396_v29 = vadd.f32 %v390_v27, %v313_v22  ;;  %v531_v30 = vpop.f32.mrb[5].mxu0 }
  0xf8   : > { %v393_v31 = vpop.f32.mrb[6].mxu0 }
  0xf9   : > { %v404_v32 = vadd.f32 %v488_v28, %v396_v29  ;;  %v532_v33 = vpop.f32.mrb[7].mxu0 }
  0xfb   : > { %v405_v34 = vmax.f32 %v404_v32, 0.0 }
  0xfd   : > { %v406_v35 = vpack.c.bf16 %v405_v34, %v405_v34 }
  0xff   : > { %408 = vst.msk [vmem:[%s163_s15] sm:$0x1] %vm407_vm2, %v406_v35 }
 0x100 PF: > { %s13_s12 = sadd.s32 1, %s558_s12  }
 0x101   : > { %p10_p4 = scmp.ge.s32.totalorder %s13_s12, 4  }
 0x103   :  { %12 = sbr.rel (!%p10_p4) target bundleno = 1 (0x1), region = 64 }

// kernel: nusunit7s_forward.20
= control target key start
LH: loop header
LB: loop body
LE: loop exit
PB: predicated region body
PF: predicated region fallthrough
CT: control target
= control target key end

     0   :  { %s615_s12 = smov 0   ;;  %s684_s0 = inlined_call_operand.vmem [shape: bf16[2,5,60], index: 0, kind: input, shape index: {}]   ;;  %s685_s1 = inlined_call_operand.vmem [shape: bf16[3,60,12], index: 1, kind: input, shape index: {}]   ;;  %s686_s2 = inlined_call_operand.vmem [shape: f32[1,12], index: 2, kind: input, shape index: {}]   ;;  %s687_s3 = inlined_call_operand.vmem [shape: bf16[2,1,12], index: 3, kind: output, shape index: {}]  }
   0x1 LB: > { %s469_s13 = sadd.s32 4294967295, %s591_s12   ;;  %p473_p0 = scmp.ge.s32.totalorder %s591_s12, 1  ;;  %s591_s12 = sphi %s615_s12, %s13_s12  }
   0x2   : > { %p136_p1 = scmp.lt.s32.totalorder %s591_s12, 3 }
   0x4   : > { %p137_p2 = pnand %p473_p0, %p136_p1 }
   0x5   : > { %v571_v0 = vld [vmem:[%s685_s1 + $0x20] sm:$0xff] (!%p137_p2)   ;;  %v593_v1 = vmov (!%p137_p2), 0.0   ;;  %v573_v3 = vld [vmem:[%s685_s1 + $0x28] sm:$0xff] (!%p137_p2)   ;;  %p157_p3 = scmp.lt.s32.totalorder (!%p137_p2), %s469_s13, 1  ;;  %v575_v5 = vld [vmem:[%s685_s1 + $0x30] sm:$0xff] (!%p137_p2)   ;;  %vm594_vm0 = vmmov (!%p137_p2), 0  }
   0x6   : > { %140 = sbr.rel (%p137_p2) target bundleno = 260 (0x104), region = 32  ;;  %525 = vmatprep.subr.bf16.mxu0 (!%p137_p2), %v593_v1  ;;  %537 = vmatprep.subr.bf16.mxu1 (!%p137_p2), %v593_v1  ;;  %v572_v2 = vld [vmem:[%s685_s1] sm:$0xff] (!%p137_p2)   ;;  %v574_v4 = vld [vmem:[%s685_s1 + $0x8] sm:$0xff] (!%p137_p2)   ;;  %v576_v6 = vld [vmem:[%s685_s1 + $0x10] sm:$0xff] (!%p137_p2)   ;;  %vm215_vm1 = vcmask (!%p137_p2), 1045504   ;;  %vm211_vm2 = vcmask (!%p137_p2), 490496  }
   0x7   : > { %526 = vmatpush3.bf16.msra.mxu0 (!%p137_p2), %v571_v0  ;;  %538 = vmatpush3.bf16.msra.mxu1 (!%p137_p2), %v572_v2  ;;  %v577_v7 = vld [vmem:[%s685_s1 + $0x38] sm:$0x3f] (!%p137_p2)   ;;  %v580_v13 = vld [vmem:[%s685_s1 + $0x40] sm:$0xff] (!%p137_p2)   ;;  %v581_v15 = vld [vmem:[%s685_s1 + $0x48] sm:$0xff] (!%p137_p2)   ;;  %vm416_vm3 = vcmask (!%p137_p2), 90112  }
   0x8   : > { %527 = vmatprep.subr.bf16.mxu0 (!%p137_p2), %v593_v1  ;;  %539 = vmatprep.subr.bf16.mxu1 (!%p137_p2), %v593_v1  ;;  %v578_v8 = vld [vmem:[%s685_s1 + $0x18] sm:$0x3f] (!%p137_p2)   ;;  %v217_v10 = vsel (!%p137_p2), %vm215_vm1, %v577_v7, 0  ;;  %v582_v16 = vld [vmem:[%s685_s1 + $0x50] sm:$0xff] (!%p137_p2)   ;;  %v412_v31 = vld [vmem:[%s686_s2] sm:$0x1] (!%p137_p2) }
   0x9   : > { %533 = vmatprep.mubr.msk.bf16.mxu0 (!%p137_p2), %vm594_vm0, %v593_v1  ;;  %545 = vmatprep.mubr.msk.bf16.mxu1 (!%p137_p2), %vm594_vm0, %v593_v1  ;;  %v286_v11 = vsel (!%p137_p2), %vm215_vm1, %v578_v8, 0  ;;  %v583_v17 = vld [vmem:[%s685_s1 + $0x58] sm:$0x3f] (!%p137_p2)   ;;  %vm417_vm4 = vsmask.f32 (!%p137_p2), 256 }
   0xa   : > { %v369_v19 = vsel (!%p137_p2), %vm215_vm1, %v583_v17, 0  ;;  %vm418_vm5 = vmand (!%p137_p2), %vm416_vm3, %vm417_vm4 }
   0xb   : > { %528 = vmatpush3.bf16.msra.mxu0 (!%p137_p2), %v573_v3  ;;  %540 = vmatpush3.bf16.msra.mxu1 (!%p137_p2), %v574_v4 }
   0xc   : > { %529 = vmatprep.subr.bf16.mxu0 (!%p137_p2), %v593_v1  ;;  %541 = vmatprep.subr.bf16.mxu1 (!%p137_p2), %v593_v1 }
   0xd   : > { %s689_s13 = smov (!%p157_p3, %s469_s13), 1 }
   0xe   : > { %s474_s30 = sshll.u32 %s689_s13, 2  ;;  %s163_s21 = scalar_lea.vmem %s687_s3, %s689_s13 }
   0xf   : > { %s160_s6 = scalar_lea.vmem %s684_s0, %s474_s30  ;;  %530 = vmatpush3.bf16.msra.mxu0 %v575_v5  ;;  %542 = vmatpush3.bf16.msra.mxu1 %v576_v6  ;;  %v419_v38 = vld [vmem:[%s163_s21] sm:$0x1] }
  0x10   : > { %v579_v9 = vld [vmem:[%s160_s6] ss:$0 sps:$4 sm:$0x22]   ;;  %531 = vmatprep.subr.bf16.mxu0 %v593_v1  ;;  %543 = vmatprep.subr.bf16.mxu1 %v593_v1 }
  0x11   : > { %v187_v12 = vrot.slane %v579_v9, 1  ;;  %v165_v14 = vld [vmem:[%s160_s6] sm:$0x1] }
  0x12   : > { %v584_v18 = vld [vmem:[%s160_s6] ss:$0 sps:$4 sm:$0x44]  }
  0x13   : > { %532 = vmatpush3.bf16.msra.mxu0 %v217_v10  ;;  %544 = vmatpush3.bf16.msra.mxu1 %v286_v11  ;;  %v341_v20 = vrot.slane %v584_v18, 2 }
  0x14   : > { %549 = vmatprep.subr.bf16.mxu0 %v593_v1 }
  0x16   : > { %534 = vmatmul.mubr.msk.bf16.vlgmr.msra.gmra.mrb[0].mxu0 %vm211_vm2, %v187_v12  ;;  %546 = vmatmul.mubr.msk.bf16.vlgmr.msra.gmra.mrb[0].mxu1 %vm211_vm2, %v165_v14 }
  0x17   : > { %550 = vmatpush3.bf16.msra.mxu0 %v580_v13  ;;  %557 = vmatprep.mubr.msk.bf16.mxu0 %vm594_vm0, %v593_v1 }
  0x18   : > { %551 = vmatprep.subr.bf16.mxu0 %v593_v1 }
  0x1b   : > { %552 = vmatpush3.bf16.msra.mxu0 %v581_v15 }
  0x1c   : > { %553 = vmatprep.subr.bf16.mxu0 %v593_v1 }
  0x1f   : > { %554 = vmatpush3.bf16.msra.mxu0 %v582_v16 }
  0x20   : > { %555 = vmatprep.subr.bf16.mxu0 %v593_v1 }
  0x23   : > { %556 = vmatpush3.bf16.msra.mxu0 %v369_v19 }
  0x26   : > { %558 = vmatmul.mubr.msk.bf16.vlgmr.msra.gmra.mrb[4].mxu0 %vm211_vm2, %v341_v20 }
  0xe9   : > { %v253_v21 = vpop.f32.mrb[0].mxu0  ;;  %v322_v23 = vpop.f32.mrb[0].mxu1 }
  0xea   : > { %v535_v22 = vpop.f32.mrb[1].mxu0  ;;  %v323_v24 = vadd.f32 %v322_v23, %v253_v21  ;;  %v547_v26 = vpop.f32.mrb[1].mxu1 }
  0xeb   : > { %v256_v25 = vpop.f32.mrb[2].mxu0  ;;  %v325_v28 = vpop.f32.mrb[2].mxu1 }
  0xec   : > { %v536_v27 = vpop.f32.mrb[3].mxu0  ;;  %v548_v29 = vpop.f32.mrb[3].mxu1 }
  0xf9   : > { %v405_v30 = vpop.f32.mrb[4].mxu0 }
  0xfa   : > { %v411_v32 = vadd.f32 %v405_v30, %v323_v24  ;;  %v559_v33 = vpop.f32.mrb[5].mxu0 }
  0xfb   : > { %v408_v34 = vpop.f32.mrb[6].mxu0 }
  0xfc   : > { %v413_v35 = vadd.f32 %v412_v31, %v411_v32  ;;  %v560_v36 = vpop.f32.mrb[7].mxu0 }
  0xfe   : > { %v414_v37 = vmax.f32 %v413_v35, 0.0 }
 0x100   : > { %v415_v39 = vpack.c.bf16 %v414_v37, %v414_v37 }
 0x102   : > { %v420_v40 = vsel %vm418_vm5, %v415_v39, %v419_v38 }
 0x103   : > { %421 = vst [vmem:[%s163_s21] sm:$0x1] %v420_v40 }
 0x104 PF: > { %s13_s12 = sadd.s32 1, %s591_s12  }
 0x105   : > { %p10_p4 = scmp.ge.s32.totalorder %s13_s12, 4  }
 0x107   :  { %12 = sbr.rel (!%p10_p4) target bundleno = 1 (0x1), region = 64 }

// kernel: nusunit7s_forward.21
= control target key start
LH: loop header
LB: loop body
LE: loop exit
PB: predicated region body
PF: predicated region fallthrough
CT: control target
= control target key end

     0   :  { %s754_s12 = smov 0   ;;  %s897_s0 = inlined_call_operand.vmem [shape: bf16[2,11,132], index: 0, kind: input, shape index: {}]   ;;  %s898_s1 = inlined_call_operand.vmem [shape: bf16[3,132,12], index: 1, kind: input, shape index: {}]   ;;  %s899_s2 = inlined_call_operand.vmem [shape: f32[1,12], index: 2, kind: input, shape index: {}]   ;;  %s900_s3 = inlined_call_operand.vmem [shape: bf16[2,1,12], index: 3, kind: output, shape index: {}]  }
   0x1 LB: > { %s603_s13 = sadd.s32 4294967295, %s731_s12   ;;  %p607_p0 = scmp.ge.s32.totalorder %s731_s12, 1  ;;  %s731_s12 = sphi %s754_s12, %s13_s12  }
   0x2   : > { %p137_p1 = scmp.lt.s32.totalorder %s731_s12, 3 }
   0x4   : > { %p138_p2 = pnand %p607_p0, %p137_p1 }
   0x5   : > { %v692_v0 = vld [vmem:[%s898_s1 + $0x44] sm:$0xff] (!%p138_p2)   ;;  %v733_v1 = vmov (!%p138_p2), 0   ;;  %v694_v3 = vld [vmem:[%s898_s1 + $0x4c] sm:$0xff] (!%p138_p2)   ;;  %p159_p3 = scmp.lt.s32.totalorder (!%p138_p2), %s603_s13, 1  ;;  %v696_v5 = vld [vmem:[%s898_s1 + $0x54] sm:$0xff] (!%p138_p2)   ;;  %vm270_vm0 = vcmask (!%p138_p2), 31744  }
   0x6   : > { %141 = sbr.rel (%p138_p2) target bundleno = 300 (0x12c), region = 32  ;;  %278 = vmatprep.subr.bf16.mxu0 (!%p138_p2), %v733_v1  ;;  %381 = vmatprep.subr.bf16.mxu1 (!%p138_p2), %v733_v1  ;;  %v693_v2 = vld [vmem:[%s898_s1] sm:$0xff] (!%p138_p2)   ;;  %v695_v4 = vld [vmem:[%s898_s1 + $0x8] sm:$0xff] (!%p138_p2)   ;;  %v697_v6 = vld [vmem:[%s898_s1 + $0x10] sm:$0xff] (!%p138_p2)   ;;  %vm274_vm1 = vcmask (!%p138_p2), 1041408   ;;  %vm550_vm2 = vcmask (!%p138_p2), 90112  }
   0x7   : > { %279 = vmatpush1.bf16.msra.mxu0 (!%p138_p2), %v692_v0  ;;  %382 = vmatpush1.bf16.msra.mxu1 (!%p138_p2), %v693_v2  ;;  %v698_v7 = vld [vmem:[%s898_s1 + $0x5c] sm:$0xff] (!%p138_p2)   ;;  %v700_v9 = vld [vmem:[%s898_s1 + $0x64] sm:$0xff] (!%p138_p2)   ;;  %v702_v11 = vld [vmem:[%s898_s1 + $0x6c] sm:$0xff] (!%p138_p2)   ;;  %vm551_vm3 = vsmask.f32 (!%p138_p2), 256 }
   0x8   : > { %280 = vmatprep.subr.bf16.mxu0 (!%p138_p2), %v733_v1  ;;  %383 = vmatprep.subr.bf16.mxu1 (!%p138_p2), %v733_v1  ;;  %v699_v8 = vld [vmem:[%s898_s1 + $0x18] sm:$0xff] (!%p138_p2)   ;;  %v701_v10 = vld [vmem:[%s898_s1 + $0x20] sm:$0xff] (!%p138_p2)   ;;  %v703_v13 = vld [vmem:[%s898_s1 + $0x28] sm:$0xff] (!%p138_p2)  }
   0x9   : > { %v704_v17 = vld [vmem:[%s898_s1 + $0x74] sm:$0xff] (!%p138_p2)   ;;  %v706_v22 = vld [vmem:[%s898_s1 + $0x7c] sm:$0xff] (!%p138_p2)   ;;  %v708_v24 = vld [vmem:[%s898_s1 + $0x84] ss:$0 sps:$4 sm:$0x33] (!%p138_p2)  }
   0xa   : > { %v705_v19 = vld [vmem:[%s898_s1 + $0x30] sm:$0xff] (!%p138_p2)   ;;  %v707_v23 = vld [vmem:[%s898_s1 + $0x38] sm:$0xff] (!%p138_p2)   ;;  %v709_v25 = vld [vmem:[%s898_s1 + $0x40] ss:$0 sps:$4 sm:$0x33] (!%p138_p2)   ;;  %v276_v28 = vsel (!%p138_p2), %vm274_vm1, %v708_v24, 0 }
   0xb   : > { %281 = vmatpush1.bf16.msra.mxu0 (!%p138_p2), %v694_v3  ;;  %384 = vmatpush1.bf16.msra.mxu1 (!%p138_p2), %v695_v4  ;;  %v379_v30 = vsel (!%p138_p2), %vm274_vm1, %v709_v25, 0  ;;  %v714_v33 = vld [vmem:[%s898_s1 + $0x88] sm:$0xff] (!%p138_p2)   ;;  %v715_v35 = vld [vmem:[%s898_s1 + $0x90] sm:$0xff] (!%p138_p2)   ;;  %v716_v36 = vld [vmem:[%s898_s1 + $0x98] sm:$0xff] (!%p138_p2)  }
   0xc   : > { %282 = vmatprep.subr.bf16.mxu0 (!%p138_p2), %v733_v1  ;;  %385 = vmatprep.subr.bf16.mxu1 (!%p138_p2), %v733_v1  ;;  %v717_v37 = vld [vmem:[%s898_s1 + $0xa0] sm:$0xff] (!%p138_p2)   ;;  %v718_v38 = vld [vmem:[%s898_s1 + $0xa8] sm:$0xff] (!%p138_p2)   ;;  %v719_v39 = vld [vmem:[%s898_s1 + $0xb0] sm:$0xff] (!%p138_p2)  }
   0xd   : > { %s902_s13 = smov (!%p159_p3, %s603_s13), 1  ;;  %v720_v40 = vld [vmem:[%s898_s1 + $0xb8] sm:$0xff]   ;;  %v721_v41 = vld [vmem:[%s898_s1 + $0xc0] sm:$0xff]   ;;  %v722_v42 = vld [vmem:[%s898_s1 + $0xc8] ss:$0 sps:$4 sm:$0x33]  }
   0xe   : > { %s682_s30 = sshll.u32 %s902_s13, 4  ;;  %v503_v44 = vsel %vm274_vm1, %v722_v42, 0  ;;  %v546_v56 = vld [vmem:[%s899_s2] sm:$0x1]  ;;  %s166_s26 = scalar_lea.vmem %s900_s3, %s902_s13  ;;  %vm552_vm4 = vmand %vm550_vm2, %vm551_vm3 }
   0xf   : > { %283 = vmatpush1.bf16.msra.mxu0 %v696_v5  ;;  %386 = vmatpush1.bf16.msra.mxu1 %v697_v6  ;;  %s807_s10 = scalar_lea.vmem %s897_s0, %s682_s30  ;;  %v553_v63 = vld [vmem:[%s166_s26] sm:$0x1] }
  0x10   : > { %284 = vmatprep.subr.bf16.mxu0 %v733_v1  ;;  %387 = vmatprep.subr.bf16.mxu1 %v733_v1  ;;  %v186_v12 = vld [vmem:[%s807_s10] sm:$0x44]  ;;  %v168_v15 = vld [vmem:[%s807_s10] sm:$0x11]  ;;  %v421_v26 = vld [vmem:[%s807_s10 + $0x8] sm:$0x22] }
  0x11   : > { %v628_v14 = vcombine.high %v186_v12, %v186_v12  ;;  %v640_v16 = vcombine.high %v168_v15, %v168_v15  ;;  %v627_v21 = vcombine.low %v186_v12, %v186_v12  ;;  %v669_v29 = vcombine.high %v421_v26, %v421_v26 }
  0x12   : > { %v639_v32 = vcombine.low %v168_v15, %v168_v15  ;;  %v668_v43 = vcombine.low %v421_v26, %v421_v26 }
  0x13   : > { %285 = vmatpush1.bf16.msra.mxu0 %v698_v7  ;;  %388 = vmatpush1.bf16.msra.mxu1 %v699_v8  ;;  %v215_v18 = vshrl.u32 %v628_v14, 16  ;;  %v211_v27 = vshrl.u32 %v627_v21, 16  ;;  %v446_v34 = vrot.slane %v669_v29, 1 }
  0x14   : > { %286 = vmatprep.subr.bf16.mxu0 %v733_v1  ;;  %389 = vmatprep.subr.bf16.mxu1 %v733_v1  ;;  %v445_v45 = vrot.slane %v668_v43, 1 }
  0x15   : > { %650 = vmatprep.mubr.msk.bf16.mxu1 %vm270_vm0, %v640_v16  ;;  %v217_v20 = vrot.slane %v215_v18, 2  ;;  %v213_v31 = vrot.slane %v211_v27, 2 }
  0x17   : > { %287 = vmatpush1.bf16.msra.mxu0 %v700_v9  ;;  %390 = vmatpush1.bf16.msra.mxu1 %v701_v10 }
  0x18   : > { %288 = vmatprep.subr.bf16.mxu0 %v733_v1  ;;  %391 = vmatprep.subr.bf16.mxu1 %v733_v1 }
  0x19   : > { %638 = vmatprep.mubr.msk.bf16.mxu0 %vm270_vm0, %v217_v20 }
  0x1b   : > { %289 = vmatpush1.bf16.msra.mxu0 %v702_v11  ;;  %392 = vmatpush1.bf16.msra.mxu1 %v703_v13 }
  0x1c   : > { %290 = vmatprep.subr.bf16.mxu0 %v733_v1  ;;  %393 = vmatprep.subr.bf16.mxu1 %v733_v1 }
  0x1f   : > { %291 = vmatpush1.bf16.msra.mxu0 %v704_v17  ;;  %394 = vmatpush1.bf16.msra.mxu1 %v705_v19 }
  0x20   : > { %292 = vmatprep.subr.bf16.mxu0 %v733_v1  ;;  %395 = vmatprep.subr.bf16.mxu1 %v733_v1 }
  0x23   : > { %293 = vmatpush1.bf16.msra.mxu0 %v706_v22  ;;  %396 = vmatpush1.bf16.msra.mxu1 %v707_v23 }
  0x24   : > { %294 = vmatprep.subr.bf16.mxu0 %v733_v1  ;;  %397 = vmatprep.subr.bf16.mxu1 %v733_v1 }
  0x27   : > { %295 = vmatpush1.bf16.msra.mxu0 %v276_v28  ;;  %398 = vmatpush1.bf16.msra.mxu1 %v379_v30 }
  0x28   : > { %505 = vmatprep.subr.bf16.mxu0 %v733_v1 }
  0x2a   : > { %311 = vmatmul.mubr.bf16.vlgmr.msra.gmra.mrb[0].mxu0 %v213_v31  ;;  %414 = vmatmul.mubr.bf16.vlgmr.msra.gmra.mrb[0].mxu1 %v639_v32 }
  0x2b   : > { %506 = vmatpush1.bf16.msra.mxu0 %v714_v33  ;;  %679 = vmatprep.mubr.msk.bf16.mxu0 %vm270_vm0, %v446_v34 }
  0x2c   : > { %507 = vmatprep.subr.bf16.mxu0 %v733_v1 }
  0x2f   : > { %508 = vmatpush1.bf16.msra.mxu0 %v715_v35 }
  0x30   : > { %509 = vmatprep.subr.bf16.mxu0 %v733_v1 }
  0x33   : > { %510 = vmatpush1.bf16.msra.mxu0 %v716_v36 }
  0x34   : > { %511 = vmatprep.subr.bf16.mxu0 %v733_v1 }
  0x37   : > { %512 = vmatpush1.bf16.msra.mxu0 %v717_v37 }
  0x38   : > { %513 = vmatprep.subr.bf16.mxu0 %v733_v1 }
  0x3b   : > { %514 = vmatpush1.bf16.msra.mxu0 %v718_v38 }
  0x3c   : > { %515 = vmatprep.subr.bf16.mxu0 %v733_v1 }
  0x3f   : > { %516 = vmatpush1.bf16.msra.mxu0 %v719_v39 }
  0x40   : > { %517 = vmatprep.subr.bf16.mxu0 %v733_v1 }
  0x43   : > { %518 = vmatpush1.bf16.msra.mxu0 %v720_v40 }
  0x44   : > { %519 = vmatprep.subr.bf16.mxu0 %v733_v1 }
  0x47   : > { %520 = vmatpush1.bf16.msra.mxu0 %v721_v41 }
  0x48   : > { %521 = vmatprep.subr.bf16.mxu0 %v733_v1 }
  0x4b   : > { %522 = vmatpush1.bf16.msra.mxu0 %v503_v44 }
  0x4e   : > { %538 = vmatmul.mubr.bf16.vlgmr.msra.gmra.mrb[4].mxu0 %v445_v45 }
  0xfd   : > { %v312_v46 = vpop.f32.mrb[0].mxu0  ;;  %v415_v48 = vpop.f32.mrb[0].mxu1 }
  0xfe   : > { %v314_v47 = vpop.f32.mrb[1].mxu0  ;;  %v416_v49 = vadd.f32 %v415_v48, %v312_v46  ;;  %v417_v51 = vpop.f32.mrb[1].mxu1 }
  0xff   : > { %v315_v50 = vpop.f32.mrb[2].mxu0  ;;  %v418_v53 = vpop.f32.mrb[2].mxu1 }
 0x100   : > { %v316_v52 = vpop.f32.mrb[3].mxu0  ;;  %v419_v54 = vpop.f32.mrb[3].mxu1 }
 0x121   : > { %v539_v55 = vpop.f32.mrb[4].mxu0 }
 0x122   : > { %v545_v57 = vadd.f32 %v539_v55, %v416_v49  ;;  %v541_v58 = vpop.f32.mrb[5].mxu0 }
 0x123   : > { %v542_v59 = vpop.f32.mrb[6].mxu0 }
 0x124   : > { %v547_v60 = vadd.f32 %v546_v56, %v545_v57  ;;  %v543_v61 = vpop.f32.mrb[7].mxu0 }
 0x126   : > { %v548_v62 = vmax.f32 %v547_v60, 0.0 }
 0x128   : > { %v549_v0 = vpack.c.bf16 %v548_v62, %v548_v62 }
 0x12a   : > { %v554_v1 = vsel %vm552_vm4, %v549_v0, %v553_v63 }
 0x12b   : > { %555 = vst [vmem:[%s166_s26] sm:$0x1] %v554_v1 }
 0x12c PF: > { %s13_s12 = sadd.s32 1, %s731_s12  }
 0x12d   : > { %p10_p4 = scmp.ge.s32.totalorder %s13_s12, 4  }
 0x12f   :  { %12 = sbr.rel (!%p10_p4) target bundleno = 1 (0x1), region = 64 }

// kernel: nusunit7s_forward.22
= control target key start
LH: loop header
LB: loop body
LE: loop exit
PB: predicated region body
PF: predicated region fallthrough
CT: control target
= control target key end

     0   :  { %s571_s12 = smov 0   ;;  %s631_s0 = inlined_call_operand.vmem [shape: bf16[2,3,36], index: 0, kind: input, shape index: {}]   ;;  %s632_s1 = inlined_call_operand.vmem [shape: bf16[3,36,12], index: 1, kind: input, shape index: {}]   ;;  %s633_s2 = inlined_call_operand.vmem [shape: f32[1,12], index: 2, kind: input, shape index: {}]   ;;  %s634_s3 = inlined_call_operand.vmem [shape: bf16[2,1,12], index: 3, kind: output, shape index: {}]  }
   0x1 LB: > { %s447_s13 = sadd.s32 4294967295, %s546_s12   ;;  %p451_p0 = scmp.ge.s32.totalorder %s546_s12, 1  ;;  %s546_s12 = sphi %s571_s12, %s13_s12  }
   0x2   : > { %p136_p1 = scmp.lt.s32.totalorder %s546_s12, 3 }
   0x4   : > { %p137_p2 = pnand %p451_p0, %p136_p1 }
   0x5   : > { %v531_v0 = vld [vmem:[%s632_s1 + $0x14] sm:$0xff] (!%p137_p2)   ;;  %v548_v1 = vmov (!%p137_p2), 0.0   ;;  %v532_v2 = vld [vmem:[%s632_s1] sm:$0xff] (!%p137_p2)   ;;  %v534_v4 = vld [vmem:[%s632_s1 + $0x8] sm:$0xff] (!%p137_p2)   ;;  %p157_p3 = scmp.lt.s32.totalorder (!%p137_p2), %s447_s13, 1  ;;  %v181_v5 = vlaneseq (!%p137_p2)  ;;  %vm207_vm0 = vcmask (!%p137_p2), 1041408  }
   0x6   : > { %140 = sbr.rel (%p137_p2) target bundleno = 255 (0xff), region = 32  ;;  %490 = vmatprep.subr.bf16.mxu0 (!%p137_p2), %v548_v1  ;;  %500 = vmatprep.subr.bf16.mxu1 (!%p137_p2), %v548_v1  ;;  %v533_v3 = vld [vmem:[%s632_s1 + $0x1c] sm:$0xff] (!%p137_p2)   ;;  %v535_v6 = vld [vmem:[%s632_s1 + $0x24] ss:$0 sps:$4 sm:$0x33] (!%p137_p2)   ;;  %vm549_vm1 = vmmov (!%p137_p2), 0  }
   0x7   : > { %491 = vmatpush3.bf16.msra.mxu0 (!%p137_p2), %v531_v0  ;;  %501 = vmatpush3.bf16.msra.mxu1 (!%p137_p2), %v532_v2  ;;  %v536_v7 = vld [vmem:[%s632_s1 + $0x10] ss:$0 sps:$4 sm:$0x33] (!%p137_p2)   ;;  %v209_v8 = vsel (!%p137_p2), %vm207_vm0, %v535_v6, 0  ;;  %v550_v10 = vmov (!%p137_p2), 1983009808  }
   0x8   : > { %492 = vmatprep.subr.bf16.mxu0 (!%p137_p2), %v548_v1  ;;  %502 = vmatprep.subr.bf16.mxu1 (!%p137_p2), %v548_v1  ;;  %v270_v9 = vsel (!%p137_p2), %vm207_vm0, %v536_v7, 0  ;;  %v179_v11 = vunpack.c.l.s4 (!%p137_p2), %v550_v10  ;;  %v182_v12 = vshrl.u32 (!%p137_p2), %v181_v5, 7  ;;  %vm203_vm2 = vcmask (!%p137_p2), 293888   ;;  %v537_v17 = vld [vmem:[%s632_s1 + $0x28] sm:$0xff] (!%p137_p2)   ;;  %v538_v19 = vld [vmem:[%s632_s1 + $0x30] sm:$0xff] (!%p137_p2)  }
   0x9   : > { %496 = vmatprep.mubr.msk.bf16.mxu0 (!%p137_p2), %vm549_vm1, %v548_v1  ;;  %506 = vmatprep.mubr.msk.bf16.mxu1 (!%p137_p2), %vm549_vm1, %v548_v1  ;;  %v539_v20 = vld [vmem:[%s632_s1 + $0x38] ss:$0 sps:$4 sm:$0x33] (!%p137_p2)   ;;  %v390_v34 = vld [vmem:[%s633_s2] sm:$0x1] (!%p137_p2)  ;;  %vm394_vm3 = vcmask (!%p137_p2), 90112  }
   0xa   : > { %v180_v13 = vunpack.c.0.s8 (!%p137_p2), %v179_v11  ;;  %v347_v22 = vsel (!%p137_p2), %vm207_vm0, %v539_v20, 0  ;;  %vm395_vm4 = vsmask.f32 (!%p137_p2), 256 }
   0xb   : > { %493 = vmatpush3.bf16.msra.mxu0 (!%p137_p2), %v533_v3  ;;  %503 = vmatpush3.bf16.msra.mxu1 (!%p137_p2), %v534_v4  ;;  %vm396_vm5 = vmand (!%p137_p2), %vm394_vm3, %vm395_vm4 }
   0xc   : > { %494 = vmatprep.subr.bf16.mxu0 (!%p137_p2), %v548_v1  ;;  %504 = vmatprep.subr.bf16.mxu1 (!%p137_p2), %v548_v1  ;;  %v183_v15 = vsub.s32 (!%p137_p2), %v180_v13, %v182_v12 }
   0xd   : > { %s636_s13 = smov (!%p157_p3, %s447_s13), 1 }
   0xe   : > { %s452_s26 = sshll.u32 %s636_s13, 1  ;;  %s163_s15 = scalar_lea.vmem %s634_s3, %s636_s13 }
   0xf   : > { %s160_s29 = scalar_lea.vmem %s631_s0, %s452_s26  ;;  %495 = vmatpush3.bf16.msra.mxu0 %v209_v8  ;;  %505 = vmatpush3.bf16.msra.mxu1 %v270_v9  ;;  %v397_v41 = vld [vmem:[%s163_s15] sm:$0x1] }
  0x10   : > { %v165_v14 = vld [vmem:[%s160_s29] sm:$0x1]  ;;  %510 = vmatprep.subr.bf16.mxu0 %v548_v1  ;;  %v471_v21 = vld.sshfl [vmem:[%s160_s29] sm:$0x2 pattern:$0x76325410] }
  0x11   : > { %v184_v16 = vrot.slane %v165_v14, %v183_v15  ;;  %v327_v23 = vrot.slane %v471_v21, 1 }
  0x12   : > { %507 = vmatmul.mubr.msk.bf16.vlgmr.msra.gmra.mrb[0].mxu1 %vm203_vm2, %v165_v14 }
  0x13   : > { %v186_v18 = vshrl.u32 %v184_v16, 16 }
  0x15   : > { %497 = vmatmul.mubr.msk.bf16.vlgmr.msra.gmra.mrb[0].mxu0 %vm203_vm2, %v186_v18 }
  0x16   : > { %511 = vmatpush3.bf16.msra.mxu0 %v537_v17  ;;  %516 = vmatprep.mubr.msk.bf16.mxu0 %vm549_vm1, %v548_v1 }
  0x17   : > { %512 = vmatprep.subr.bf16.mxu0 %v548_v1 }
  0x1a   : > { %513 = vmatpush3.bf16.msra.mxu0 %v538_v19 }
  0x1b   : > { %514 = vmatprep.subr.bf16.mxu0 %v548_v1 }
  0x1e   : > { %515 = vmatpush3.bf16.msra.mxu0 %v347_v22 }
  0x21   : > { %517 = vmatmul.mubr.msk.bf16.vlgmr.msra.gmra.mrb[4].mxu0 %vm203_vm2, %v327_v23 }
  0xe5   : > { %v306_v24 = vpop.f32.mrb[0].mxu1 }
  0xe6   : > { %v508_v25 = vpop.f32.mrb[1].mxu1 }
  0xe7   : > { %v309_v26 = vpop.f32.mrb[2].mxu1 }
  0xe8   : > { %v245_v27 = vpop.f32.mrb[0].mxu0  ;;  %v509_v28 = vpop.f32.mrb[3].mxu1 }
  0xe9   : > { %v498_v29 = vpop.f32.mrb[1].mxu0  ;;  %v307_v30 = vadd.f32 %v306_v24, %v245_v27 }
  0xea   : > { %v248_v31 = vpop.f32.mrb[2].mxu0 }
  0xeb   : > { %v499_v32 = vpop.f32.mrb[3].mxu0 }
  0xf4   : > { %v383_v33 = vpop.f32.mrb[4].mxu0 }
  0xf5   : > { %v389_v35 = vadd.f32 %v383_v33, %v307_v30  ;;  %v518_v36 = vpop.f32.mrb[5].mxu0 }
  0xf6   : > { %v386_v37 = vpop.f32.mrb[6].mxu0 }
  0xf7   : > { %v391_v38 = vadd.f32 %v390_v34, %v389_v35  ;;  %v519_v39 = vpop.f32.mrb[7].mxu0 }
  0xf9   : > { %v392_v40 = vmax.f32 %v391_v38, 0.0 }
  0xfb   : > { %v393_v42 = vpack.c.bf16 %v392_v40, %v392_v40 }
  0xfd   : > { %v398_v43 = vsel %vm396_vm5, %v393_v42, %v397_v41 }
  0xfe   : > { %399 = vst [vmem:[%s163_s15] sm:$0x1] %v398_v43 }
  0xff PF: > { %s13_s12 = sadd.s32 1, %s546_s12  }
 0x100   : > { %p10_p4 = scmp.ge.s32.totalorder %s13_s12, 4  }
 0x102   :  { %12 = sbr.rel (!%p10_p4) target bundleno = 1 (0x1), region = 64 }

// kernel: nusunit7s_forward.24
= control target key start
LH: loop header
LB: loop body
LE: loop exit
PB: predicated region body
PF: predicated region fallthrough
CT: control target
= control target key end

     0   :  { %s665_s12 = smov 0   ;;  %s766_s0 = inlined_call_operand.vmem [shape: bf16[2,6,72], index: 0, kind: input, shape index: {}]   ;;  %s767_s1 = inlined_call_operand.vmem [shape: bf16[3,72,48], index: 1, kind: input, shape index: {}]   ;;  %s768_s2 = inlined_call_operand.vmem [shape: f32[1,48], index: 2, kind: input, shape index: {}]   ;;  %s769_s3 = inlined_call_operand.vmem [shape: bf16[2,4,48], index: 3, kind: output, shape index: {}]  }
   0x1 LB: > { %s500_s13 = sadd.s32 4294967295, %s641_s12   ;;  %p504_p0 = scmp.ge.s32.totalorder %s641_s12, 1  ;;  %s641_s12 = sphi %s665_s12, %s13_s12  }
   0x2   : > { %p136_p1 = scmp.lt.s32.totalorder %s641_s12, 3 }
   0x4   : > { %p137_p2 = pnand %p504_p0, %p136_p1 }
   0x5   : > { %v618_v0 = vld [vmem:[%s767_s1 + $0x24] sm:$0xff] (!%p137_p2)   ;;  %v643_v1 = vmov (!%p137_p2), 0.0   ;;  %v620_v3 = vld [vmem:[%s767_s1 + $0x2c] sm:$0xff] (!%p137_p2)   ;;  %p158_p3 = scmp.lt.s32.totalorder (!%p137_p2), %s500_s13, 1  ;;  %vm644_vm0 = vmmov (!%p137_p2), 0   ;;  %v622_v5 = vld [vmem:[%s767_s1 + $0x34] sm:$0xff] (!%p137_p2)  }
   0x6   : > { %140 = sbr.rel (%p137_p2) target bundleno = 267 (0x10b), region = 32  ;;  %566 = vmatprep.subr.bf16.mxu0 (!%p137_p2), %v643_v1  ;;  %580 = vmatprep.subr.bf16.mxu1 (!%p137_p2), %v643_v1  ;;  %v619_v2 = vld [vmem:[%s767_s1] sm:$0xff] (!%p137_p2)   ;;  %v621_v4 = vld [vmem:[%s767_s1 + $0x8] sm:$0xff] (!%p137_p2)   ;;  %v623_v6 = vld [vmem:[%s767_s1 + $0x10] sm:$0xff] (!%p137_p2)   ;;  %vm229_vm1 = vcmask (!%p137_p2), 1043456   ;;  %vm225_vm2 = vcmask (!%p137_p2), 588800  }
   0x7   : > { %567 = vmatpush3.bf16.msra.mxu0 (!%p137_p2), %v618_v0  ;;  %581 = vmatpush3.bf16.msra.mxu1 (!%p137_p2), %v619_v2  ;;  %v624_v7 = vld [vmem:[%s767_s1 + $0x3c] sm:$0xff] (!%p137_p2)   ;;  %v626_v10 = vld [vmem:[%s767_s1 + $0x44] ss:$0 sps:$4 sm:$0xff] (!%p137_p2)   ;;  %v629_v18 = vld [vmem:[%s767_s1 + $0x48] sm:$0xff] (!%p137_p2)   ;;  %vm445_vm3 = vcmask (!%p137_p2), 386048  }
   0x8   : > { %568 = vmatprep.subr.bf16.mxu0 (!%p137_p2), %v643_v1  ;;  %582 = vmatprep.subr.bf16.mxu1 (!%p137_p2), %v643_v1  ;;  %v625_v8 = vld [vmem:[%s767_s1 + $0x18] sm:$0xff] (!%p137_p2)   ;;  %v627_v11 = vld [vmem:[%s767_s1 + $0x20] ss:$0 sps:$4 sm:$0xff] (!%p137_p2)   ;;  %v231_v15 = vsel (!%p137_p2), %vm229_vm1, %v626_v10, 0  ;;  %v630_v20 = vld [vmem:[%s767_s1 + $0x50] sm:$0xff] (!%p137_p2)  }
   0x9   : > { %576 = vmatprep.mubr.msk.bf16.mxu0 (!%p137_p2), %vm644_vm0, %v643_v1  ;;  %590 = vmatprep.mubr.msk.bf16.mxu1 (!%p137_p2), %vm644_vm0, %v643_v1  ;;  %v304_v16 = vsel (!%p137_p2), %vm229_vm1, %v627_v11, 0  ;;  %v631_v21 = vld [vmem:[%s767_s1 + $0x58] sm:$0xff] (!%p137_p2)   ;;  %v632_v22 = vld [vmem:[%s767_s1 + $0x60] sm:$0xff] (!%p137_p2)   ;;  %v633_v23 = vld [vmem:[%s767_s1 + $0x68] ss:$0 sps:$4 sm:$0xff] (!%p137_p2)  }
   0xa   : > { %v392_v25 = vsel (!%p137_p2), %vm229_vm1, %v633_v23, 0  ;;  %v545_v37 = vld [vmem:[%s768_s2] ss:$0 sm:$0xff] (!%p137_p2) }
   0xb   : > { %569 = vmatpush3.bf16.msra.mxu0 (!%p137_p2), %v620_v3  ;;  %583 = vmatpush3.bf16.msra.mxu1 (!%p137_p2), %v621_v4 }
   0xc   : > { %570 = vmatprep.subr.bf16.mxu0 (!%p137_p2), %v643_v1  ;;  %584 = vmatprep.subr.bf16.mxu1 (!%p137_p2), %v643_v1 }
   0xd   : > { %s771_s13 = smov (!%p158_p3, %s500_s13), 1 }
   0xe   : > { %s505_s26 = sshll.u32 %s771_s13, 2  ;;  %s506_s25 = sshll.u32 %s771_s13, 1 }
   0xf   : > { %s707_s29 = scalar_lea.vmem %s766_s0, %s505_s26  ;;  %571 = vmatpush3.bf16.msra.mxu0 %v622_v5  ;;  %585 = vmatpush3.bf16.msra.mxu1 %v623_v6  ;;  %s165_s28 = scalar_lea.vmem %s769_s3, %s506_s25 }
  0x10   : > { %v628_v9 = vld [vmem:[%s707_s29] ss:$0 sps:$4 sm:$0x77]   ;;  %572 = vmatprep.subr.bf16.mxu0 %v643_v1  ;;  %586 = vmatprep.subr.bf16.mxu1 %v643_v1 }
  0x11   : > { %v192_v12 = vshrl.u32 %v628_v9, 16  ;;  %v194_v13 = vshll.u32 %v628_v9, 16  ;;  %v167_v19 = vld [vmem:[%s707_s29] sm:$0x3] }
  0x12   : > { %v634_v24 = vld [vmem:[%s707_s29] ss:$0 sps:$4 sm:$0x66]  }
  0x13   : > { %573 = vmatpush3.bf16.msra.mxu0 %v624_v7  ;;  %v196_v14 = vrot.slane %v194_v13, 1  ;;  %587 = vmatpush3.bf16.msra.mxu1 %v625_v8  ;;  %v360_v26 = vrot.slane %v634_v24, 1 }
  0x14   : > { %574 = vmatprep.subr.bf16.mxu0 %v643_v1  ;;  %588 = vmatprep.subr.bf16.mxu1 %v643_v1 }
  0x15   : > { %v197_v17 = vor.u32 %v196_v14, %v192_v12 }
  0x17   : > { %575 = vmatpush3.bf16.msra.mxu0 %v231_v15  ;;  %589 = vmatpush3.bf16.msra.mxu1 %v304_v16 }
  0x18   : > { %594 = vmatprep.subr.bf16.mxu0 %v643_v1 }
  0x1a   : > { %577 = vmatmul.mubr.msk.bf16.vlgmr.msra.gmra.mrb[0].mxu0 %vm225_vm2, %v197_v17  ;;  %591 = vmatmul.mubr.msk.bf16.vlgmr.msra.gmra.mrb[0].mxu1 %vm225_vm2, %v167_v19 }
  0x1b   : > { %595 = vmatpush3.bf16.msra.mxu0 %v629_v18  ;;  %604 = vmatprep.mubr.msk.bf16.mxu0 %vm644_vm0, %v643_v1 }
  0x1c   : > { %596 = vmatprep.subr.bf16.mxu0 %v643_v1 }
  0x1f   : > { %597 = vmatpush3.bf16.msra.mxu0 %v630_v20 }
  0x20   : > { %598 = vmatprep.subr.bf16.mxu0 %v643_v1 }
  0x23   : > { %599 = vmatpush3.bf16.msra.mxu0 %v631_v21 }
  0x24   : > { %600 = vmatprep.subr.bf16.mxu0 %v643_v1 }
  0x27   : > { %601 = vmatpush3.bf16.msra.mxu0 %v632_v22 }
  0x28   : > { %602 = vmatprep.subr.bf16.mxu0 %v643_v1 }
  0x2b   : > { %603 = vmatpush3.bf16.msra.mxu0 %v392_v25 }
  0x2e   : > { %605 = vmatmul.mubr.msk.bf16.vlgmr.msra.gmra.mrb[4].mxu0 %vm225_vm2, %v360_v26 }
  0xed   : > { %v267_v27 = vpop.f32.mrb[0].mxu0  ;;  %v340_v29 = vpop.f32.mrb[0].mxu1 }
  0xee   : > { %v578_v28 = vpop.f32.mrb[1].mxu0  ;;  %v341_v30 = vadd.f32 %v340_v29, %v267_v27  ;;  %v592_v32 = vpop.f32.mrb[1].mxu1 }
  0xef   : > { %v270_v31 = vpop.f32.mrb[2].mxu0  ;;  %v343_v34 = vpop.f32.mrb[2].mxu1 }
  0xf0   : > { %v579_v33 = vpop.f32.mrb[3].mxu0  ;;  %v593_v35 = vpop.f32.mrb[3].mxu1 }
 0x101   : > { %v428_v36 = vpop.f32.mrb[4].mxu0 }
 0x102   : > { %v434_v38 = vadd.f32 %v428_v36, %v341_v30  ;;  %v606_v39 = vpop.f32.mrb[5].mxu0 }
 0x103   : > { %v431_v40 = vpop.f32.mrb[6].mxu0 }
 0x104   : > { %v442_v41 = vadd.f32 %v545_v37, %v434_v38  ;;  %v607_v42 = vpop.f32.mrb[7].mxu0 }
 0x106   : > { %v443_v43 = vmax.f32 %v442_v41, 0.0 }
 0x108   : > { %v444_v44 = vpack.c.bf16 %v443_v43, %v443_v43 }
 0x10a   : > { %446 = vst.msk [vmem:[%s165_s28] sm:$0x3] %vm445_vm3, %v444_v44 }
 0x10b PF: > { %s13_s12 = sadd.s32 1, %s641_s12  }
 0x10c   : > { %p10_p4 = scmp.ge.s32.totalorder %s13_s12, 4  }
 0x10e   :  { %12 = sbr.rel (!%p10_p4) target bundleno = 1 (0x1), region = 64 }

// kernel: nusunit7s_forward.25
= control target key start
LH: loop header
LB: loop body
LE: loop exit
PB: predicated region body
PF: predicated region fallthrough
CT: control target
= control target key end

     0   :  { %s801_s12 = smov 0   ;;  %s938_s0 = inlined_call_operand.vmem [shape: bf16[2,10,120], index: 0, kind: input, shape index: {}]   ;;  %s939_s1 = inlined_call_operand.vmem [shape: bf16[3,120,96], index: 1, kind: input, shape index: {}]   ;;  %s940_s2 = inlined_call_operand.vmem [shape: f32[1,96], index: 2, kind: input, shape index: {}]   ;;  %s941_s3 = inlined_call_operand.vmem [shape: bf16[2,8,96], index: 3, kind: output, shape index: {}]  }
   0x1 LB: > { %s577_s13 = sadd.s32 4294967295, %s777_s12   ;;  %p581_p0 = scmp.ge.s32.totalorder %s777_s12, 1  ;;  %s777_s12 = sphi %s801_s12, %s13_s12  }
   0x2   : > { %p137_p1 = scmp.lt.s32.totalorder %s777_s12, 3 }
   0x4   : > { %p138_p2 = pnand %p581_p0, %p137_p1 }
   0x5   : > { %v745_v0 = vld [vmem:[%s939_s1 + $0x3c] sm:$0xff] (!%p138_p2)   ;;  %v779_v1 = vmov (!%p138_p2), 0.0   ;;  %v747_v3 = vld [vmem:[%s939_s1 + $0x44] sm:$0xff] (!%p138_p2)   ;;  %p160_p3 = scmp.lt.s32.totalorder (!%p138_p2), %s577_s13, 1  ;;  %vm780_vm0 = vmmov (!%p138_p2), 0   ;;  %v749_v5 = vld [vmem:[%s939_s1 + $0x4c] sm:$0xff] (!%p138_p2)  }
   0x6   : > { %141 = sbr.rel (%p138_p2) target bundleno = 291 (0x123), region = 32  ;;  %675 = vmatprep.subr.bf16.mxu0 (!%p138_p2), %v779_v1  ;;  %695 = vmatprep.subr.bf16.mxu1 (!%p138_p2), %v779_v1  ;;  %v746_v2 = vld [vmem:[%s939_s1] sm:$0xff] (!%p138_p2)   ;;  %v748_v4 = vld [vmem:[%s939_s1 + $0x8] sm:$0xff] (!%p138_p2)   ;;  %v750_v6 = vld [vmem:[%s939_s1 + $0x10] sm:$0xff] (!%p138_p2)   ;;  %vm264_vm1 = vcmask (!%p138_p2), 1043456   ;;  %vm260_vm2 = vcmask (!%p138_p2), 982016  }
   0x7   : > { %676 = vmatpush3.bf16.msra.mxu0 (!%p138_p2), %v745_v0  ;;  %696 = vmatpush3.bf16.msra.mxu1 (!%p138_p2), %v746_v2  ;;  %v751_v7 = vld [vmem:[%s939_s1 + $0x54] sm:$0xff] (!%p138_p2)   ;;  %v753_v9 = vld [vmem:[%s939_s1 + $0x5c] sm:$0xff] (!%p138_p2)   ;;  %v755_v14 = vld [vmem:[%s939_s1 + $0x64] sm:$0xff] (!%p138_p2)   ;;  %vm522_vm3 = vcmask (!%p138_p2), 781312  }
   0x8   : > { %677 = vmatprep.subr.bf16.mxu0 (!%p138_p2), %v779_v1  ;;  %697 = vmatprep.subr.bf16.mxu1 (!%p138_p2), %v779_v1  ;;  %v752_v8 = vld [vmem:[%s939_s1 + $0x18] sm:$0xff] (!%p138_p2)   ;;  %v754_v10 = vld [vmem:[%s939_s1 + $0x20] sm:$0xff] (!%p138_p2)   ;;  %v756_v15 = vld [vmem:[%s939_s1 + $0x28] sm:$0xff] (!%p138_p2)  }
   0x9   : > { %691 = vmatprep.mubr.msk.bf16.mxu0 (!%p138_p2), %vm780_vm0, %v779_v1  ;;  %711 = vmatprep.mubr.msk.bf16.mxu1 (!%p138_p2), %vm780_vm0, %v779_v1  ;;  %v757_v17 = vld [vmem:[%s939_s1 + $0x6c] sm:$0xff] (!%p138_p2)   ;;  %v759_v19 = vld [vmem:[%s939_s1 + $0x74] ss:$0 sps:$4 sm:$0xff] (!%p138_p2)   ;;  %v760_v20 = vld [vmem:[%s939_s1 + $0x38] ss:$0 sps:$4 sm:$0xff] (!%p138_p2)  }
   0xa   : > { %v758_v18 = vld [vmem:[%s939_s1 + $0x30] sm:$0xff] (!%p138_p2)   ;;  %v266_v23 = vsel (!%p138_p2), %vm264_vm1, %v759_v19, 0  ;;  %v357_v24 = vsel (!%p138_p2), %vm264_vm1, %v760_v20, 0  ;;  %v762_v26 = vld [vmem:[%s939_s1 + $0x78] sm:$0xff] (!%p138_p2)   ;;  %v763_v27 = vld [vmem:[%s939_s1 + $0x80] sm:$0xff] (!%p138_p2)  }
   0xb   : > { %678 = vmatpush3.bf16.msra.mxu0 (!%p138_p2), %v747_v3  ;;  %698 = vmatpush3.bf16.msra.mxu1 (!%p138_p2), %v748_v4  ;;  %v764_v28 = vld [vmem:[%s939_s1 + $0x88] sm:$0xff] (!%p138_p2)   ;;  %v765_v29 = vld [vmem:[%s939_s1 + $0x90] sm:$0xff] (!%p138_p2)   ;;  %v766_v30 = vld [vmem:[%s939_s1 + $0x98] sm:$0xff] (!%p138_p2)  }
   0xc   : > { %679 = vmatprep.subr.bf16.mxu0 (!%p138_p2), %v779_v1  ;;  %699 = vmatprep.subr.bf16.mxu1 (!%p138_p2), %v779_v1  ;;  %v767_v31 = vld [vmem:[%s939_s1 + $0xa0] sm:$0xff] (!%p138_p2)   ;;  %v768_v32 = vld [vmem:[%s939_s1 + $0xa8] sm:$0xff] (!%p138_p2)   ;;  %v769_v34 = vld [vmem:[%s939_s1 + $0xb0] ss:$0 sps:$4 sm:$0xff] (!%p138_p2)  }
   0xd   : > { %s943_s13 = smov (!%p160_p3, %s577_s13), 1  ;;  %v469_v36 = vsel %vm264_vm1, %v769_v34, 0  ;;  %v644_v48 = vld [vmem:[%s940_s2] ss:$0 sm:$0xff] }
   0xe   : > { %s647_s26 = sshll.u32 %s943_s13, 3  ;;  %s584_s18 = sshll.u32 %s943_s13, 2 }
   0xf   : > { %680 = vmatpush3.bf16.msra.mxu0 %v749_v5  ;;  %700 = vmatpush3.bf16.msra.mxu1 %v750_v6  ;;  %s851_s6 = scalar_lea.vmem %s938_s0, %s647_s26  ;;  %s168_s21 = scalar_lea.vmem %s941_s3, %s584_s18 }
  0x10   : > { %681 = vmatprep.subr.bf16.mxu0 %v779_v1  ;;  %701 = vmatprep.subr.bf16.mxu1 %v779_v1  ;;  %v170_v11 = vld [vmem:[%s851_s6] sm:$0xf]  ;;  %v186_v12 = vld [vmem:[%s851_s6 + $0x4] sm:$0x1] }
  0x11   : > { %v600_v13 = vcombine.low %v170_v11, %v186_v12  ;;  %v399_v33 = vld [vmem:[%s851_s6] sm:$0xe] }
  0x12   : > { %v634_v35 = vcombine.low %v399_v33, %v186_v12 }
  0x13   : > { %682 = vmatpush3.bf16.msra.mxu0 %v751_v7  ;;  %702 = vmatpush3.bf16.msra.mxu1 %v752_v8  ;;  %v211_v16 = vshll.u32 %v600_v13, 16  ;;  %v209_v21 = vshrl.u32 %v600_v13, 16 }
  0x14   : > { %683 = vmatprep.subr.bf16.mxu0 %v779_v1  ;;  %703 = vmatprep.subr.bf16.mxu1 %v779_v1  ;;  %v419_v37 = vrot.slane %v634_v35, 1 }
  0x15   : > { %v213_v22 = vrot.slane %v211_v16, 1 }
  0x17   : > { %684 = vmatpush3.bf16.msra.mxu0 %v753_v9  ;;  %704 = vmatpush3.bf16.msra.mxu1 %v754_v10  ;;  %v214_v25 = vor.u32 %v213_v22, %v209_v21 }
  0x18   : > { %685 = vmatprep.subr.bf16.mxu0 %v779_v1  ;;  %705 = vmatprep.subr.bf16.mxu1 %v779_v1 }
  0x1b   : > { %686 = vmatpush3.bf16.msra.mxu0 %v755_v14  ;;  %706 = vmatpush3.bf16.msra.mxu1 %v756_v15 }
  0x1c   : > { %687 = vmatprep.subr.bf16.mxu0 %v779_v1  ;;  %707 = vmatprep.subr.bf16.mxu1 %v779_v1 }
  0x1f   : > { %688 = vmatpush3.bf16.msra.mxu0 %v757_v17  ;;  %708 = vmatpush3.bf16.msra.mxu1 %v758_v18 }
  0x20   : > { %689 = vmatprep.subr.bf16.mxu0 %v779_v1  ;;  %709 = vmatprep.subr.bf16.mxu1 %v779_v1 }
  0x23   : > { %690 = vmatpush3.bf16.msra.mxu0 %v266_v23  ;;  %710 = vmatpush3.bf16.msra.mxu1 %v357_v24 }
  0x24   : > { %715 = vmatprep.subr.bf16.mxu0 %v779_v1 }
  0x26   : > { %692 = vmatmul.mubr.msk.bf16.vlgmr.msra.gmra.mrb[0].mxu0 %vm260_vm2, %v214_v25  ;;  %712 = vmatmul.mubr.msk.bf16.vlgmr.msra.gmra.mrb[0].mxu1 %vm260_vm2, %v170_v11 }
  0x27   : > { %716 = vmatpush3.bf16.msra.mxu0 %v762_v26  ;;  %731 = vmatprep.mubr.msk.bf16.mxu0 %vm780_vm0, %v779_v1 }
  0x28   : > { %717 = vmatprep.subr.bf16.mxu0 %v779_v1 }
  0x2b   : > { %718 = vmatpush3.bf16.msra.mxu0 %v763_v27 }
  0x2c   : > { %719 = vmatprep.subr.bf16.mxu0 %v779_v1 }
  0x2f   : > { %720 = vmatpush3.bf16.msra.mxu0 %v764_v28 }
  0x30   : > { %721 = vmatprep.subr.bf16.mxu0 %v779_v1 }
  0x33   : > { %722 = vmatpush3.bf16.msra.mxu0 %v765_v29 }
  0x34   : > { %723 = vmatprep.subr.bf16.mxu0 %v779_v1 }
  0x37   : > { %724 = vmatpush3.bf16.msra.mxu0 %v766_v30 }
  0x38   : > { %725 = vmatprep.subr.bf16.mxu0 %v779_v1 }
  0x3b   : > { %726 = vmatpush3.bf16.msra.mxu0 %v767_v31 }
  0x3c   : > { %727 = vmatprep.subr.bf16.mxu0 %v779_v1 }
  0x3f   : > { %728 = vmatpush3.bf16.msra.mxu0 %v768_v32 }
  0x40   : > { %729 = vmatprep.subr.bf16.mxu0 %v779_v1 }
  0x43   : > { %730 = vmatpush3.bf16.msra.mxu0 %v469_v36 }
  0x46   : > { %732 = vmatmul.mubr.msk.bf16.vlgmr.msra.gmra.mrb[4].mxu0 %vm260_vm2, %v419_v37 }
  0xf9   : > { %v302_v38 = vpop.f32.mrb[0].mxu0  ;;  %v393_v40 = vpop.f32.mrb[0].mxu1 }
  0xfa   : > { %v693_v39 = vpop.f32.mrb[1].mxu0  ;;  %v394_v41 = vadd.f32 %v393_v40, %v302_v38  ;;  %v713_v43 = vpop.f32.mrb[1].mxu1 }
  0xfb   : > { %v305_v42 = vpop.f32.mrb[2].mxu0  ;;  %v396_v45 = vpop.f32.mrb[2].mxu1 }
  0xfc   : > { %v694_v44 = vpop.f32.mrb[3].mxu0  ;;  %v714_v46 = vpop.f32.mrb[3].mxu1 }
 0x119   : > { %v505_v47 = vpop.f32.mrb[4].mxu0 }
 0x11a   : > { %v511_v49 = vadd.f32 %v505_v47, %v394_v41  ;;  %v733_v50 = vpop.f32.mrb[5].mxu0 }
 0x11b   : > { %v508_v51 = vpop.f32.mrb[6].mxu0 }
 0x11c   : > { %v519_v52 = vadd.f32 %v644_v48, %v511_v49  ;;  %v734_v53 = vpop.f32.mrb[7].mxu0 }
 0x11e   : > { %v520_v54 = vmax.f32 %v519_v52, 0.0 }
 0x120   : > { %v521_v55 = vpack.c.bf16 %v520_v54, %v520_v54 }
 0x122   : > { %523 = vst.msk [vmem:[%s168_s21] sm:$0xf] %vm522_vm3, %v521_v55 }
 0x123 PF: > { %s13_s12 = sadd.s32 1, %s777_s12  }
 0x124   : > { %p10_p4 = scmp.ge.s32.totalorder %s13_s12, 4  }
 0x126   :  { %12 = sbr.rel (!%p10_p4) target bundleno = 1 (0x1), region = 64 }

// kernel: nusunit7s_forward.27
= control target key start
LH: loop header
LB: loop body
LE: loop exit
PB: predicated region body
PF: predicated region fallthrough
CT: control target
= control target key end

     0   :  { %s1827_s12 = smov 0   ;;  %s2253_s0 = inlined_call_operand.vmem [shape: bf16[2,34,408], index: 0, kind: input, shape index: {}]   ;;  %s2254_s1 = inlined_call_operand.vmem [shape: bf16[3,408,96], index: 1, kind: input, shape index: {}]   ;;  %s2255_s2 = inlined_call_operand.vmem [shape: f32[1,96], index: 2, kind: input, shape index: {}]   ;;  %s2256_s3 = inlined_call_operand.vmem [shape: bf16[2,32,96], index: 3, kind: output, shape index: {}]  }
   0x1 LB: > { %s1386_s13 = sadd.s32 4294967295, %s1804_s12   ;;  %p1390_p0 = scmp.ge.s32.totalorder %s1804_s12, 1  ;;  %s1804_s12 = sphi %s1827_s12, %s13_s12  }
   0x2   : > { %p137_p1 = scmp.lt.s32.totalorder %s1804_s12, 3 }
   0x4   : > { %p138_p2 = pnand %p1390_p0, %p137_p1 }
   0x5   : > { %v1702_v0 = vld [vmem:[%s2254_s1 + $0x10c] sm:$0xff] (!%p138_p2)   ;;  %v1806_v1 = vmov (!%p138_p2), 0   ;;  %v1705_v4 = vld [vmem:[%s2254_s1 + $0x114] sm:$0xff] (!%p138_p2)   ;;  %v1708_v7 = vld [vmem:[%s2254_s1 + $0x11c] sm:$0xff] (!%p138_p2)   ;;  %p161_p3 = scmp.lt.s32.totalorder (!%p138_p2), %s1386_s13, 1  ;;  %vm574_vm1 = vcmask (!%p138_p2), 1043456  }
   0x6   : > { %141 = sbr.rel (%p138_p2) target bundleno = 359 (0x167), region = 32  ;;  %627 = vmatprep.subr.bf16.mxu1 (!%p138_p2), %v1806_v1  ;;  %v1703_v2 = vld [vmem:[%s2254_s1 + $0x14c] sm:$0xff] (!%p138_p2)   ;;  %1608 = vmatprep.subr.bf16.mxu0 (!%p138_p2), %v1702_v0  ;;  %v1706_v5 = vld [vmem:[%s2254_s1 + $0x154] sm:$0xff] (!%p138_p2)   ;;  %v1709_v8 = vld [vmem:[%s2254_s1 + $0x15c] sm:$0xff] (!%p138_p2)   ;;  %vm327_vm0 = vsmask.f32 (!%p138_p2), 7424 }
   0x7   : > { %v1704_v3 = vld [vmem:[%s2254_s1 + $0xcc] sm:$0xff] (!%p138_p2)   ;;  %628 = vmatpush1.bf16.msra.mxu1 (!%p138_p2), %v1703_v2  ;;  %v1707_v6 = vld [vmem:[%s2254_s1 + $0xd4] sm:$0xff] (!%p138_p2)   ;;  %v1710_v9 = vld [vmem:[%s2254_s1 + $0xdc] sm:$0xff] (!%p138_p2)   ;;  %vm567_vm2 = vcmask (!%p138_p2), 195584   ;;  %vm1004_vm3 = vcmask (!%p138_p2), 1046528   ;;  %vm1326_vm4 = vcmask (!%p138_p2), 781312  }
   0x8   : > { %1609 = vmatpush3.bf16.msra.mxu0 (!%p138_p2), %v1704_v3  ;;  %629 = vmatprep.subr.bf16.mxu1 (!%p138_p2), %v1806_v1  ;;  %v1711_v10 = vld [vmem:[%s2254_s1 + $0x124] sm:$0xff] (!%p138_p2)   ;;  %v1714_v13 = vld [vmem:[%s2254_s1 + $0x12c] sm:$0xff] (!%p138_p2)   ;;  %v1717_v16 = vld [vmem:[%s2254_s1 + $0x134] sm:$0xff] (!%p138_p2)  }
   0x9   : > { %1610 = vmatprep.subr.bf16.mxu0 (!%p138_p2), %v1705_v4  ;;  %v1712_v11 = vld [vmem:[%s2254_s1 + $0x164] sm:$0xff] (!%p138_p2)   ;;  %v1715_v14 = vld [vmem:[%s2254_s1 + $0x16c] sm:$0xff] (!%p138_p2)   ;;  %v1718_v17 = vld [vmem:[%s2254_s1 + $0x174] sm:$0xff] (!%p138_p2)  }
   0xa   : > { %v1713_v12 = vld [vmem:[%s2254_s1 + $0xe4] sm:$0xff] (!%p138_p2)   ;;  %v1716_v15 = vld [vmem:[%s2254_s1 + $0xec] sm:$0xff] (!%p138_p2)   ;;  %v1719_v18 = vld [vmem:[%s2254_s1 + $0xf4] sm:$0xff] (!%p138_p2)  }
   0xb   : > { %630 = vmatpush1.bf16.msra.mxu1 (!%p138_p2), %v1706_v5  ;;  %v1720_v19 = vld [vmem:[%s2254_s1 + $0x13c] sm:$0xff] (!%p138_p2)   ;;  %v1723_v22 = vld [vmem:[%s2254_s1 + $0x144] sm:$0xff] (!%p138_p2)   ;;  %v1729_v38 = vld [vmem:[%s2254_s1 + $0x18c] sm:$0xff] (!%p138_p2)  }
   0xc   : > { %1611 = vmatpush3.bf16.msra.mxu0 (!%p138_p2), %v1707_v6  ;;  %631 = vmatprep.subr.bf16.mxu1 (!%p138_p2), %v1806_v1  ;;  %v1721_v20 = vld [vmem:[%s2254_s1 + $0x17c] sm:$0xff] (!%p138_p2)   ;;  %v1724_v25 = vld [vmem:[%s2254_s1 + $0x184] sm:$0xff] (!%p138_p2)   ;;  %v1734_v43 = vld [vmem:[%s2254_s1 + $0x194] ss:$0 sps:$4 sm:$0xff] (!%p138_p2)  }
   0xd   : > { %1612 = vmatprep.subr.bf16.mxu0 %v1708_v7  ;;  %s2258_s13 = smov (!%p161_p3, %s1386_s13), 1  ;;  %v1722_v21 = vld [vmem:[%s2254_s1 + $0xfc] sm:$0xff]   ;;  %v1725_v29 = vld [vmem:[%s2254_s1 + $0x104] sm:$0xff]   ;;  %v576_v56 = vsel %vm574_vm1, %v1734_v43, 0  ;;  %v1742_v0 = vld [vmem:[%s2254_s1 + $0x50] sm:$0xff]  }
   0xe   : > { %s1692_s21 = smul.u32 80, %s2258_s13  ;;  %v1730_v39 = vld [vmem:[%s2254_s1 + $0x40] sm:$0xff]   ;;  %v1735_v47 = vld [vmem:[%s2254_s1 + $0x48] sm:$0xff]   ;;  %s1603_s29 = sshll.u32 %s2258_s13, 4 }
   0xf   : > { %632 = vmatpush1.bf16.msra.mxu1 %v1709_v8  ;;  %v1733_v42 = vld [vmem:[%s2254_s1] sm:$0xff]   ;;  %v1736_v57 = vld [vmem:[%s2254_s1 + $0x8] sm:$0xff]   ;;  %v1744_v8 = vld [vmem:[%s2254_s1 + $0x10] sm:$0xff]  }
  0x10   : > { %1613 = vmatpush3.bf16.msra.mxu0 %v1710_v9  ;;  %633 = vmatprep.subr.bf16.mxu1 %v1806_v1  ;;  %s1911_s5 = scalar_lea.vmem %s2253_s0, %s1692_s21  ;;  %v1743_v6 = vld [vmem:[%s2254_s1 + $0x80] sm:$0xff]  }
  0x11   : > { %1614 = vmatprep.subr.bf16.mxu0 %v1711_v10  ;;  %v172_v23 = vld [vmem:[%s1911_s5] sm:$0xff]  ;;  %v1922_v24 = vld [vmem:[%s1911_s5 + $0x10] sm:$0xff]  ;;  %v173_v48 = vld [vmem:[%s1911_s5 + $0x8] sm:$0xff] }
  0x12   : > { %v1928_v26 = vcombine.high %v172_v23, %v1922_v24  ;;  %v1931_v27 = vld [vmem:[%s1911_s5 + $0x24] ss:$16 sps:$4 sm:$0xff]   ;;  %v1934_v28 = vcombine.low %v172_v23, %v1922_v24  ;;  %v1944_v33 = vld [vmem:[%s1911_s5 + $0x20] ss:$16 sps:$4 sm:$0xff]   ;;  %v1973_v50 = vld [vmem:[%s1911_s5 + $0x18] sm:$0xff] }
  0x13   : > { %634 = vmatpush1.bf16.msra.mxu1 %v1712_v11  ;;  %v348_v32 = vshll.u32 %v1931_v27, 16  ;;  %v336_v41 = vshll.u32 %v1944_v33, 16  ;;  %v1978_v52 = vcombine.high %v173_v48, %v1973_v50  ;;  %v1981_v53 = vld [vmem:[%s1911_s5 + $0x2c] ss:$16 sps:$4 sm:$0xff]   ;;  %v1984_v54 = vcombine.low %v173_v48, %v1973_v50  ;;  %v1987_v55 = vld [vmem:[%s1911_s5 + $0x28] ss:$16 sps:$4 sm:$0xff]  }
  0x14   : > { %1615 = vmatpush3.bf16.msra.mxu0 %v1713_v12  ;;  %635 = vmatprep.subr.bf16.mxu1 %v1806_v1  ;;  %v341_v30 = vshrl.u32 %v1928_v26, 16  ;;  %v343_v31 = vshll.u32 %v1928_v26, 16  ;;  %v329_v34 = vshrl.u32 %v1934_v28, 16  ;;  %v331_v35 = vshll.u32 %v1934_v28, 16  ;;  %v1745_v10 = vld [vmem:[%s2254_s1 + $0x58] sm:$0xff]  }
  0x15   : > { %1616 = vmatprep.subr.bf16.mxu0 %v1714_v13  ;;  %v1948_v37 = vrot.slane %v348_v32, 1  ;;  %v1964_v46 = vrot.slane %v336_v41, 1  ;;  %v365_v58 = vshrl.u32 %v1978_v52, 16  ;;  %v367_v59 = vshll.u32 %v1978_v52, 16  ;;  %v1746_v13 = vld [vmem:[%s2254_s1 + $0x88] sm:$0xff]  }
  0x16   : > { %v345_v36 = vrot.slane %v343_v31, 1  ;;  %v333_v40 = vrot.slane %v331_v35, 1  ;;  %v372_v60 = vshll.u32 %v1981_v53, 16  ;;  %v353_v61 = vshrl.u32 %v1984_v54, 16  ;;  %v232_v43 = vld [vmem:[%s1911_s5 + $0x48] sm:$0x11] }
  0x17   : > { %636 = vmatpush1.bf16.msra.mxu1 %v1715_v14  ;;  %v355_v62 = vshll.u32 %v1984_v54, 16  ;;  %v360_v63 = vshll.u32 %v1987_v55, 16  ;;  %v369_v2 = vrot.slane %v367_v59, 1  ;;  %v1747_v14 = vld [vmem:[%s2254_s1 + $0x18] sm:$0xff]   ;;  %v392_v35 = vshrl.u32 %v1987_v55, 16 }
  0x18   : > { %1617 = vmatpush3.bf16.msra.mxu0 %v1716_v15  ;;  %637 = vmatprep.subr.bf16.mxu1 %v1806_v1  ;;  %v346_v44 = vor.u32 %v345_v36, %v341_v30  ;;  %v334_v45 = vor.u32 %v333_v40, %v329_v34  ;;  %v2003_v3 = vrot.slane %v372_v60, 1  ;;  %v1748_v15 = vld [vmem:[%s2254_s1 + $0x60] sm:$0xff]   ;;  %v1753_v30 = vld [vmem:[%s2254_s1 + $0x28] sm:$0xff]   ;;  %v1752_v36 = vld [vmem:[%s2254_s1 + $0x98] sm:$0xff]   ;;  %v1012_v60 = vrot.slane %v1987_v55, 1 }
  0x19   : > { %1618 = vmatprep.subr.bf16.mxu0 %v1717_v16  ;;  %v357_v4 = vrot.slane %v355_v62, 1  ;;  %v2005_v5 = vrot.slane %v360_v63, 1  ;;  %v370_v7 = vor.u32 %v369_v2, %v365_v58  ;;  %v384_v16 = vshrl.u32 %v1931_v27, 16  ;;  %v1762_v2 = vld [vmem:[%s2254_s1 + $0xb0] sm:$0xff]  }
  0x1a   : > { %v351_v49 = vsel %vm327_vm0, %v346_v44, %v1948_v37  ;;  %v339_v51 = vsel %vm327_vm0, %v334_v45, %v1964_v46  ;;  %v1758_v44 = vld [vmem:[%s2254_s1 + $0x30] sm:$0xff]   ;;  %v2074_v45 = vcombine.high %v232_v43, %v232_v43 }
  0x1b   : > { %638 = vmatpush1.bf16.msra.mxu1 %v1718_v17  ;;  %610 = vmatprep.mubr.bf16.mxu0 %v351_v49  ;;  %v358_v9 = vor.u32 %v357_v4, %v353_v61  ;;  %v375_v11 = vsel %vm327_vm0, %v370_v7, %v2003_v3  ;;  %v1749_v17 = vld [vmem:[%s2254_s1 + $0x90] sm:$0xff]   ;;  %v1760_v61 = vld [vmem:[%s2254_s1 + $0xa8] sm:$0xff]   ;;  %v1770_v4 = vld [vmem:[%s2254_s1 + $0x198] sm:$0xff]  }
  0x1c   : > { %1619 = vmatpush3.bf16.msra.mxu0 %v1719_v18  ;;  %639 = vmatprep.subr.bf16.mxu1 %v1806_v1  ;;  %v1750_v18 = vld [vmem:[%s2254_s1 + $0x20] sm:$0xff]   ;;  %v404_v49 = vshll.u32 %v2074_v45, 16  ;;  %v1775_v7 = vld [vmem:[%s2254_s1 + $0x1e8] sm:$0xff]  }
  0x1d   : > { %1620 = vmatprep.subr.bf16.mxu0 %v1720_v19  ;;  %1483 = vmatprep.mubr.msk.bf16.mxu1 %vm567_vm2, %v375_v11  ;;  %v363_v12 = vsel %vm327_vm0, %v358_v9, %v2005_v5  ;;  %v376_v19 = vshrl.u32 %v1944_v33, 16  ;;  %v1778_v9 = vld [vmem:[%s2254_s1 + $0x1f0] sm:$0xff]  }
  0x1e   : > { %v406_v58 = vrot.slane %v404_v49, 1  ;;  %v1779_v11 = vld [vmem:[%s2254_s1 + $0x1b0] sm:$0xff]   ;;  %v1794_v49 = vld [vmem:[%s2254_s1 + $0x258] sm:$0xff]  }
  0x1f   : > { %640 = vmatpush1.bf16.msra.mxu1 %v1721_v20  ;;  %v231_v20 = vld [vmem:[%s1911_s5 + $0x40] sm:$0x11]  ;;  %v378_v32 = vor.u32 %v376_v19, %v1964_v46  ;;  %v1455_v46 = vcombine.low %v232_v43, %v232_v43 }
  0x20   : > { %1621 = vmatpush3.bf16.msra.mxu0 %v1722_v21  ;;  %641 = vmatprep.subr.bf16.mxu1 %v1806_v1  ;;  %v1751_v21 = vld [vmem:[%s2254_s1 + $0x68] sm:$0xff]   ;;  %v2046_v23 = vcombine.low %v231_v20, %v231_v20 }
  0x21   : > { %1622 = vmatprep.subr.bf16.mxu0 %v1723_v22  ;;  %v2044_v22 = vcombine.high %v231_v20, %v231_v20  ;;  %v1021_v62 = vrot.slane %v1455_v46, 1 }
  0x22   : > { %v380_v34 = vshll.u32 %v2046_v23, 16 }
  0x23   : > { %642 = vmatpush1.bf16.msra.mxu1 %v1724_v25  ;;  %v400_v25 = vshrl.u32 %v1981_v53, 16  ;;  %v388_v31 = vshll.u32 %v2044_v22, 16  ;;  %v1019_v43 = vrot.slane %v2044_v22, 1  ;;  %v1783_v22 = vld [vmem:[%s2254_s1 + $0x240] sm:$0xff]  }
  0x24   : > { %1623 = vmatpush3.bf16.msra.mxu0 %v1725_v29  ;;  %643 = vmatprep.subr.bf16.mxu1 %v1806_v1  ;;  %v386_v29 = vor.u32 %v384_v16, %v1948_v37  ;;  %v1784_v16 = vld [vmem:[%s2254_s1 + $0x200] sm:$0xff]  }
  0x25   : > { %1636 = vmatprep.subr.bf16.mxu0 %v1730_v39  ;;  %v390_v37 = vrot.slane %v388_v31, 1  ;;  %v1756_v39 = vld [vmem:[%s2254_s1 + $0x70] sm:$0xff]   ;;  %v402_v48 = vor.u32 %v400_v25, %v2003_v3  ;;  %v2104_v3 = vsel %vm1004_vm3, %v1012_v60, %v1021_v62  ;;  %v1006_v25 = vrot.slane %v1944_v33, 1 }
  0x27   : > { %644 = vmatpush1.bf16.msra.mxu1 %v1729_v38  ;;  %611 = vmatmul.mubr.bf16.vlgmr.msra.gmra.mrb[0].mxu0 %v339_v51  ;;  %v382_v38 = vrot.slane %v380_v34, 1  ;;  %v391_v40 = vsel %vm327_vm0, %v386_v29, %v390_v37  ;;  %v394_v51 = vor.u32 %v392_v35, %v2005_v5  ;;  %v1772_v5 = vld [vmem:[%s2254_s1 + $0x1e0] sm:$0xff]   ;;  %v1788_v34 = vld [vmem:[%s2254_s1 + $0x1c8] sm:$0xff]  }
  0x28   : > { %1637 = vmatpush3.bf16.msra.mxu0 %v1733_v42  ;;  %645 = vmatprep.subr.bf16.mxu1 %v1806_v1  ;;  %v1757_v42 = vld [vmem:[%s2254_s1 + $0xa0] sm:$0xff]  }
  0x29   : > { %1638 = vmatprep.subr.bf16.mxu0 %v1735_v47  ;;  %v383_v41 = vsel %vm327_vm0, %v378_v32, %v382_v38  ;;  %618 = vmatprep.mubr.bf16.mxu0 %v391_v40  ;;  %v1759_v47 = vld [vmem:[%s2254_s1 + $0x78] sm:$0xff]   ;;  %v1771_v29 = vld [vmem:[%s2254_s1 + $0x220] sm:$0xff]   ;;  %v1015_v32 = vrot.slane %v1981_v53, 1  ;;  %v1774_v38 = vld [vmem:[%s2254_s1 + $0x228] sm:$0xff]  }
  0x2b   : > { %646 = vmatpush1.bf16.msra.mxu1 %v576_v56  ;;  %v396_v56 = vshll.u32 %v1455_v46, 16  ;;  %v1017_v46 = vrot.slane %v2046_v23, 1  ;;  %v1789_v23 = vld [vmem:[%s2254_s1 + $0x250] sm:$0xff]  }
  0x2c   : > { %1639 = vmatpush3.bf16.msra.mxu0 %v1736_v57  ;;  %891 = vmatprep.subr.bf16.mxu1 %v1806_v1  ;;  %v1761_v57 = vld [vmem:[%s2254_s1 + $0x38] sm:$0xff]  }
  0x2d   : > { %1640 = vmatprep.subr.bf16.mxu0 %v1742_v0  ;;  %v398_v59 = vrot.slane %v396_v56, 1  ;;  %v1769_v0 = vld [vmem:[%s2254_s1 + $0x1d8] sm:$0xff]  }
  0x2e   : > { %660 = vmatmul.mubr.bf16.vlgmr.msra.gmra.mrb[0].mxu1 %v363_v12  ;;  %v1781_v12 = vld [vmem:[%s2254_s1 + $0x1f8] sm:$0xff]  }
  0x2f   : > { %892 = vmatpush1.bf16.msra.mxu1 %v1743_v6  ;;  %619 = vmatmul.mubr.bf16.gmra.mrb[4].mxu0 %v383_v41  ;;  %v399_v63 = vsel %vm327_vm0, %v394_v51, %v398_v59  ;;  %v1764_v6 = vld [vmem:[%s2254_s1 + $0xb8] sm:$0xff]   ;;  %v1791_v41 = vld [vmem:[%s2254_s1 + $0x1d0] sm:$0xff]   ;;  %v1795_v51 = vld [vmem:[%s2254_s1 + $0x260] ss:$0 sps:$4 sm:$0xff]  }
  0x30   : > { %1641 = vmatpush3.bf16.msra.mxu0 %v1744_v8  ;;  %893 = vmatprep.subr.bf16.mxu1 %v1806_v1  ;;  %v1776_v8 = vld [vmem:[%s2254_s1 + $0x1a8] sm:$0xff]   ;;  %v1191_v56 = vsel %vm574_vm1, %v1795_v51, 0 }
  0x31   : > { %1642 = vmatprep.subr.bf16.mxu0 %v1745_v10  ;;  %874 = vmatprep.mubr.bf16.mxu0 %v1928_v26  ;;  %v407_v26 = vsel %vm327_vm0, %v402_v48, %v406_v58  ;;  %v1767_v10 = vld [vmem:[%s2254_s1 + $0xc8] ss:$0 sps:$4 sm:$0xff]  }
  0x32   : > { %1484 = vmatprep.mubr.msk.bf16.mxu1 %vm567_vm2, %v407_v26  ;;  %v1786_v48 = vld [vmem:[%s2254_s1 + $0x248] sm:$0xff]  }
  0x33   : > { %894 = vmatpush1.bf16.msra.mxu1 %v1746_v13  ;;  %v840_v13 = vsel %vm574_vm1, %v1767_v10, 0 }
  0x34   : > { %1643 = vmatpush3.bf16.msra.mxu0 %v1747_v14  ;;  %895 = vmatprep.subr.bf16.mxu1 %v1806_v1  ;;  %v1782_v14 = vld [vmem:[%s2254_s1 + $0x1b8] sm:$0xff]  }
  0x35   : > { %1644 = vmatprep.subr.bf16.mxu0 %v1748_v15  ;;  %v1768_v15 = vld [vmem:[%s2254_s1 + $0x218] sm:$0xff]  }
  0x36   : > { %668 = vmatmul.mubr.bf16.gmra.mrb[4].mxu1 %v399_v63 }
  0x37   : > { %896 = vmatpush1.bf16.msra.mxu1 %v1749_v17  ;;  %1511 = vmatprep.mubr.msk.bf16.mxu1 %vm567_vm2, %v1978_v52  ;;  %v1773_v52 = vld [vmem:[%s2254_s1 + $0x1a0] sm:$0xff]  }
  0x38   : > { %1645 = vmatpush3.bf16.msra.mxu0 %v1750_v18  ;;  %897 = vmatprep.subr.bf16.mxu1 %v1806_v1  ;;  %v940_v17 = vld [vmem:[%s1911_s5] sm:$0xee] }
  0x39   : > { %1646 = vmatprep.subr.bf16.mxu0 %v1751_v21  ;;  %v1785_v18 = vld [vmem:[%s2254_s1 + $0x1c0] sm:$0xff]   ;;  %v1564_v19 = vcombine.low %v940_v17, %v1922_v24  ;;  %v1565_v20 = vcombine.high %v940_v17, %v1922_v24  ;;  %v1009_v21 = vrot.slane %v1931_v27, 1 }
  0x3b   : > { %898 = vmatpush1.bf16.msra.mxu1 %v1752_v36  ;;  %v1005_v24 = vrot.slane %v1564_v19, 1 }
  0x3c   : > { %1647 = vmatpush3.bf16.msra.mxu0 %v1753_v30  ;;  %899 = vmatprep.subr.bf16.mxu1 %v1806_v1  ;;  %v941_v30 = vld [vmem:[%s1911_s5 + $0x8] sm:$0xee]  ;;  %s170_s5 = scalar_lea.vmem %s2256_s3, %s1603_s29 }
  0x3d   : > { %1648 = vmatprep.subr.bf16.mxu0 %v1756_v39  ;;  %v1567_v31 = vcombine.high %v941_v30, %v1973_v50  ;;  %v1007_v36 = vsel %vm1004_vm3, %v1005_v24, %v1006_v25 }
  0x3f   : > { %900 = vmatpush1.bf16.msra.mxu1 %v1757_v42  ;;  %v1777_v42 = vld [vmem:[%s2254_s1 + $0x230] sm:$0xff]  }
  0x40   : > { %1649 = vmatpush3.bf16.msra.mxu0 %v1758_v44  ;;  %901 = vmatprep.subr.bf16.mxu1 %v1806_v1  ;;  %v1020_v44 = vsel %vm1004_vm3, %v1009_v21, %v1019_v43 }
  0x41   : > { %1650 = vmatprep.subr.bf16.mxu0 %v1759_v47  ;;  %v1018_v47 = vsel %vm1004_vm3, %v1006_v25, %v1017_v46 }
  0x43   : > { %902 = vmatpush1.bf16.msra.mxu1 %v1760_v61 }
  0x44   : > { %1651 = vmatpush3.bf16.msra.mxu0 %v1761_v57  ;;  %903 = vmatprep.subr.bf16.mxu1 %v1806_v1  ;;  %v1023_v57 = vrot.slane %v2074_v45, 1 }
  0x45   : > { %1664 = vmatprep.subr.bf16.mxu0 %v1769_v0 }
  0x46   : > { %v1024_v58 = vsel %vm1004_vm3, %v1015_v32, %v1023_v57 }
  0x47   : > { %875 = vmatmul.mubr.bf16.vlgmr.msra.gmra.mrb[8].mxu0 %v1934_v28  ;;  %904 = vmatpush1.bf16.msra.mxu1 %v1762_v2  ;;  %v1766_v28 = vld [vmem:[%s2254_s1 + $0xc0] sm:$0xff]  }
  0x48   : > { %882 = vmatprep.mubr.bf16.mxu0 %v1931_v27  ;;  %1665 = vmatpush3.bf16.msra.mxu0 %v1770_v4  ;;  %v1008_v27 = vrot.slane %v1565_v20, 1 }
  0x49   : > { %1666 = vmatprep.subr.bf16.mxu0 %v1772_v5  ;;  %905 = vmatprep.subr.bf16.mxu1 %v1806_v1 }
  0x4a   : > { %v1010_v35 = vsel %vm1004_vm3, %v1008_v27, %v1009_v21 }
  0x4b   : > { %906 = vmatpush1.bf16.msra.mxu1 %v1764_v6 }
  0x4c   : > { %1667 = vmatpush3.bf16.msra.mxu0 %v1773_v52  ;;  %907 = vmatprep.subr.bf16.mxu1 %v1806_v1 }
  0x4d   : > { %1668 = vmatprep.subr.bf16.mxu0 %v1775_v7 }
  0x4f   : > { %883 = vmatmul.mubr.bf16.gmra.mrb[12].mxu0 %v1944_v33  ;;  %908 = vmatpush1.bf16.msra.mxu1 %v1766_v28  ;;  %v1566_v33 = vcombine.low %v941_v30, %v1973_v50  ;;  %v1790_v50 = vld [vmem:[%s2254_s1 + $0x210] sm:$0xff]  }
  0x50   : > { %1669 = vmatpush3.bf16.msra.mxu0 %v1776_v8  ;;  %909 = vmatprep.subr.bf16.mxu1 %v1806_v1 }
  0x51   : > { %1670 = vmatprep.subr.bf16.mxu0 %v1778_v9  ;;  %v1011_v37 = vrot.slane %v1566_v33, 1  ;;  %1225 = vmatprep.mubr.bf16.mxu0 %v1010_v35 }
  0x53   : > { %910 = vmatpush1.bf16.msra.mxu1 %v840_v13  ;;  %v1013_v39 = vsel %vm1004_vm3, %v1011_v37, %v1012_v60 }
  0x54   : > { %1671 = vmatpush3.bf16.msra.mxu0 %v1779_v11  ;;  %1242 = vmatprep.subr.bf16.mxu1 %v1806_v1 }
  0x55   : > { %1672 = vmatprep.subr.bf16.mxu0 %v1781_v12 }
  0x56   : > { %924 = vmatmul.mubr.bf16.vlgmr.msra.gmra.mrb[8].mxu1 %v1984_v54  ;;  %v1787_v54 = vld [vmem:[%s2254_s1 + $0x208] sm:$0xff]  }
  0x57   : > { %1243 = vmatpush1.bf16.msra.mxu1 %v1768_v15  ;;  %1512 = vmatprep.mubr.msk.bf16.mxu1 %vm567_vm2, %v1981_v53  ;;  %v1014_v53 = vrot.slane %v1567_v31, 1 }
  0x58   : > { %1673 = vmatpush3.bf16.msra.mxu0 %v1782_v14  ;;  %1244 = vmatprep.subr.bf16.mxu1 %v1806_v1 }
  0x59   : > { %1674 = vmatprep.subr.bf16.mxu0 %v1784_v16  ;;  %v1016_v40 = vsel %vm1004_vm3, %v1014_v53, %v1015_v32 }
  0x5b   : > { %1245 = vmatpush1.bf16.msra.mxu1 %v1771_v29 }
  0x5c   : > { %1675 = vmatpush3.bf16.msra.mxu0 %v1785_v18  ;;  %1246 = vmatprep.subr.bf16.mxu1 %v1806_v1 }
  0x5d   : > { %1676 = vmatprep.subr.bf16.mxu0 %v1787_v54 }
  0x5e   : > { %932 = vmatmul.mubr.bf16.gmra.mrb[12].mxu1 %v1987_v55  ;;  %v1780_v55 = vld [vmem:[%s2254_s1 + $0x238] sm:$0xff]  }
  0x5f   : > { %1247 = vmatpush1.bf16.msra.mxu1 %v1774_v38  ;;  %1594 = vmatprep.mubr.msk.bf16.mxu1 %vm567_vm2, %v1016_v40 }
  0x60   : > { %1677 = vmatpush3.bf16.msra.mxu0 %v1788_v34  ;;  %1248 = vmatprep.subr.bf16.mxu1 %v1806_v1 }
  0x61   : > { %1678 = vmatprep.subr.bf16.mxu0 %v1790_v50 }
  0x63   : > { %1249 = vmatpush1.bf16.msra.mxu1 %v1777_v42 }
  0x64   : > { %1679 = vmatpush3.bf16.msra.mxu0 %v1791_v41  ;;  %1250 = vmatprep.subr.bf16.mxu1 %v1806_v1 }
  0x67   : > { %1226 = vmatmul.mubr.bf16.vlgmr.msra.gmra.mrb[16].mxu0 %v1007_v36  ;;  %1251 = vmatpush1.bf16.msra.mxu1 %v1780_v55 }
  0x68   : > { %1233 = vmatprep.mubr.bf16.mxu0 %v1020_v44  ;;  %1252 = vmatprep.subr.bf16.mxu1 %v1806_v1 }
  0x6b   : > { %1253 = vmatpush1.bf16.msra.mxu1 %v1783_v22 }
  0x6c   : > { %1254 = vmatprep.subr.bf16.mxu1 %v1806_v1 }
  0x6f   : > { %1234 = vmatmul.mubr.bf16.gmra.mrb[20].mxu0 %v1018_v47  ;;  %1255 = vmatpush1.bf16.msra.mxu1 %v1786_v48 }
  0x70   : > { %1256 = vmatprep.subr.bf16.mxu1 %v1806_v1 }
  0x73   : > { %1257 = vmatpush1.bf16.msra.mxu1 %v1789_v23 }
  0x74   : > { %1258 = vmatprep.subr.bf16.mxu1 %v1806_v1 }
  0x77   : > { %1259 = vmatpush1.bf16.msra.mxu1 %v1794_v49 }
  0x78   : > { %1260 = vmatprep.subr.bf16.mxu1 %v1806_v1 }
  0x7b   : > { %1261 = vmatpush1.bf16.msra.mxu1 %v1191_v56 }
  0x7e   : > { %1275 = vmatmul.mubr.bf16.vlgmr.msra.gmra.mrb[16].mxu1 %v1013_v39 }
  0x7f   : > { %1595 = vmatprep.mubr.msk.bf16.mxu1 %vm567_vm2, %v1024_v58 }
  0x86   : > { %1283 = vmatmul.mubr.bf16.gmra.mrb[20].mxu1 %v2104_v3 }
  0xfa   : > { %v1624_v59 = vpop.f32.mrb[0].mxu0 }
  0xfb   : > { %v1625_v60 = vpop.f32.mrb[1].mxu0 }
  0xfc   : > { %v1626_v61 = vadd.f32 %v1625_v60, %v1624_v59  ;;  %v1627_v62 = vpop.f32.mrb[2].mxu0 }
  0xfd   : > { %v1628_v26 = vpop.f32.mrb[3].mxu0 }
  0xfe   : > { %v1629_v63 = vadd.f32 %v1628_v26, %v1627_v62  ;;  %v1596_v62 = vld [vmem:[%s2255_s2] ss:$0 sm:$0xff] }
 0x101   : > { %v661_v0 = vpop.f32.mrb[0].mxu1 }
 0x102   : > { %v662_v1 = vadd.f32 %v1626_v61, %v661_v0  ;;  %v663_v2 = vpop.f32.mrb[1].mxu1  ;;  %v1630_v6 = vpop.f32.mrb[4].mxu0 }
 0x103   : > { %v664_v4 = vpop.f32.mrb[2].mxu1  ;;  %v1631_v52 = vpop.f32.mrb[5].mxu0 }
 0x104   : > { %v665_v5 = vadd.f32 %v1629_v63, %v664_v4  ;;  %v666_v45 = vpop.f32.mrb[3].mxu1  ;;  %v1632_v7 = vadd.f32 %v1631_v52, %v1630_v6  ;;  %v1633_v28 = vpop.f32.mrb[6].mxu0 }
 0x105   : > { %v1634_v8 = vpop.f32.mrb[7].mxu0 }
 0x106   : > { %v1635_v9 = vadd.f32 %v1634_v8, %v1633_v28 }
 0x109   : > { %v669_v10 = vpop.f32.mrb[4].mxu1 }
 0x10a   : > { %v670_v3 = vadd.f32 %v1632_v7, %v669_v10  ;;  %v671_v11 = vpop.f32.mrb[5].mxu1 }
 0x10b   : > { %v672_v12 = vpop.f32.mrb[6].mxu1 }
 0x10c   : > { %v673_v14 = vadd.f32 %v1635_v9, %v672_v12  ;;  %v674_v15 = vpop.f32.mrb[7].mxu1 }
 0x11a   : > { %v1652_v13 = vpop.f32.mrb[8].mxu0 }
 0x11b   : > { %v1653_v16 = vpop.f32.mrb[9].mxu0 }
 0x11c   : > { %v1654_v17 = vadd.f32 %v1653_v16, %v1652_v13  ;;  %v1655_v18 = vpop.f32.mrb[10].mxu0 }
 0x11d   : > { %v1656_v19 = vpop.f32.mrb[11].mxu0 }
 0x11e   : > { %v1657_v20 = vadd.f32 %v1656_v19, %v1655_v18  ;;  %v877_v21 = vadd.f32 %v1654_v17, %v662_v1 }
 0x120   : > { %v880_v25 = vadd.f32 %v1657_v20, %v665_v5 }
 0x122   : > { %v1658_v29 = vpop.f32.mrb[12].mxu0 }
 0x123   : > { %v1659_v54 = vpop.f32.mrb[13].mxu0 }
 0x124   : > { %v1660_v30 = vadd.f32 %v1659_v54, %v1658_v29  ;;  %v1661_v24 = vpop.f32.mrb[14].mxu0 }
 0x125   : > { %v1662_v27 = vpop.f32.mrb[15].mxu0 }
 0x126   : > { %v1663_v33 = vadd.f32 %v1662_v27, %v1661_v24  ;;  %v885_v31 = vadd.f32 %v1660_v30, %v670_v3 }
 0x128   : > { %v888_v32 = vadd.f32 %v1663_v33, %v673_v14 }
 0x129   : > { %v925_v34 = vpop.f32.mrb[8].mxu1 }
 0x12a   : > { %v926_v35 = vadd.f32 %v925_v34, %v877_v21  ;;  %v927_v36 = vpop.f32.mrb[9].mxu1 }
 0x12b   : > { %v928_v37 = vpop.f32.mrb[10].mxu1 }
 0x12c   : > { %v929_v38 = vadd.f32 %v928_v37, %v880_v25  ;;  %v930_v50 = vpop.f32.mrb[11].mxu1 }
 0x131   : > { %v933_v53 = vpop.f32.mrb[12].mxu1 }
 0x132   : > { %v934_v39 = vadd.f32 %v933_v53, %v885_v31  ;;  %v935_v40 = vpop.f32.mrb[13].mxu1 }
 0x133   : > { %v936_v41 = vpop.f32.mrb[14].mxu1 }
 0x134   : > { %v937_v42 = vadd.f32 %v936_v41, %v888_v32  ;;  %v938_v43 = vpop.f32.mrb[15].mxu1 }
 0x13a   : > { %v1680_v55 = vpop.f32.mrb[16].mxu0 }
 0x13b   : > { %v1681_v44 = vpop.f32.mrb[17].mxu0 }
 0x13c   : > { %v1682_v46 = vadd.f32 %v1681_v44, %v1680_v55  ;;  %v1683_v22 = vpop.f32.mrb[18].mxu0 }
 0x13d   : > { %v1684_v47 = vpop.f32.mrb[19].mxu0 }
 0x13e   : > { %v1685_v48 = vadd.f32 %v1684_v47, %v1683_v22 }
 0x142   : > { %v1686_v23 = vpop.f32.mrb[20].mxu0 }
 0x143   : > { %v1687_v49 = vpop.f32.mrb[21].mxu0 }
 0x144   : > { %v1688_v51 = vadd.f32 %v1687_v49, %v1686_v23  ;;  %v1689_v56 = vpop.f32.mrb[22].mxu0 }
 0x145   : > { %v1690_v57 = vpop.f32.mrb[23].mxu0 }
 0x146   : > { %v1691_v58 = vadd.f32 %v1690_v57, %v1689_v56 }
 0x151   : > { %v1276_v59 = vpop.f32.mrb[16].mxu1 }
 0x152   : > { %v1277_v60 = vadd.f32 %v1682_v46, %v1276_v59  ;;  %v1278_v61 = vpop.f32.mrb[17].mxu1 }
 0x153   : > { %v1279_v26 = vpop.f32.mrb[18].mxu1 }
 0x154   : > { %v1291_v63 = vadd.f32 %v1277_v60, %v926_v35  ;;  %v1280_v0 = vadd.f32 %v1685_v48, %v1279_v26  ;;  %v1281_v1 = vpop.f32.mrb[19].mxu1 }
 0x156   : > { %v1302_v2 = vadd.f32 %v1596_v62, %v1291_v63  ;;  %v1292_v4 = vadd.f32 %v1280_v0, %v929_v38 }
 0x158   : > { %v1306_v5 = vmax.f32 %v1302_v2, 0.0  ;;  %v1303_v45 = vadd.f32 %v1596_v62, %v1292_v4 }
 0x159   : > { %v1284_v6 = vpop.f32.mrb[20].mxu1 }
 0x15a   : > { %v1604_v52 = vpack.c.bf16 %v1306_v5, %v1306_v5  ;;  %v1307_v7 = vmax.f32 %v1303_v45, 0.0  ;;  %v1285_v28 = vadd.f32 %v1688_v51, %v1284_v6  ;;  %v1286_v8 = vpop.f32.mrb[21].mxu1 }
 0x15b   : > { %v1287_v9 = vpop.f32.mrb[22].mxu1 }
 0x15c   : > { %1327 = vst.msk [vmem:[%s170_s5] sm:$0xf] %vm1326_vm4, %v1604_v52  ;;  %v1605_v10 = vpack.c.bf16 %v1307_v7, %v1307_v7  ;;  %v1293_v3 = vadd.f32 %v1285_v28, %v934_v39  ;;  %v1288_v11 = vadd.f32 %v1691_v58, %v1287_v9  ;;  %v1289_v12 = vpop.f32.mrb[23].mxu1 }
 0x15e   : > { %1328 = vst.msk [vmem:[%s170_s5 + $0x4] sm:$0xf] %vm1326_vm4, %v1605_v10  ;;  %v1304_v13 = vadd.f32 %v1596_v62, %v1293_v3  ;;  %v1294_v14 = vadd.f32 %v1288_v11, %v937_v42 }
 0x160   : > { %v1308_v15 = vmax.f32 %v1304_v13, 0.0  ;;  %v1305_v16 = vadd.f32 %v1596_v62, %v1294_v14 }
 0x162   : > { %v1606_v17 = vpack.c.bf16 %v1308_v15, %v1308_v15  ;;  %v1309_v18 = vmax.f32 %v1305_v16, 0.0 }
 0x164   : > { %1329 = vst.msk [vmem:[%s170_s5 + $0x8] sm:$0xf] %vm1326_vm4, %v1606_v17  ;;  %v1607_v19 = vpack.c.bf16 %v1309_v18, %v1309_v18 }
 0x166   : > { %1330 = vst.msk [vmem:[%s170_s5 + $0xc] sm:$0xf] %vm1326_vm4, %v1607_v19 }
 0x167 PF: > { %s13_s12 = sadd.s32 1, %s1804_s12  }
 0x168   : > { %p10_p4 = scmp.ge.s32.totalorder %s13_s12, 4  }
 0x16a   :  { %12 = sbr.rel (!%p10_p4) target bundleno = 1 (0x1), region = 64 }

</bundles_post_ra>
